<compile_context>
chip_gen: v7x
topology: tpu7x:2x2x1
jax: 0.10.0
libtpu: 0.0.40
codegen_flags: <defaults>
</compile_context>

<pallas_src>
import functools

import jax
import jax.numpy as jnp
from jax.experimental import pallas as pl
from jax.experimental.pallas import tpu as pltpu


def _round_up(a, b):
    return (a + b - 1) // b * b


# ---------------------------------------------------------------------------
# Pallas kernel: multi-tap matmul with fused bias (+ optional residual) epilogue
# ---------------------------------------------------------------------------
def _tap_matmul_kernel(*refs, group_offsets, tile_rows, has_halo, has_residual):
    """out[m, g*Cg:(g+1)*Cg] = sum_t x[m + offset(g,t)] @ W[g,t]  (+ bias [+ residual])."""
    it = iter(refs)
    x_ref = next(it)
    xh_ref = next(it) if has_halo else None
    w_ref = next(it)
    b_ref = next(it)
    res_ref = next(it) if has_residual else None
    o_ref = next(it)

    # Row tile (+ halo rows covering the largest tap offset).  Upcast once to f32 so the
    # static row-shifted slices below operate on unpacked 32-bit sublanes (cheap, known to
    # lower; packed-bf16 sublane shifts are the expensive / fragile case).
    if has_halo:
        x = jnp.concatenate([x_ref[...], xh_ref[...]], axis=0)
    else:
        x = x_ref[...]
    x = x.astype(jnp.float32)

    # Shared residue-shifted copies: one (possibly sublane-misaligned) slice per
    # (offset % 8) class; every per-tap slice below is then 8-row aligned, so a 3x3/4x4
    # conv pays <=3 XLU-rotating relayouts per tile instead of one per tap.  The wrapper
    # pads the conv row width to a multiple of 8 to make this hold.
    all_offs = [d for offs in group_offsets for d in offs]
    residues = sorted({d % 8 for d in all_offs})
    spans = {r: max(d for d in all_offs if d % 8 == r) - r for r in residues}
    xr = {r: x[r:r + tile_rows + spans[r], :] for r in residues}

    wi = 0
    group_accs = []
    for offs in group_offsets:                       # static python -> fully unrolled
        acc = None
        for d in offs:                               # static row offsets
            r = d % 8
            xa = xr[r][d - r:d - r + tile_rows, :].astype(jnp.bfloat16)
            part = jnp.dot(xa, w_ref[wi], preferred_element_type=jnp.float32)
            acc = part if acc is None else acc + part
            wi += 1
        group_accs.append(acc)
    acc = group_accs[0] if len(group_accs) == 1 else jnp.concatenate(group_accs, axis=-1)

    acc = acc + b_ref[...]                           # f32 epilogue (bias)
    if res_ref is not None:
        acc = acc + res_ref[...].astype(jnp.float32) # f32 epilogue (fused residual add)
    o_ref[...] = acc.astype(o_ref.dtype)


# ---------------------------------------------------------------------------
# Wrapper: row-tiled, auto-pipelined tap-conv (conv lowered to shifted matmuls)
# ---------------------------------------------------------------------------
def tap_conv(x_flat, w_taps, bias, group_offsets, *, residual=None,
             out_dtype=jnp.bfloat16, tr=512):
    """x_flat: (R, Cin) bf16 rows of the conv-padded NHWC activation (flattened).
    w_taps: (T, Cin, Cout_g) bf16, group-major tap order matching `group_offsets`.
    bias: (1, G*Cout_g) f32.  residual: optional (R, G*Cout_g), added in the f32 epilogue.
    Output row m, group g: sum over taps of x_flat[m + offset] @ w_tap  (+ bias/residual)."""
    R, Cin = x_flat.shape
    T, Cin_w, Cout_g = w_taps.shape
    assert Cin == Cin_w
    G = len(group_offsets)
    assert T == sum(len(g) for g in group_offsets)
    outw = G * Cout_g
    assert bias.shape == (1, outw)

    halo = max(max(offs) for offs in group_offsets)
    has_halo = halo > 0
    halo_r = _round_up(halo, 8) if has_halo else 0

    # Row tile: a multiple of halo_r (so the halo block's index map is exact), shrunk for
    # small inputs and rebalanced so the last tile is not mostly padding.
    unit = halo_r if has_halo else 8
    tr_eff = _round_up(min(tr, R), unit)
    num_tiles = int(pl.cdiv(R, tr_eff))
    tr_eff = _round_up(-(-R // num_tiles), unit)
    num_tiles = int(pl.cdiv(R, tr_eff))
    Rp = num_tiles * tr_eff

    x_p = jnp.pad(x_flat, ((0, Rp + halo_r - R), (0, 0)))

    args = [x_p]
    in_specs = [pl.BlockSpec((tr_eff, Cin), lambda i: (i, 0))]
    if has_halo:
        halo_stride = tr_eff // halo_r
        args.append(x_p)
        in_specs.append(
            pl.BlockSpec((halo_r, Cin), lambda i, hs=halo_stride: ((i + 1) * hs, 0)))
    args += [w_taps, bias]
    in_specs += [
        pl.BlockSpec((T, Cin, Cout_g), lambda i: (0, 0, 0)),
        pl.BlockSpec((1, outw), lambda i: (0, 0)),
    ]
    if residual is not None:
        res_p = jnp.pad(residual, ((0, Rp - R), (0, 0)))
        args.append(res_p)
        in_specs.append(pl.BlockSpec((tr_eff, outw), lambda i: (i, 0)))

    kernel = functools.partial(
        _tap_matmul_kernel,
        group_offsets=tuple(tuple(g) for g in group_offsets),
        tile_rows=tr_eff,
        has_halo=has_halo,
        has_residual=residual is not None,
    )

    out_isize = jnp.dtype(out_dtype).itemsize
    flops = 2 * Rp * T * Cin * Cout_g
    bytes_accessed = int(
        num_tiles * (tr_eff + halo_r) * Cin * x_p.dtype.itemsize
        + w_taps.size * w_taps.dtype.itemsize
        + Rp * outw * out_isize
        + (Rp * outw * residual.dtype.itemsize if residual is not None else 0))
    # VMEM hint: cover the pipelined blocks plus the in-kernel f32 temporaries while
    # staying under the v7x 64 MiB-per-TensorCore budget.
    per_step = ((tr_eff + halo_r) * Cin * (2 + 4 + 4)    # bf16 block + f32 copy + residue copies
                + T * Cin * Cout_g * 2                    # weight taps
                + tr_eff * outw * (4 + out_isize)         # f32 acc + output block
                + (tr_eff * outw * 2 if residual is not None else 0))
    vmem_limit = int(min(max(32 * 1024 * 1024, 3 * per_step), 48 * 1024 * 1024))

    out = pl.pallas_call(
        kernel,
        out_shape=jax.ShapeDtypeStruct((Rp, outw), out_dtype),
        grid=(num_tiles,),
        in_specs=in_specs,
        out_specs=pl.BlockSpec((tr_eff, outw), lambda i: (i, 0)),
        compiler_params=pltpu.CompilerParams(
            dimension_semantics=("parallel",),
            vmem_limit_bytes=vmem_limit,
        ),
        cost_estimate=pl.CostEstimate(
            flops=flops, transcendentals=0, bytes_accessed=bytes_accessed),
    )(*args)
    return out[:R]


# ---------------------------------------------------------------------------
# One-time parameter preparation (hoisted out of the forward pass)
# ---------------------------------------------------------------------------
def prepare_params(params):
    f32, bf16 = jnp.float32, jnp.bfloat16
    cf = params["lat_b"].shape[0]
    # lat: (Cf, Cb, 1, 1) -> (1 tap, Cb, Cf)
    lat_w = params["lat_w"][:, :, 0, 0].T[None]
    # aa: (Cf, Cf, 3, 3) -> 9 taps (ky, kx) of (Cin, Cout)
    aa_w = jnp.stack([params["aa_w"][:, :, ky, kx].T
                      for ky in range(3) for kx in range(3)], axis=0)
    # top: sub-pixel decomposition of ConvTranspose2d(4, 2, 1):
    #   out[2m+r, 2n+c] = sum_{di,dj} pad1(prev)[m+r+di, n+c+dj] . W[:, :, 3-r-2di, 3-c-2dj]
    top_w = jnp.stack([params["top_w"][:, :, 3 - r - 2 * di, 3 - c - 2 * dj]
                       for r in (0, 1) for c in (0, 1)
                       for di in (0, 1) for dj in (0, 1)], axis=0)       # (16, Cf, Cf)
    return {
        "lat_w": lat_w.astype(bf16),
        "lat_b": params["lat_b"].reshape(1, cf).astype(f32),
        "top_w": top_w.astype(bf16),
        "top_b": jnp.tile(params["top_b"], 4).reshape(1, 4 * cf).astype(f32),
        "aa_w": aa_w.astype(bf16),
        "aa_b": params["aa_b"].reshape(1, cf).astype(f32),
    }


# ---------------------------------------------------------------------------
# FPNStage forward (NCHW in / NCHW out, matching the PyTorch module)
# ---------------------------------------------------------------------------
def fpn_stage_forward(prepared, bbone_nchw, prev_nchw, *, tr=512):
    x = jnp.transpose(bbone_nchw, (0, 2, 3, 1)).astype(jnp.bfloat16)   # (N, H, W, Cb)
    p = jnp.transpose(prev_nchw, (0, 2, 3, 1)).astype(jnp.bfloat16)    # (N, Hp, Wp, Cf)
    N, H, W, Cb = x.shape
    _, Hp, Wp, Cf = p.shape

    # ---- top: ConvTranspose2d(k=4, s=2, p=1), 4 phases x 4 taps, one pallas_call -------
    # Padded width rounded to a multiple of 8 so tap offsets fall into <=3 residue classes.
    Wtp = _round_up(Wp + 2, 8)
    pp = jnp.pad(p, ((0, 0), (1, 1), (1, Wtp - Wp - 1), (0, 0)))        # (N, Hp+2, Wtp, Cf)
    pp_flat = pp.reshape(N * (Hp + 2) * Wtp, Cf)
    top_groups = tuple(
        tuple((r + di) * Wtp + (c + dj) for di in (0, 1) for dj in (0, 1))
        for r in (0, 1) for c in (0, 1))
    top_wide = tap_conv(pp_flat, prepared["top_w"], prepared["top_b"], top_groups, tr=tr)
    top_wide = top_wide.reshape(N, Hp + 2, Wtp, 2, 2, Cf)[:, :Hp, :Wp]  # (N,Hp,Wp,r,c,Cf)
    top = jnp.transpose(top_wide, (0, 1, 3, 2, 4, 5)).reshape(N, 2 * Hp, 2 * Wp, Cf)

    # ---- shape-mismatch fallback: UpsamplingNearest2d(size=(H, W)) ----------------------
    # TODO(synk): the nearest-neighbour resize fallback stays a plain-JAX gather (only hit
    # when 2*prev spatial dims != backbone spatial dims).
    if top.shape[1:3] != (H, W):
        ys = (jnp.arange(H) * top.shape[1]) // H
        xs = (jnp.arange(W) * top.shape[2]) // W
        top = top[:, ys][:, :, xs]

    # ---- lat: 1x1 conv with the (lat + top) residual add fused into the epilogue -------
    s = tap_conv(x.reshape(N * H * W, Cb), prepared["lat_w"], prepared["lat_b"], ((0,),),
                 residual=top.reshape(N * H * W, Cf), tr=tr)
    s = s.reshape(N, H, W, Cf)

    # ---- aa: 3x3 conv (pad 1), 9 taps accumulated in-kernel (no im2col in HBM) ---------
    Wt = _round_up(W + 2, 8)
    sp = jnp.pad(s, ((0, 0), (1, 1), (1, Wt - W - 1), (0, 0)))          # (N, H+2, Wt, Cf)
    aa_groups = (tuple(ky * Wt + kx for ky in range(3) for kx in range(3)),)
    out_wide = tap_conv(sp.reshape(N * (H + 2) * Wt, Cf), prepared["aa_w"],
                        prepared["aa_b"], aa_groups, out_dtype=jnp.float32, tr=tr)
    out = out_wide.reshape(N, H + 2, Wt, Cf)[:, :H, :W]
    return jnp.transpose(out, (0, 3, 1, 2))                             # back to NCHW


# ---------------------------------------------------------------------------
# Deterministic parameter construction (PyTorch shapes)
# ---------------------------------------------------------------------------
def init_params(key, fpn_dim, bbone_dim):
    ks = jax.random.split(key, 6)
    scale = 0.1
    return {
        # nn.Conv2d(bbone_dim, fpn_dim, 1): weight (Cf, Cb, 1, 1)
        "lat_w": scale * jax.random.normal(ks[0], (fpn_dim, bbone_dim, 1, 1), jnp.float32),
        "lat_b": scale * jax.random.normal(ks[1], (fpn_dim,), jnp.float32),
        # nn.ConvTranspose2d(fpn_dim, fpn_dim, 4, 2, 1): weight (Cin, Cout, 4, 4)
        "top_w": scale * jax.random.normal(ks[2], (fpn_dim, fpn_dim, 4, 4), jnp.float32),
        "top_b": scale * jax.random.normal(ks[3], (fpn_dim,), jnp.float32),
        # nn.Conv2d(fpn_dim, fpn_dim, 3, 1, 1): weight (Cf, Cf, 3, 3)
        "aa_w": scale * jax.random.normal(ks[4], (fpn_dim, fpn_dim, 3, 3), jnp.float32),
        "aa_b": scale * jax.random.normal(ks[5], (fpn_dim,), jnp.float32),
    }


if __name__ == "__main__":
    fpn_dim, bbone_dim = 8, 4
    N, H, W = 2, 16, 16

    key = jax.random.PRNGKey(0)
    kp, kx, kf = jax.random.split(key, 3)
    params = init_params(kp, fpn_dim, bbone_dim)
    prepared = prepare_params(params)           # one-time weight prep (not in fwd path)

    # backbone activation (NCHW) and previous FPN stage at half resolution
    bbone = jax.random.normal(kx, (N, bbone_dim, H, W), jnp.float32)
    prev_fpn = jax.random.normal(kf, (N, fpn_dim, H // 2, W // 2), jnp.float32)

    fwd = jax.jit(fpn_stage_forward)
    out = jax.block_until_ready(fwd(prepared, bbone, prev_fpn))
    assert out.shape == (N, fpn_dim, H, W), out.shape
    assert bool(jnp.all(jnp.isfinite(out)))
    print("KERNEL_OK")
</pallas_src>

<mosaic_0001>
module attributes {stable_mosaic.version = 11 : i64} {
  func.func @_tap_matmul_kernel(%arg0: i32, %arg1: memref<320x8xbf16, #tpu.memory_space<vmem>>, %arg2: memref<40x8xbf16, #tpu.memory_space<vmem>>, %arg3: memref<16x8x8xbf16, #tpu.memory_space<vmem>>, %arg4: memref<1x32xf32, #tpu.memory_space<vmem>>, %arg5: memref<320x32xbf16, #tpu.memory_space<vmem>>) attributes {dimension_semantics = [#tpu.dimension_semantics<parallel>], iteration_bounds = array<i64: 1>, scalar_prefetch = 0 : i64, scratch_operands = 0 : i64, tpu.core_type = #tpu.core_type<tc>, window_params = [{transform_indices = @transform_0, window_bounds = array<i64: 320, 8>}, {transform_indices = @transform_1, window_bounds = array<i64: 40, 8>}, {pipeline_mode = #tpu.pipeline_mode<synchronous>, transform_indices = @transform_2, window_bounds = array<i64: 16, 8, 8>}, {pipeline_mode = #tpu.pipeline_mode<synchronous>, transform_indices = @transform_3, window_bounds = array<i64: 1, 32>}, {transform_indices = @transform_4, window_bounds = array<i64: 320, 32>}]} {
    %c0 = arith.constant 0 : index
    %c0_0 = arith.constant 0 : index
    %0 = vector.load %arg1[%c0, %c0_0] : memref<320x8xbf16, #tpu.memory_space<vmem>>, vector<320x8xbf16>
    %c0_1 = arith.constant 0 : index
    %c0_2 = arith.constant 0 : index
    %1 = vector.load %arg2[%c0_1, %c0_2] : memref<40x8xbf16, #tpu.memory_space<vmem>>, vector<40x8xbf16>
    %2 = tpu.concatenate %0, %1 in 0 : vector<320x8xbf16>, vector<40x8xbf16> -> vector<360x8xbf16>
    %3 = arith.extf %2 : vector<360x8xbf16> to vector<360x8xf32>
    %4 = vector.extract_strided_slice %3 {offsets = [0, 0], sizes = [352, 8], strides = [1, 1]} : vector<360x8xf32> to vector<352x8xf32>
    %5 = vector.extract_strided_slice %3 {offsets = [1, 0], sizes = [352, 8], strides = [1, 1]} : vector<360x8xf32> to vector<352x8xf32>
    %6 = vector.extract_strided_slice %3 {offsets = [2, 0], sizes = [352, 8], strides = [1, 1]} : vector<360x8xf32> to vector<352x8xf32>
    %7 = vector.extract_strided_slice %4 {offsets = [0, 0], sizes = [320, 8], strides = [1, 1]} : vector<352x8xf32> to vector<320x8xf32>
    %8 = arith.truncf %7 : vector<320x8xf32> to vector<320x8xbf16>
    %c0_3 = arith.constant 0 : index
    %c0_4 = arith.constant 0 : index
    %c0_5 = arith.constant 0 : index
    %9 = vector.load %arg3[%c0_3, %c0_4, %c0_5] : memref<16x8x8xbf16, #tpu.memory_space<vmem>>, vector<1x8x8xbf16>
    %10 = vector.shape_cast %9 : vector<1x8x8xbf16> to vector<8x8xbf16>
    %cst = arith.constant dense<0.000000e+00> : vector<320x8xf32>
    %11 = tpu.matmul %8, %10, %cst {dimension_numbers = #tpu.dot_dimension_numbers<[1], [0], [0], [1], [0, 0, 1, 1], [], []>} : vector<320x8xbf16>, vector<8x8xbf16>, vector<320x8xf32> -> vector<320x8xf32>
    %12 = vector.extract_strided_slice %5 {offsets = [0, 0], sizes = [320, 8], strides = [1, 1]} : vector<352x8xf32> to vector<320x8xf32>
    %13 = arith.truncf %12 : vector<320x8xf32> to vector<320x8xbf16>
    %c1 = arith.constant 1 : index
    %c0_6 = arith.constant 0 : index
    %c0_7 = arith.constant 0 : index
    %14 = vector.load %arg3[%c1, %c0_6, %c0_7] : memref<16x8x8xbf16, #tpu.memory_space<vmem>>, vector<1x8x8xbf16>
    %15 = vector.shape_cast %14 : vector<1x8x8xbf16> to vector<8x8xbf16>
    %cst_8 = arith.constant dense<0.000000e+00> : vector<320x8xf32>
    %16 = tpu.matmul %13, %15, %cst_8 {dimension_numbers = #tpu.dot_dimension_numbers<[1], [0], [0], [1], [0, 0, 1, 1], [], []>} : vector<320x8xbf16>, vector<8x8xbf16>, vector<320x8xf32> -> vector<320x8xf32>
    %17 = arith.addf %11, %16 : vector<320x8xf32>
    %18 = vector.extract_strided_slice %4 {offsets = [16, 0], sizes = [320, 8], strides = [1, 1]} : vector<352x8xf32> to vector<320x8xf32>
    %19 = arith.truncf %18 : vector<320x8xf32> to vector<320x8xbf16>
    %c2 = arith.constant 2 : index
    %c0_9 = arith.constant 0 : index
    %c0_10 = arith.constant 0 : index
    %20 = vector.load %arg3[%c2, %c0_9, %c0_10] : memref<16x8x8xbf16, #tpu.memory_space<vmem>>, vector<1x8x8xbf16>
    %21 = vector.shape_cast %20 : vector<1x8x8xbf16> to vector<8x8xbf16>
    %cst_11 = arith.constant dense<0.000000e+00> : vector<320x8xf32>
    %22 = tpu.matmul %19, %21, %cst_11 {dimension_numbers = #tpu.dot_dimension_numbers<[1], [0], [0], [1], [0, 0, 1, 1], [], []>} : vector<320x8xbf16>, vector<8x8xbf16>, vector<320x8xf32> -> vector<320x8xf32>
    %23 = arith.addf %17, %22 : vector<320x8xf32>
    %24 = vector.extract_strided_slice %5 {offsets = [16, 0], sizes = [320, 8], strides = [1, 1]} : vector<352x8xf32> to vector<320x8xf32>
    %25 = arith.truncf %24 : vector<320x8xf32> to vector<320x8xbf16>
    %c3 = arith.constant 3 : index
    %c0_12 = arith.constant 0 : index
    %c0_13 = arith.constant 0 : index
    %26 = vector.load %arg3[%c3, %c0_12, %c0_13] : memref<16x8x8xbf16, #tpu.memory_space<vmem>>, vector<1x8x8xbf16>
    %27 = vector.shape_cast %26 : vector<1x8x8xbf16> to vector<8x8xbf16>
    %cst_14 = arith.constant dense<0.000000e+00> : vector<320x8xf32>
    %28 = tpu.matmul %25, %27, %cst_14 {dimension_numbers = #tpu.dot_dimension_numbers<[1], [0], [0], [1], [0, 0, 1, 1], [], []>} : vector<320x8xbf16>, vector<8x8xbf16>, vector<320x8xf32> -> vector<320x8xf32>
    %29 = arith.addf %23, %28 : vector<320x8xf32>
    %30 = vector.extract_strided_slice %5 {offsets = [0, 0], sizes = [320, 8], strides = [1, 1]} : vector<352x8xf32> to vector<320x8xf32>
    %31 = arith.truncf %30 : vector<320x8xf32> to vector<320x8xbf16>
    %c4 = arith.constant 4 : index
    %c0_15 = arith.constant 0 : index
    %c0_16 = arith.constant 0 : index
    %32 = vector.load %arg3[%c4, %c0_15, %c0_16] : memref<16x8x8xbf16, #tpu.memory_space<vmem>>, vector<1x8x8xbf16>
    %33 = vector.shape_cast %32 : vector<1x8x8xbf16> to vector<8x8xbf16>
    %cst_17 = arith.constant dense<0.000000e+00> : vector<320x8xf32>
    %34 = tpu.matmul %31, %33, %cst_17 {dimension_numbers = #tpu.dot_dimension_numbers<[1], [0], [0], [1], [0, 0, 1, 1], [], []>} : vector<320x8xbf16>, vector<8x8xbf16>, vector<320x8xf32> -> vector<320x8xf32>
    %35 = vector.extract_strided_slice %6 {offsets = [0, 0], sizes = [320, 8], strides = [1, 1]} : vector<352x8xf32> to vector<320x8xf32>
    %36 = arith.truncf %35 : vector<320x8xf32> to vector<320x8xbf16>
    %c5 = arith.constant 5 : index
    %c0_18 = arith.constant 0 : index
    %c0_19 = arith.constant 0 : index
    %37 = vector.load %arg3[%c5, %c0_18, %c0_19] : memref<16x8x8xbf16, #tpu.memory_space<vmem>>, vector<1x8x8xbf16>
    %38 = vector.shape_cast %37 : vector<1x8x8xbf16> to vector<8x8xbf16>
    %cst_20 = arith.constant dense<0.000000e+00> : vector<320x8xf32>
    %39 = tpu.matmul %36, %38, %cst_20 {dimension_numbers = #tpu.dot_dimension_numbers<[1], [0], [0], [1], [0, 0, 1, 1], [], []>} : vector<320x8xbf16>, vector<8x8xbf16>, vector<320x8xf32> -> vector<320x8xf32>
    %40 = arith.addf %34, %39 : vector<320x8xf32>
    %41 = vector.extract_strided_slice %5 {offsets = [16, 0], sizes = [320, 8], strides = [1, 1]} : vector<352x8xf32> to vector<320x8xf32>
    %42 = arith.truncf %41 : vector<320x8xf32> to vector<320x8xbf16>
    %c6 = arith.constant 6 : index
    %c0_21 = arith.constant 0 : index
    %c0_22 = arith.constant 0 : index
    %43 = vector.load %arg3[%c6, %c0_21, %c0_22] : memref<16x8x8xbf16, #tpu.memory_space<vmem>>, vector<1x8x8xbf16>
    %44 = vector.shape_cast %43 : vector<1x8x8xbf16> to vector<8x8xbf16>
    %cst_23 = arith.constant dense<0.000000e+00> : vector<320x8xf32>
    %45 = tpu.matmul %42, %44, %cst_23 {dimension_numbers = #tpu.dot_dimension_numbers<[1], [0], [0], [1], [0, 0, 1, 1], [], []>} : vector<320x8xbf16>, vector<8x8xbf16>, vector<320x8xf32> -> vector<320x8xf32>
    %46 = arith.addf %40, %45 : vector<320x8xf32>
    %47 = vector.extract_strided_slice %6 {offsets = [16, 0], sizes = [320, 8], strides = [1, 1]} : vector<352x8xf32> to vector<320x8xf32>
    %48 = arith.truncf %47 : vector<320x8xf32> to vector<320x8xbf16>
    %c7 = arith.constant 7 : index
    %c0_24 = arith.constant 0 : index
    %c0_25 = arith.constant 0 : index
    %49 = vector.load %arg3[%c7, %c0_24, %c0_25] : memref<16x8x8xbf16, #tpu.memory_space<vmem>>, vector<1x8x8xbf16>
    %50 = vector.shape_cast %49 : vector<1x8x8xbf16> to vector<8x8xbf16>
    %cst_26 = arith.constant dense<0.000000e+00> : vector<320x8xf32>
    %51 = tpu.matmul %48, %50, %cst_26 {dimension_numbers = #tpu.dot_dimension_numbers<[1], [0], [0], [1], [0, 0, 1, 1], [], []>} : vector<320x8xbf16>, vector<8x8xbf16>, vector<320x8xf32> -> vector<320x8xf32>
    %52 = arith.addf %46, %51 : vector<320x8xf32>
    %53 = vector.extract_strided_slice %4 {offsets = [16, 0], sizes = [320, 8], strides = [1, 1]} : vector<352x8xf32> to vector<320x8xf32>
    %54 = arith.truncf %53 : vector<320x8xf32> to vector<320x8xbf16>
    %c8 = arith.constant 8 : index
    %c0_27 = arith.constant 0 : index
    %c0_28 = arith.constant 0 : index
    %55 = vector.load %arg3[%c8, %c0_27, %c0_28] : memref<16x8x8xbf16, #tpu.memory_space<vmem>>, vector<1x8x8xbf16>
    %56 = vector.shape_cast %55 : vector<1x8x8xbf16> to vector<8x8xbf16>
    %cst_29 = arith.constant dense<0.000000e+00> : vector<320x8xf32>
    %57 = tpu.matmul %54, %56, %cst_29 {dimension_numbers = #tpu.dot_dimension_numbers<[1], [0], [0], [1], [0, 0, 1, 1], [], []>} : vector<320x8xbf16>, vector<8x8xbf16>, vector<320x8xf32> -> vector<320x8xf32>
    %58 = vector.extract_strided_slice %5 {offsets = [16, 0], sizes = [320, 8], strides = [1, 1]} : vector<352x8xf32> to vector<320x8xf32>
    %59 = arith.truncf %58 : vector<320x8xf32> to vector<320x8xbf16>
    %c9 = arith.constant 9 : index
    %c0_30 = arith.constant 0 : index
    %c0_31 = arith.constant 0 : index
    %60 = vector.load %arg3[%c9, %c0_30, %c0_31] : memref<16x8x8xbf16, #tpu.memory_space<vmem>>, vector<1x8x8xbf16>
    %61 = vector.shape_cast %60 : vector<1x8x8xbf16> to vector<8x8xbf16>
    %cst_32 = arith.constant dense<0.000000e+00> : vector<320x8xf32>
    %62 = tpu.matmul %59, %61, %cst_32 {dimension_numbers = #tpu.dot_dimension_numbers<[1], [0], [0], [1], [0, 0, 1, 1], [], []>} : vector<320x8xbf16>, vector<8x8xbf16>, vector<320x8xf32> -> vector<320x8xf32>
    %63 = arith.addf %57, %62 : vector<320x8xf32>
    %64 = vector.extract_strided_slice %4 {offsets = [32, 0], sizes = [320, 8], strides = [1, 1]} : vector<352x8xf32> to vector<320x8xf32>
    %65 = arith.truncf %64 : vector<320x8xf32> to vector<320x8xbf16>
    %c10 = arith.constant 10 : index
    %c0_33 = arith.constant 0 : index
    %c0_34 = arith.constant 0 : index
    %66 = vector.load %arg3[%c10, %c0_33, %c0_34] : memref<16x8x8xbf16, #tpu.memory_space<vmem>>, vector<1x8x8xbf16>
    %67 = vector.shape_cast %66 : vector<1x8x8xbf16> to vector<8x8xbf16>
    %cst_35 = arith.constant dense<0.000000e+00> : vector<320x8xf32>
    %68 = tpu.matmul %65, %67, %cst_35 {dimension_numbers = #tpu.dot_dimension_numbers<[1], [0], [0], [1], [0, 0, 1, 1], [], []>} : vector<320x8xbf16>, vector<8x8xbf16>, vector<320x8xf32> -> vector<320x8xf32>
    %69 = arith.addf %63, %68 : vector<320x8xf32>
    %70 = vector.extract_strided_slice %5 {offsets = [32, 0], sizes = [320, 8], strides = [1, 1]} : vector<352x8xf32> to vector<320x8xf32>
    %71 = arith.truncf %70 : vector<320x8xf32> to vector<320x8xbf16>
    %c11 = arith.constant 11 : index
    %c0_36 = arith.constant 0 : index
    %c0_37 = arith.constant 0 : index
    %72 = vector.load %arg3[%c11, %c0_36, %c0_37] : memref<16x8x8xbf16, #tpu.memory_space<vmem>>, vector<1x8x8xbf16>
    %73 = vector.shape_cast %72 : vector<1x8x8xbf16> to vector<8x8xbf16>
    %cst_38 = arith.constant dense<0.000000e+00> : vector<320x8xf32>
    %74 = tpu.matmul %71, %73, %cst_38 {dimension_numbers = #tpu.dot_dimension_numbers<[1], [0], [0], [1], [0, 0, 1, 1], [], []>} : vector<320x8xbf16>, vector<8x8xbf16>, vector<320x8xf32> -> vector<320x8xf32>
    %75 = arith.addf %69, %74 : vector<320x8xf32>
    %76 = vector.extract_strided_slice %5 {offsets = [16, 0], sizes = [320, 8], strides = [1, 1]} : vector<352x8xf32> to vector<320x8xf32>
    %77 = arith.truncf %76 : vector<320x8xf32> to vector<320x8xbf16>
    %c12 = arith.constant 12 : index
    %c0_39 = arith.constant 0 : index
    %c0_40 = arith.constant 0 : index
    %78 = vector.load %arg3[%c12, %c0_39, %c0_40] : memref<16x8x8xbf16, #tpu.memory_space<vmem>>, vector<1x8x8xbf16>
    %79 = vector.shape_cast %78 : vector<1x8x8xbf16> to vector<8x8xbf16>
    %cst_41 = arith.constant dense<0.000000e+00> : vector<320x8xf32>
    %80 = tpu.matmul %77, %79, %cst_41 {dimension_numbers = #tpu.dot_dimension_numbers<[1], [0], [0], [1], [0, 0, 1, 1], [], []>} : vector<320x8xbf16>, vector<8x8xbf16>, vector<320x8xf32> -> vector<320x8xf32>
    %81 = vector.extract_strided_slice %6 {offsets = [16, 0], sizes = [320, 8], strides = [1, 1]} : vector<352x8xf32> to vector<320x8xf32>
    %82 = arith.truncf %81 : vector<320x8xf32> to vector<320x8xbf16>
    %c13 = arith.constant 13 : index
    %c0_42 = arith.constant 0 : index
    %c0_43 = arith.constant 0 : index
    %83 = vector.load %arg3[%c13, %c0_42, %c0_43] : memref<16x8x8xbf16, #tpu.memory_space<vmem>>, vector<1x8x8xbf16>
    %84 = vector.shape_cast %83 : vector<1x8x8xbf16> to vector<8x8xbf16>
    %cst_44 = arith.constant dense<0.000000e+00> : vector<320x8xf32>
    %85 = tpu.matmul %82, %84, %cst_44 {dimension_numbers = #tpu.dot_dimension_numbers<[1], [0], [0], [1], [0, 0, 1, 1], [], []>} : vector<320x8xbf16>, vector<8x8xbf16>, vector<320x8xf32> -> vector<320x8xf32>
    %86 = arith.addf %80, %85 : vector<320x8xf32>
    %87 = vector.extract_strided_slice %5 {offsets = [32, 0], sizes = [320, 8], strides = [1, 1]} : vector<352x8xf32> to vector<320x8xf32>
    %88 = arith.truncf %87 : vector<320x8xf32> to vector<320x8xbf16>
    %c14 = arith.constant 14 : index
    %c0_45 = arith.constant 0 : index
    %c0_46 = arith.constant 0 : index
    %89 = vector.load %arg3[%c14, %c0_45, %c0_46] : memref<16x8x8xbf16, #tpu.memory_space<vmem>>, vector<1x8x8xbf16>
    %90 = vector.shape_cast %89 : vector<1x8x8xbf16> to vector<8x8xbf16>
    %cst_47 = arith.constant dense<0.000000e+00> : vector<320x8xf32>
    %91 = tpu.matmul %88, %90, %cst_47 {dimension_numbers = #tpu.dot_dimension_numbers<[1], [0], [0], [1], [0, 0, 1, 1], [], []>} : vector<320x8xbf16>, vector<8x8xbf16>, vector<320x8xf32> -> vector<320x8xf32>
    %92 = arith.addf %86, %91 : vector<320x8xf32>
    %93 = vector.extract_strided_slice %6 {offsets = [32, 0], sizes = [320, 8], strides = [1, 1]} : vector<352x8xf32> to vector<320x8xf32>
    %94 = arith.truncf %93 : vector<320x8xf32> to vector<320x8xbf16>
    %c15 = arith.constant 15 : index
    %c0_48 = arith.constant 0 : index
    %c0_49 = arith.constant 0 : index
    %95 = vector.load %arg3[%c15, %c0_48, %c0_49] : memref<16x8x8xbf16, #tpu.memory_space<vmem>>, vector<1x8x8xbf16>
    %96 = vector.shape_cast %95 : vector<1x8x8xbf16> to vector<8x8xbf16>
    %cst_50 = arith.constant dense<0.000000e+00> : vector<320x8xf32>
    %97 = tpu.matmul %94, %96, %cst_50 {dimension_numbers = #tpu.dot_dimension_numbers<[1], [0], [0], [1], [0, 0, 1, 1], [], []>} : vector<320x8xbf16>, vector<8x8xbf16>, vector<320x8xf32> -> vector<320x8xf32>
    %98 = arith.addf %92, %97 : vector<320x8xf32>
    %99 = tpu.concatenate %29, %52, %75, %98 in 1 : vector<320x8xf32>, vector<320x8xf32>, vector<320x8xf32>, vector<320x8xf32> -> vector<320x32xf32>
    %c0_51 = arith.constant 0 : index
    %c0_52 = arith.constant 0 : index
    %100 = vector.load %arg4[%c0_51, %c0_52] : memref<1x32xf32, #tpu.memory_space<vmem>>, vector<1x32xf32>
    %101 = vector.broadcast %100 : vector<1x32xf32> to vector<320x32xf32>
    %102 = arith.addf %99, %101 : vector<320x32xf32>
    %103 = arith.truncf %102 : vector<320x32xf32> to vector<320x32xbf16>
    %c0_53 = arith.constant 0 : index
    %c0_54 = arith.constant 0 : index
    %104 = vector.load %arg5[%c0_53, %c0_54] : memref<320x32xbf16, #tpu.memory_space<vmem>>, vector<320x32xbf16>
    tpu.vector_store %arg5[%c0_53, %c0_54], %103 {strides = array<i32>} : memref<320x32xbf16, #tpu.memory_space<vmem>>, vector<320x32xbf16>,
    return
  }
  func.func @transform_0(%arg0: i32) -> (i32, i32) {
    %c0_i32 = arith.constant 0 : i32
    %c0_i32_0 = arith.constant 0 : i32
    return %arg0, %c0_i32 : i32, i32
  }
  func.func @transform_1(%arg0: i32) -> (i32, i32) {
    %c1_i32 = arith.constant 1 : i32
    %0 = arith.addi %arg0, %c1_i32 : i32
    %c8_i32 = arith.constant 8 : i32
    %1 = arith.muli %0, %c8_i32 : i32
    %c0_i32 = arith.constant 0 : i32
    %c0_i32_0 = arith.constant 0 : i32
    return %1, %c0_i32 : i32, i32
  }
  func.func @transform_2(%arg0: i32) -> (i32, i32, i32) {
    %c0_i32 = arith.constant 0 : i32
    %c0_i32_0 = arith.constant 0 : i32
    %c0_i32_1 = arith.constant 0 : i32
    %c0_i32_2 = arith.constant 0 : i32
    return %c0_i32, %c0_i32_0, %c0_i32_1 : i32, i32, i32
  }
  func.func @transform_3(%arg0: i32) -> (i32, i32) {
    %c0_i32 = arith.constant 0 : i32
    %c0_i32_0 = arith.constant 0 : i32
    %c0_i32_1 = arith.constant 0 : i32
    return %c0_i32, %c0_i32_0 : i32, i32
  }
  func.func @transform_4(%arg0: i32) -> (i32, i32) {
    %c0_i32 = arith.constant 0 : i32
    %c0_i32_0 = arith.constant 0 : i32
    return %arg0, %c0_i32 : i32, i32
  }
}

module attributes {stable_mosaic.version = 11 : i64} {
  func.func @_tap_matmul_kernel(%arg0: i32, %arg1: memref<512x4xbf16, #tpu.memory_space<vmem>>, %arg2: memref<1x4x8xbf16, #tpu.memory_space<vmem>>, %arg3: memref<1x8xf32, #tpu.memory_space<vmem>>, %arg4: memref<512x8xbf16, #tpu.memory_space<vmem>>, %arg5: memref<512x8xbf16, #tpu.memory_space<vmem>>) attributes {dimension_semantics = [#tpu.dimension_semantics<parallel>], iteration_bounds = array<i64: 1>, scalar_prefetch = 0 : i64, scratch_operands = 0 : i64, tpu.core_type = #tpu.core_type<tc>, window_params = [{transform_indices = @transform_0, window_bounds = array<i64: 512, 4>}, {pipeline_mode = #tpu.pipeline_mode<synchronous>, transform_indices = @transform_1, window_bounds = array<i64: 1, 4, 8>}, {pipeline_mode = #tpu.pipeline_mode<synchronous>, transform_indices = @transform_2, window_bounds = array<i64: 1, 8>}, {transform_indices = @transform_3, window_bounds = array<i64: 512, 8>}, {transform_indices = @transform_4, window_bounds = array<i64: 512, 8>}]} {
    %c0 = arith.constant 0 : index
    %c0_0 = arith.constant 0 : index
    %0 = vector.load %arg1[%c0, %c0_0] : memref<512x4xbf16, #tpu.memory_space<vmem>>, vector<512x4xbf16>
    %1 = arith.extf %0 : vector<512x4xbf16> to vector<512x4xf32>
    %2 = arith.truncf %1 : vector<512x4xf32> to vector<512x4xbf16>
    %c0_1 = arith.constant 0 : index
    %c0_2 = arith.constant 0 : index
    %c0_3 = arith.constant 0 : index
    %3 = vector.load %arg2[%c0_1, %c0_2, %c0_3] : memref<1x4x8xbf16, #tpu.memory_space<vmem>>, vector<1x4x8xbf16>
    %4 = vector.shape_cast %3 : vector<1x4x8xbf16> to vector<4x8xbf16>
    %cst = arith.constant dense<0.000000e+00> : vector<512x8xf32>
    %5 = tpu.matmul %2, %4, %cst {dimension_numbers = #tpu.dot_dimension_numbers<[1], [0], [0], [1], [0, 0, 1, 1], [], []>} : vector<512x4xbf16>, vector<4x8xbf16>, vector<512x8xf32> -> vector<512x8xf32>
    %c0_4 = arith.constant 0 : index
    %c0_5 = arith.constant 0 : index
    %6 = vector.load %arg3[%c0_4, %c0_5] : memref<1x8xf32, #tpu.memory_space<vmem>>, vector<1x8xf32>
    %7 = vector.broadcast %6 : vector<1x8xf32> to vector<512x8xf32>
    %8 = arith.addf %5, %7 : vector<512x8xf32>
    %c0_6 = arith.constant 0 : index
    %c0_7 = arith.constant 0 : index
    %9 = vector.load %arg4[%c0_6, %c0_7] : memref<512x8xbf16, #tpu.memory_space<vmem>>, vector<512x8xbf16>
    %10 = arith.extf %9 : vector<512x8xbf16> to vector<512x8xf32>
    %11 = arith.addf %8, %10 : vector<512x8xf32>
    %12 = arith.truncf %11 : vector<512x8xf32> to vector<512x8xbf16>
    %c0_8 = arith.constant 0 : index
    %c0_9 = arith.constant 0 : index
    %13 = vector.load %arg5[%c0_8, %c0_9] : memref<512x8xbf16, #tpu.memory_space<vmem>>, vector<512x8xbf16>
    tpu.vector_store %arg5[%c0_8, %c0_9], %12 {strides = array<i32>} : memref<512x8xbf16, #tpu.memory_space<vmem>>, vector<512x8xbf16>,
    return
  }
  func.func @transform_0(%arg0: i32) -> (i32, i32) {
    %c0_i32 = arith.constant 0 : i32
    %c0_i32_0 = arith.constant 0 : i32
    return %arg0, %c0_i32 : i32, i32
  }
  func.func @transform_1(%arg0: i32) -> (i32, i32, i32) {
    %c0_i32 = arith.constant 0 : i32
    %c0_i32_0 = arith.constant 0 : i32
    %c0_i32_1 = arith.constant 0 : i32
    %c0_i32_2 = arith.constant 0 : i32
    return %c0_i32, %c0_i32_0, %c0_i32_1 : i32, i32, i32
  }
  func.func @transform_2(%arg0: i32) -> (i32, i32) {
    %c0_i32 = arith.constant 0 : i32
    %c0_i32_0 = arith.constant 0 : i32
    %c0_i32_1 = arith.constant 0 : i32
    return %c0_i32, %c0_i32_0 : i32, i32
  }
  func.func @transform_3(%arg0: i32) -> (i32, i32) {
    %c0_i32 = arith.constant 0 : i32
    %c0_i32_0 = arith.constant 0 : i32
    return %arg0, %c0_i32 : i32, i32
  }
  func.func @transform_4(%arg0: i32) -> (i32, i32) {
    %c0_i32 = arith.constant 0 : i32
    %c0_i32_0 = arith.constant 0 : i32
    return %arg0, %c0_i32 : i32, i32
  }
}

module attributes {stable_mosaic.version = 11 : i64} {
  func.func @_tap_matmul_kernel(%arg0: i32, %arg1: memref<448x8xbf16, #tpu.memory_space<vmem>>, %arg2: memref<56x8xbf16, #tpu.memory_space<vmem>>, %arg3: memref<9x8x8xbf16, #tpu.memory_space<vmem>>, %arg4: memref<1x8xf32, #tpu.memory_space<vmem>>, %arg5: memref<448x8xf32, #tpu.memory_space<vmem>>) attributes {dimension_semantics = [#tpu.dimension_semantics<parallel>], iteration_bounds = array<i64: 2>, scalar_prefetch = 0 : i64, scratch_operands = 0 : i64, tpu.core_type = #tpu.core_type<tc>, window_params = [{transform_indices = @transform_0, window_bounds = array<i64: 448, 8>}, {transform_indices = @transform_1, window_bounds = array<i64: 56, 8>}, {pipeline_mode = #tpu.pipeline_mode<synchronous>, transform_indices = @transform_2, window_bounds = array<i64: 9, 8, 8>}, {pipeline_mode = #tpu.pipeline_mode<synchronous>, transform_indices = @transform_3, window_bounds = array<i64: 1, 8>}, {transform_indices = @transform_4, window_bounds = array<i64: 448, 8>}]} {
    %c0 = arith.constant 0 : index
    %c0_0 = arith.constant 0 : index
    %0 = vector.load %arg1[%c0, %c0_0] : memref<448x8xbf16, #tpu.memory_space<vmem>>, vector<448x8xbf16>
    %c0_1 = arith.constant 0 : index
    %c0_2 = arith.constant 0 : index
    %1 = vector.load %arg2[%c0_1, %c0_2] : memref<56x8xbf16, #tpu.memory_space<vmem>>, vector<56x8xbf16>
    %2 = tpu.concatenate %0, %1 in 0 : vector<448x8xbf16>, vector<56x8xbf16> -> vector<504x8xbf16>
    %3 = arith.extf %2 : vector<504x8xbf16> to vector<504x8xf32>
    %4 = vector.extract_strided_slice %3 {offsets = [0, 0], sizes = [496, 8], strides = [1, 1]} : vector<504x8xf32> to vector<496x8xf32>
    %5 = vector.extract_strided_slice %3 {offsets = [1, 0], sizes = [496, 8], strides = [1, 1]} : vector<504x8xf32> to vector<496x8xf32>
    %6 = vector.extract_strided_slice %3 {offsets = [2, 0], sizes = [496, 8], strides = [1, 1]} : vector<504x8xf32> to vector<496x8xf32>
    %7 = vector.extract_strided_slice %4 {offsets = [0, 0], sizes = [448, 8], strides = [1, 1]} : vector<496x8xf32> to vector<448x8xf32>
    %8 = arith.truncf %7 : vector<448x8xf32> to vector<448x8xbf16>
    %c0_3 = arith.constant 0 : index
    %c0_4 = arith.constant 0 : index
    %c0_5 = arith.constant 0 : index
    %9 = vector.load %arg3[%c0_3, %c0_4, %c0_5] : memref<9x8x8xbf16, #tpu.memory_space<vmem>>, vector<1x8x8xbf16>
    %10 = vector.shape_cast %9 : vector<1x8x8xbf16> to vector<8x8xbf16>
    %cst = arith.constant dense<0.000000e+00> : vector<448x8xf32>
    %11 = tpu.matmul %8, %10, %cst {dimension_numbers = #tpu.dot_dimension_numbers<[1], [0], [0], [1], [0, 0, 1, 1], [], []>} : vector<448x8xbf16>, vector<8x8xbf16>, vector<448x8xf32> -> vector<448x8xf32>
    %12 = vector.extract_strided_slice %5 {offsets = [0, 0], sizes = [448, 8], strides = [1, 1]} : vector<496x8xf32> to vector<448x8xf32>
    %13 = arith.truncf %12 : vector<448x8xf32> to vector<448x8xbf16>
    %c1 = arith.constant 1 : index
    %c0_6 = arith.constant 0 : index
    %c0_7 = arith.constant 0 : index
    %14 = vector.load %arg3[%c1, %c0_6, %c0_7] : memref<9x8x8xbf16, #tpu.memory_space<vmem>>, vector<1x8x8xbf16>
    %15 = vector.shape_cast %14 : vector<1x8x8xbf16> to vector<8x8xbf16>
    %cst_8 = arith.constant dense<0.000000e+00> : vector<448x8xf32>
    %16 = tpu.matmul %13, %15, %cst_8 {dimension_numbers = #tpu.dot_dimension_numbers<[1], [0], [0], [1], [0, 0, 1, 1], [], []>} : vector<448x8xbf16>, vector<8x8xbf16>, vector<448x8xf32> -> vector<448x8xf32>
    %17 = arith.addf %11, %16 : vector<448x8xf32>
    %18 = vector.extract_strided_slice %6 {offsets = [0, 0], sizes = [448, 8], strides = [1, 1]} : vector<496x8xf32> to vector<448x8xf32>
    %19 = arith.truncf %18 : vector<448x8xf32> to vector<448x8xbf16>
    %c2 = arith.constant 2 : index
    %c0_9 = arith.constant 0 : index
    %c0_10 = arith.constant 0 : index
    %20 = vector.load %arg3[%c2, %c0_9, %c0_10] : memref<9x8x8xbf16, #tpu.memory_space<vmem>>, vector<1x8x8xbf16>
    %21 = vector.shape_cast %20 : vector<1x8x8xbf16> to vector<8x8xbf16>
    %cst_11 = arith.constant dense<0.000000e+00> : vector<448x8xf32>
    %22 = tpu.matmul %19, %21, %cst_11 {dimension_numbers = #tpu.dot_dimension_numbers<[1], [0], [0], [1], [0, 0, 1, 1], [], []>} : vector<448x8xbf16>, vector<8x8xbf16>, vector<448x8xf32> -> vector<448x8xf32>
    %23 = arith.addf %17, %22 : vector<448x8xf32>
    %24 = vector.extract_strided_slice %4 {offsets = [24, 0], sizes = [448, 8], strides = [1, 1]} : vector<496x8xf32> to vector<448x8xf32>
    %25 = arith.truncf %24 : vector<448x8xf32> to vector<448x8xbf16>
    %c3 = arith.constant 3 : index
    %c0_12 = arith.constant 0 : index
    %c0_13 = arith.constant 0 : index
    %26 = vector.load %arg3[%c3, %c0_12, %c0_13] : memref<9x8x8xbf16, #tpu.memory_space<vmem>>, vector<1x8x8xbf16>
    %27 = vector.shape_cast %26 : vector<1x8x8xbf16> to vector<8x8xbf16>
    %cst_14 = arith.constant dense<0.000000e+00> : vector<448x8xf32>
    %28 = tpu.matmul %25, %27, %cst_14 {dimension_numbers = #tpu.dot_dimension_numbers<[1], [0], [0], [1], [0, 0, 1, 1], [], []>} : vector<448x8xbf16>, vector<8x8xbf16>, vector<448x8xf32> -> vector<448x8xf32>
    %29 = arith.addf %23, %28 : vector<448x8xf32>
    %30 = vector.extract_strided_slice %5 {offsets = [24, 0], sizes = [448, 8], strides = [1, 1]} : vector<496x8xf32> to vector<448x8xf32>
    %31 = arith.truncf %30 : vector<448x8xf32> to vector<448x8xbf16>
    %c4 = arith.constant 4 : index
    %c0_15 = arith.constant 0 : index
    %c0_16 = arith.constant 0 : index
    %32 = vector.load %arg3[%c4, %c0_15, %c0_16] : memref<9x8x8xbf16, #tpu.memory_space<vmem>>, vector<1x8x8xbf16>
    %33 = vector.shape_cast %32 : vector<1x8x8xbf16> to vector<8x8xbf16>
    %cst_17 = arith.constant dense<0.000000e+00> : vector<448x8xf32>
    %34 = tpu.matmul %31, %33, %cst_17 {dimension_numbers = #tpu.dot_dimension_numbers<[1], [0], [0], [1], [0, 0, 1, 1], [], []>} : vector<448x8xbf16>, vector<8x8xbf16>, vector<448x8xf32> -> vector<448x8xf32>
    %35 = arith.addf %29, %34 : vector<448x8xf32>
    %36 = vector.extract_strided_slice %6 {offsets = [24, 0], sizes = [448, 8], strides = [1, 1]} : vector<496x8xf32> to vector<448x8xf32>
    %37 = arith.truncf %36 : vector<448x8xf32> to vector<448x8xbf16>
    %c5 = arith.constant 5 : index
    %c0_18 = arith.constant 0 : index
    %c0_19 = arith.constant 0 : index
    %38 = vector.load %arg3[%c5, %c0_18, %c0_19] : memref<9x8x8xbf16, #tpu.memory_space<vmem>>, vector<1x8x8xbf16>
    %39 = vector.shape_cast %38 : vector<1x8x8xbf16> to vector<8x8xbf16>
    %cst_20 = arith.constant dense<0.000000e+00> : vector<448x8xf32>
    %40 = tpu.matmul %37, %39, %cst_20 {dimension_numbers = #tpu.dot_dimension_numbers<[1], [0], [0], [1], [0, 0, 1, 1], [], []>} : vector<448x8xbf16>, vector<8x8xbf16>, vector<448x8xf32> -> vector<448x8xf32>
    %41 = arith.addf %35, %40 : vector<448x8xf32>
    %42 = vector.extract_strided_slice %4 {offsets = [48, 0], sizes = [448, 8], strides = [1, 1]} : vector<496x8xf32> to vector<448x8xf32>
    %43 = arith.truncf %42 : vector<448x8xf32> to vector<448x8xbf16>
    %c6 = arith.constant 6 : index
    %c0_21 = arith.constant 0 : index
    %c0_22 = arith.constant 0 : index
    %44 = vector.load %arg3[%c6, %c0_21, %c0_22] : memref<9x8x8xbf16, #tpu.memory_space<vmem>>, vector<1x8x8xbf16>
    %45 = vector.shape_cast %44 : vector<1x8x8xbf16> to vector<8x8xbf16>
    %cst_23 = arith.constant dense<0.000000e+00> : vector<448x8xf32>
    %46 = tpu.matmul %43, %45, %cst_23 {dimension_numbers = #tpu.dot_dimension_numbers<[1], [0], [0], [1], [0, 0, 1, 1], [], []>} : vector<448x8xbf16>, vector<8x8xbf16>, vector<448x8xf32> -> vector<448x8xf32>
    %47 = arith.addf %41, %46 : vector<448x8xf32>
    %48 = vector.extract_strided_slice %5 {offsets = [48, 0], sizes = [448, 8], strides = [1, 1]} : vector<496x8xf32> to vector<448x8xf32>
    %49 = arith.truncf %48 : vector<448x8xf32> to vector<448x8xbf16>
    %c7 = arith.constant 7 : index
    %c0_24 = arith.constant 0 : index
    %c0_25 = arith.constant 0 : index
    %50 = vector.load %arg3[%c7, %c0_24, %c0_25] : memref<9x8x8xbf16, #tpu.memory_space<vmem>>, vector<1x8x8xbf16>
    %51 = vector.shape_cast %50 : vector<1x8x8xbf16> to vector<8x8xbf16>
    %cst_26 = arith.constant dense<0.000000e+00> : vector<448x8xf32>
    %52 = tpu.matmul %49, %51, %cst_26 {dimension_numbers = #tpu.dot_dimension_numbers<[1], [0], [0], [1], [0, 0, 1, 1], [], []>} : vector<448x8xbf16>, vector<8x8xbf16>, vector<448x8xf32> -> vector<448x8xf32>
    %53 = arith.addf %47, %52 : vector<448x8xf32>
    %54 = vector.extract_strided_slice %6 {offsets = [48, 0], sizes = [448, 8], strides = [1, 1]} : vector<496x8xf32> to vector<448x8xf32>
    %55 = arith.truncf %54 : vector<448x8xf32> to vector<448x8xbf16>
    %c8 = arith.constant 8 : index
    %c0_27 = arith.constant 0 : index
    %c0_28 = arith.constant 0 : index
    %56 = vector.load %arg3[%c8, %c0_27, %c0_28] : memref<9x8x8xbf16, #tpu.memory_space<vmem>>, vector<1x8x8xbf16>
    %57 = vector.shape_cast %56 : vector<1x8x8xbf16> to vector<8x8xbf16>
    %cst_29 = arith.constant dense<0.000000e+00> : vector<448x8xf32>
    %58 = tpu.matmul %55, %57, %cst_29 {dimension_numbers = #tpu.dot_dimension_numbers<[1], [0], [0], [1], [0, 0, 1, 1], [], []>} : vector<448x8xbf16>, vector<8x8xbf16>, vector<448x8xf32> -> vector<448x8xf32>
    %59 = arith.addf %53, %58 : vector<448x8xf32>
    %c0_30 = arith.constant 0 : index
    %c0_31 = arith.constant 0 : index
    %60 = vector.load %arg4[%c0_30, %c0_31] : memref<1x8xf32, #tpu.memory_space<vmem>>, vector<1x8xf32>
    %61 = vector.broadcast %60 : vector<1x8xf32> to vector<448x8xf32>
    %62 = arith.addf %59, %61 : vector<448x8xf32>
    %c0_32 = arith.constant 0 : index
    %c0_33 = arith.constant 0 : index
    %63 = vector.load %arg5[%c0_32, %c0_33] : memref<448x8xf32, #tpu.memory_space<vmem>>, vector<448x8xf32>
    tpu.vector_store %arg5[%c0_32, %c0_33], %62 {strides = array<i32>} : memref<448x8xf32, #tpu.memory_space<vmem>>, vector<448x8xf32>,
    return
  }
  func.func @transform_0(%arg0: i32) -> (i32, i32) {
    %c0_i32 = arith.constant 0 : i32
    %c0_i32_0 = arith.constant 0 : i32
    return %arg0, %c0_i32 : i32, i32
  }
  func.func @transform_1(%arg0: i32) -> (i32, i32) {
    %c1_i32 = arith.constant 1 : i32
    %0 = arith.addi %arg0, %c1_i32 : i32
    %c8_i32 = arith.constant 8 : i32
    %1 = arith.muli %0, %c8_i32 : i32
    %c0_i32 = arith.constant 0 : i32
    %c0_i32_0 = arith.constant 0 : i32
    return %1, %c0_i32 : i32, i32
  }
  func.func @transform_2(%arg0: i32) -> (i32, i32, i32) {
    %c0_i32 = arith.constant 0 : i32
    %c0_i32_0 = arith.constant 0 : i32
    %c0_i32_1 = arith.constant 0 : i32
    %c0_i32_2 = arith.constant 0 : i32
    return %c0_i32, %c0_i32_0, %c0_i32_1 : i32, i32, i32
  }
  func.func @transform_3(%arg0: i32) -> (i32, i32) {
    %c0_i32 = arith.constant 0 : i32
    %c0_i32_0 = arith.constant 0 : i32
    %c0_i32_1 = arith.constant 0 : i32
    return %c0_i32, %c0_i32_0 : i32, i32
  }
  func.func @transform_4(%arg0: i32) -> (i32, i32) {
    %c0_i32 = arith.constant 0 : i32
    %c0_i32_0 = arith.constant 0 : i32
    return %arg0, %c0_i32 : i32, i32
  }
}

</mosaic_0001>

<bundles_post_ra>
// kernel: fpn_stage_forward.4
= control target key start
LH: loop header
LB: loop body
LE: loop exit
PB: predicated region body
PF: predicated region fallthrough
CT: control target
= control target key end

     0   :  { %vm347_vm0 = vcmask 1041408   ;;  %vm250_vm1 = vcmask 31744   ;;  %vm1088_vm2 = vcmask 60416   ;;  %s2221_s1 = inlined_call_operand.vmem [shape: bf16[1,4,8], index: 1, kind: input, shape index: {}]   ;;  %s2222_s0 = inlined_call_operand.vmem [shape: bf16[512,4], index: 0, kind: input, shape index: {}]   ;;  %s2223_s3 = inlined_call_operand.vmem [shape: bf16[512,8], index: 3, kind: input, shape index: {}]   ;;  %s2224_s2 = inlined_call_operand.vmem [shape: f32[1,8], index: 2, kind: input, shape index: {}]   ;;  %s2225_s4 = inlined_call_operand.vmem [shape: bf16[512,8], index: 4, kind: output, shape index: {}]  }
   0x1   :  { %v82_v0 = vld [vmem:[%s2221_s1] sm:$0x3]  ;;  %v1614_v4 = vld [vmem:[%s2222_s0 + $0x8] sm:$0xff]   ;;  %v1616_v6 = vld [vmem:[%s2222_s0 + $0x10] sm:$0xff]  }
   0x2   :  { %1610 = vmatprep.subr.msk.bf16.mxu0 %vm347_vm0, %v82_v0  ;;  %1611 = vmatprep.subr.msk.bf16.mxu1 %vm347_vm0, %v82_v0  ;;  %v349_v1 = vsel %vm347_vm0, %v82_v0, 0  ;;  %v1612_v2 = vld [vmem:[%s2222_s0] sm:$0xff]   ;;  %v1615_v5 = vld [vmem:[%s2222_s0 + $0x88] sm:$0xff]   ;;  %v1617_v7 = vld [vmem:[%s2222_s0 + $0x90] sm:$0xff]  }
   0x3   :  { %1543 = vmatpush3.bf16.msra.mxu0 %v349_v1  ;;  %1609 = vmatpush3.bf16.msra.mxu1 %v349_v1  ;;  %v1613_v3 = vld [vmem:[%s2222_s0 + $0x80] sm:$0xff]   ;;  %v1618_v8 = vld [vmem:[%s2222_s0 + $0x18] sm:$0xff]   ;;  %v1622_v12 = vld [vmem:[%s2222_s0 + $0x28] sm:$0xff]  }
   0x4   :  { %1544 = vmatprep.mubr.msk.bf16.mxu0 %vm250_vm1, %v1612_v2  ;;  %1576 = vmatprep.mubr.msk.bf16.mxu1 %vm250_vm1, %v1613_v3  ;;  %v1619_v9 = vld [vmem:[%s2222_s0 + $0x98] sm:$0xff]   ;;  %v1620_v10 = vld [vmem:[%s2222_s0 + $0x20] sm:$0xff]   ;;  %v1623_v13 = vld [vmem:[%s2222_s0 + $0xa8] sm:$0xff]  }
   0x5   :  { %v1621_v11 = vld [vmem:[%s2222_s0 + $0xa0] sm:$0xff]   ;;  %v1624_v14 = vld [vmem:[%s2222_s0 + $0x30] sm:$0xff]   ;;  %v1626_v16 = vld [vmem:[%s2222_s0 + $0x38] sm:$0xff]  }
   0x6   :  { %1545 = vmatmul.mubr.msk.bf16.vlgmr.msra.gmra.mrb[0].mxu0 %vm250_vm1, %v1614_v4  ;;  %1577 = vmatmul.mubr.msk.bf16.vlgmr.msra.gmra.mrb[0].mxu1 %vm250_vm1, %v1615_v5  ;;  %v1625_v15 = vld [vmem:[%s2222_s0 + $0xb0] sm:$0xff]   ;;  %v1627_v17 = vld [vmem:[%s2222_s0 + $0xb8] sm:$0xff]   ;;  %v1628_v18 = vld [vmem:[%s2222_s0 + $0x40] sm:$0xff]  }
   0x7   :  { %1548 = vmatprep.mubr.msk.bf16.mxu0 %vm250_vm1, %v1616_v6  ;;  %1580 = vmatprep.mubr.msk.bf16.mxu1 %vm250_vm1, %v1617_v7  ;;  %v1629_v19 = vld [vmem:[%s2222_s0 + $0xc0] sm:$0xff]   ;;  %v1630_v20 = vld [vmem:[%s2222_s0 + $0x48] sm:$0xff]   ;;  %v1632_v22 = vld [vmem:[%s2222_s0 + $0x50] sm:$0xff]  }
   0x8   :  { %v1631_v21 = vld [vmem:[%s2222_s0 + $0xc8] sm:$0xff]   ;;  %v1633_v23 = vld [vmem:[%s2222_s0 + $0xd0] sm:$0xff]   ;;  %v1634_v24 = vld [vmem:[%s2222_s0 + $0x58] sm:$0xff]  }
   0x9   :  { %v1635_v25 = vld [vmem:[%s2222_s0 + $0xd8] sm:$0xff]   ;;  %v1636_v26 = vld [vmem:[%s2222_s0 + $0x60] sm:$0xff]   ;;  %v1638_v28 = vld [vmem:[%s2222_s0 + $0x68] sm:$0xff]  }
   0xa   :  { %v1637_v27 = vld [vmem:[%s2222_s0 + $0xe0] sm:$0xff]   ;;  %v1639_v29 = vld [vmem:[%s2222_s0 + $0xe8] sm:$0xff]   ;;  %v1640_v30 = vld [vmem:[%s2222_s0 + $0x70] sm:$0xff]  }
   0xb   :  { %v1641_v31 = vld [vmem:[%s2222_s0 + $0xf0] sm:$0xff]   ;;  %v1642_v32 = vld [vmem:[%s2222_s0 + $0x78] sm:$0xff]   ;;  %v1478_v34 = vld [vmem:[%s2223_s3 + $0x8] sm:$0xff]  }
   0xc   :  { %v1643_v33 = vld [vmem:[%s2222_s0 + $0xf8] sm:$0xff]   ;;  %v1494_v35 = vld [vmem:[%s2223_s3 + $0x88] sm:$0xff]   ;;  %v1351_v36 = vld [vmem:[%s2223_s3] sm:$0xff]   ;;  %v1356_v39 = vunpack.c.l.bf16 %v1478_v34  ;;  %v1357_v47 = vunpack.c.h.bf16 %v1478_v34 }
   0xd   :  { %v1812_v37 = vld [vmem:[%s2224_s2] ss:$0 sm:$0xff]  ;;  %v1420_v41 = vunpack.c.l.bf16 %v1494_v35  ;;  %v1352_v42 = vunpack.c.l.bf16 %v1351_v36  ;;  %v1421_v48 = vunpack.c.h.bf16 %v1494_v35  ;;  %v1353_v53 = vunpack.c.h.bf16 %v1351_v36  ;;  %v1480_v1 = vld [vmem:[%s2223_s3 + $0x18] sm:$0xff]   ;;  %v1479_v7 = vld [vmem:[%s2223_s3 + $0x10] sm:$0xff]  }
   0xe   :  { %1549 = vmatmul.mubr.msk.bf16.gmra.mrb[4].mxu0 %vm250_vm1, %v1618_v8  ;;  %1581 = vmatmul.mubr.msk.bf16.gmra.mrb[4].mxu1 %vm250_vm1, %v1619_v9  ;;  %v1493_v38 = vld [vmem:[%s2223_s3 + $0x80] sm:$0xff]   ;;  %v1496_v6 = vld [vmem:[%s2223_s3 + $0x98] sm:$0xff]  }
   0xf   :  { %1552 = vmatprep.mubr.msk.bf16.mxu0 %vm250_vm1, %v1620_v10  ;;  %1584 = vmatprep.mubr.msk.bf16.mxu1 %vm250_vm1, %v1621_v11  ;;  %v1416_v46 = vunpack.c.l.bf16 %v1493_v38  ;;  %v1417_v59 = vunpack.c.h.bf16 %v1493_v38 }
  0x16   :  { %1553 = vmatmul.mubr.msk.bf16.gmra.mrb[8].mxu0 %vm250_vm1, %v1622_v12  ;;  %1585 = vmatmul.mubr.msk.bf16.gmra.mrb[8].mxu1 %vm250_vm1, %v1623_v13  ;;  %v1495_v12 = vld [vmem:[%s2223_s3 + $0x90] sm:$0xff]  }
  0x17   :  { %1556 = vmatprep.mubr.msk.bf16.mxu0 %vm250_vm1, %v1624_v14  ;;  %1588 = vmatprep.mubr.msk.bf16.mxu1 %vm250_vm1, %v1625_v15 }
  0x1e   :  { %1557 = vmatmul.mubr.msk.bf16.gmra.mrb[12].mxu0 %vm250_vm1, %v1626_v16  ;;  %1589 = vmatmul.mubr.msk.bf16.gmra.mrb[12].mxu1 %vm250_vm1, %v1627_v17  ;;  %v1364_v16 = vunpack.c.l.bf16 %v1480_v1 }
  0x1f   :  { %1560 = vmatprep.mubr.msk.bf16.mxu0 %vm250_vm1, %v1628_v18  ;;  %1592 = vmatprep.mubr.msk.bf16.mxu1 %vm250_vm1, %v1629_v19 }
  0x26   :  { %1561 = vmatmul.mubr.msk.bf16.gmra.mrb[16].mxu0 %vm250_vm1, %v1630_v20  ;;  %1593 = vmatmul.mubr.msk.bf16.gmra.mrb[16].mxu1 %vm250_vm1, %v1631_v21  ;;  %v1428_v20 = vunpack.c.l.bf16 %v1496_v6  ;;  %v1360_v21 = vunpack.c.l.bf16 %v1479_v7 }
  0x27   :  { %1564 = vmatprep.mubr.msk.bf16.mxu0 %vm250_vm1, %v1632_v22  ;;  %1596 = vmatprep.mubr.msk.bf16.mxu1 %vm250_vm1, %v1633_v23 }
  0x2e   :  { %1565 = vmatmul.mubr.msk.bf16.gmra.mrb[20].mxu0 %vm250_vm1, %v1634_v24  ;;  %1597 = vmatmul.mubr.msk.bf16.gmra.mrb[20].mxu1 %vm250_vm1, %v1635_v25 }
  0x2f   :  { %1568 = vmatprep.mubr.msk.bf16.mxu0 %vm250_vm1, %v1636_v26  ;;  %1600 = vmatprep.mubr.msk.bf16.mxu1 %vm250_vm1, %v1637_v27  ;;  %v1424_v26 = vunpack.c.l.bf16 %v1495_v12  ;;  %v1365_v27 = vunpack.c.h.bf16 %v1480_v1 }
  0x36   :  { %1569 = vmatmul.mubr.msk.bf16.gmra.mrb[24].mxu0 %vm250_vm1, %v1638_v28  ;;  %1601 = vmatmul.mubr.msk.bf16.gmra.mrb[24].mxu1 %vm250_vm1, %v1639_v29 }
  0x37   :  { %1572 = vmatprep.mubr.msk.bf16.mxu0 %vm250_vm1, %v1640_v30  ;;  %1604 = vmatprep.mubr.msk.bf16.mxu1 %vm250_vm1, %v1641_v31 }
  0x3e   :  { %1573 = vmatmul.mubr.msk.bf16.gmra.mrb[28].mxu0 %vm250_vm1, %v1642_v32  ;;  %1605 = vmatmul.mubr.msk.bf16.gmra.mrb[28].mxu1 %vm250_vm1, %v1643_v33  ;;  %v1429_v32 = vunpack.c.h.bf16 %v1496_v6  ;;  %v1361_v33 = vunpack.c.h.bf16 %v1479_v7 }
  0xd9   :  { %v1546_v40 = vpop.f32.mrb[0].mxu0  ;;  %v1578_v44 = vpop.f32.mrb[0].mxu1 }
  0xda   :  { %v394_v43 = vadd.f32 %v1546_v40, %v1812_v37  ;;  %v385_v45 = vpop.f32.mrb[1].mxu0  ;;  %v522_v49 = vadd.f32 %v1578_v44, %v1812_v37  ;;  %v513_v51 = vpop.f32.mrb[1].mxu1  ;;  %v1425_v40 = vunpack.c.h.bf16 %v1495_v12 }
  0xdb   :  { %v386_v50 = vadd.f32 %v1812_v37, %v385_v45  ;;  %v1547_v52 = vpop.f32.mrb[2].mxu0  ;;  %v514_v55 = vadd.f32 %v1812_v37, %v513_v51  ;;  %v1579_v57 = vpop.f32.mrb[2].mxu1  ;;  %v1498_v51 = vld [vmem:[%s2223_s3 + $0xa8] sm:$0xff]  }
  0xdc   :  { %v770_v54 = vadd.f32 %v1356_v39, %v394_v43  ;;  %v397_v56 = vadd.f32 %v1547_v52, %v1812_v37  ;;  %v388_v58 = vpop.f32.mrb[3].mxu0  ;;  %v802_v60 = vadd.f32 %v1420_v41, %v522_v49  ;;  %v525_v62 = vadd.f32 %v1579_v57, %v1812_v37  ;;  %v516_v0 = vpop.f32.mrb[3].mxu1  ;;  %v1481_v52 = vld [vmem:[%s2223_s3 + $0x20] sm:$0xff]  }
  0xdd   :  { %v768_v61 = vadd.f32 %v1352_v42, %v386_v50  ;;  %v389_v63 = vadd.f32 %v1812_v37, %v388_v58  ;;  %v800_v3 = vadd.f32 %v1416_v46, %v514_v55  ;;  %v517_v5 = vadd.f32 %v1812_v37, %v516_v0  ;;  %v1482_v46 = vld [vmem:[%s2223_s3 + $0x28] sm:$0xff]   ;;  %v1497_v57 = vld [vmem:[%s2223_s3 + $0xa0] sm:$0xff]  }
  0xde   :  { %v1288_v2 = vpack.c.bf16 %v770_v54, %v770_v54  ;;  %v771_v4 = vadd.f32 %v1357_v47, %v397_v56  ;;  %v1320_v8 = vpack.c.bf16 %v802_v60, %v802_v60  ;;  %v803_v10 = vadd.f32 %v1421_v48, %v525_v62 }
  0xdf   :  { %v1286_v9 = vpack.c.bf16 %v768_v61, %v768_v61  ;;  %v769_v11 = vadd.f32 %v1353_v53, %v389_v63  ;;  %v1318_v13 = vpack.c.bf16 %v800_v3, %v800_v3  ;;  %v801_v15 = vadd.f32 %v1417_v59, %v517_v5 }
  0xe0   :  { %1091 = vst.msk [vmem:[%s2225_s4 + $0x8] sm:$0xf] %vm1088_vm2, %v1288_v2  ;;  %v1289_v14 = vpack.c.bf16 %v771_v4, %v771_v4  ;;  %1123 = vst.msk [vmem:[%s2225_s4 + $0x88] sm:$0xf] %vm1088_vm2, %v1320_v8  ;;  %v1321_v17 = vpack.c.bf16 %v803_v10, %v803_v10  ;;  %v1372_v61 = vunpack.c.l.bf16 %v1482_v46  ;;  %v1436_v1 = vunpack.c.l.bf16 %v1498_v51 }
  0xe1   :  { %1089 = vst.msk [vmem:[%s2225_s4] sm:$0xf] %vm1088_vm2, %v1286_v9  ;;  %v1287_v18 = vpack.c.bf16 %v769_v11, %v769_v11  ;;  %v1550_v19 = vpop.f32.mrb[4].mxu0  ;;  %1121 = vst.msk [vmem:[%s2225_s4 + $0x80] sm:$0xf] %vm1088_vm2, %v1318_v13  ;;  %v1319_v22 = vpack.c.bf16 %v801_v15, %v801_v15  ;;  %v1582_v24 = vpop.f32.mrb[4].mxu1  ;;  %v1368_v2 = vunpack.c.l.bf16 %v1481_v52  ;;  %v1432_v7 = vunpack.c.l.bf16 %v1497_v57 }
  0xe2   :  { %1092 = vst.msk [vmem:[%s2225_s4 + $0xc] sm:$0xf] %vm1088_vm2, %v1289_v14  ;;  %v410_v23 = vadd.f32 %v1550_v19, %v1812_v37  ;;  %v401_v25 = vpop.f32.mrb[5].mxu0  ;;  %1124 = vst.msk [vmem:[%s2225_s4 + $0x8c] sm:$0xf] %vm1088_vm2, %v1321_v17  ;;  %v538_v28 = vadd.f32 %v1582_v24, %v1812_v37  ;;  %v529_v30 = vpop.f32.mrb[5].mxu1  ;;  %v1373_v8 = vunpack.c.h.bf16 %v1482_v46  ;;  %v1437_v13 = vunpack.c.h.bf16 %v1498_v51 }
  0xe3   :  { %1090 = vst.msk [vmem:[%s2225_s4 + $0x4] sm:$0xf] %vm1088_vm2, %v1287_v18  ;;  %v402_v29 = vadd.f32 %v1812_v37, %v401_v25  ;;  %v1551_v31 = vpop.f32.mrb[6].mxu0  ;;  %1122 = vst.msk [vmem:[%s2225_s4 + $0x84] sm:$0xf] %vm1088_vm2, %v1319_v22  ;;  %v530_v35 = vadd.f32 %v1812_v37, %v529_v30  ;;  %v1583_v38 = vpop.f32.mrb[6].mxu1  ;;  %v1369_v14 = vunpack.c.h.bf16 %v1481_v52 }
  0xe4   :  { %v774_v34 = vadd.f32 %v1364_v16, %v410_v23  ;;  %v413_v36 = vadd.f32 %v1551_v31, %v1812_v37  ;;  %v404_v39 = vpop.f32.mrb[7].mxu0  ;;  %v806_v41 = vadd.f32 %v1428_v20, %v538_v28  ;;  %v541_v43 = vadd.f32 %v1583_v38, %v1812_v37  ;;  %v532_v45 = vpop.f32.mrb[7].mxu1  ;;  %v1500_v31 = vld [vmem:[%s2223_s3 + $0xb8] sm:$0xff]   ;;  %v1499_v38 = vld [vmem:[%s2223_s3 + $0xb0] sm:$0xff]  }
  0xe5   :  { %v772_v42 = vadd.f32 %v1360_v21, %v402_v29  ;;  %v405_v44 = vadd.f32 %v1812_v37, %v404_v39  ;;  %v804_v48 = vadd.f32 %v1424_v26, %v530_v35  ;;  %v533_v50 = vadd.f32 %v1812_v37, %v532_v45  ;;  %v1484_v26 = vld [vmem:[%s2223_s3 + $0x38] sm:$0xff]  }
  0xe6   :  { %v1292_v47 = vpack.c.bf16 %v774_v34, %v774_v34  ;;  %v775_v49 = vadd.f32 %v1365_v27, %v413_v36  ;;  %v1324_v53 = vpack.c.bf16 %v806_v41, %v806_v41  ;;  %v807_v55 = vadd.f32 %v1429_v32, %v541_v43  ;;  %v1483_v32 = vld [vmem:[%s2223_s3 + $0x30] sm:$0xff]  }
  0xe7   :  { %v1290_v54 = vpack.c.bf16 %v772_v42, %v772_v42  ;;  %v773_v56 = vadd.f32 %v1361_v33, %v405_v44  ;;  %v1322_v58 = vpack.c.bf16 %v804_v48, %v804_v48  ;;  %v805_v60 = vadd.f32 %v1425_v40, %v533_v50 }
  0xe8   :  { %1095 = vst.msk [vmem:[%s2225_s4 + $0x18] sm:$0xf] %vm1088_vm2, %v1292_v47  ;;  %v1293_v59 = vpack.c.bf16 %v775_v49, %v775_v49  ;;  %1127 = vst.msk [vmem:[%s2225_s4 + $0x98] sm:$0xf] %vm1088_vm2, %v1324_v53  ;;  %v1325_v62 = vpack.c.bf16 %v807_v55, %v807_v55  ;;  %v1433_v20 = vunpack.c.h.bf16 %v1497_v57  ;;  %v1380_v42 = vunpack.c.l.bf16 %v1484_v26 }
  0xe9   :  { %1093 = vst.msk [vmem:[%s2225_s4 + $0x10] sm:$0xf] %vm1088_vm2, %v1290_v54  ;;  %v1291_v63 = vpack.c.bf16 %v773_v56, %v773_v56  ;;  %v1554_v0 = vpop.f32.mrb[8].mxu0  ;;  %1125 = vst.msk [vmem:[%s2225_s4 + $0x90] sm:$0xf] %vm1088_vm2, %v1322_v58  ;;  %v1323_v3 = vpack.c.bf16 %v805_v60, %v805_v60  ;;  %v1586_v5 = vpop.f32.mrb[8].mxu1  ;;  %v1444_v46 = vunpack.c.l.bf16 %v1500_v31  ;;  %v1376_v47 = vunpack.c.l.bf16 %v1483_v32 }
  0xea   :  { %1096 = vst.msk [vmem:[%s2225_s4 + $0x1c] sm:$0xf] %vm1088_vm2, %v1293_v59  ;;  %v426_v4 = vadd.f32 %v1554_v0, %v1812_v37  ;;  %v417_v6 = vpop.f32.mrb[9].mxu0  ;;  %1128 = vst.msk [vmem:[%s2225_s4 + $0x9c] sm:$0xf] %vm1088_vm2, %v1325_v62  ;;  %v554_v9 = vadd.f32 %v1586_v5, %v1812_v37  ;;  %v545_v11 = vpop.f32.mrb[9].mxu1  ;;  %v1440_v52 = vunpack.c.l.bf16 %v1499_v38  ;;  %v1381_v53 = vunpack.c.h.bf16 %v1484_v26 }
  0xeb   :  { %1094 = vst.msk [vmem:[%s2225_s4 + $0x14] sm:$0xf] %vm1088_vm2, %v1291_v63  ;;  %v418_v10 = vadd.f32 %v1812_v37, %v417_v6  ;;  %v1555_v12 = vpop.f32.mrb[10].mxu0  ;;  %1126 = vst.msk [vmem:[%s2225_s4 + $0x94] sm:$0xf] %vm1088_vm2, %v1323_v3  ;;  %v546_v16 = vadd.f32 %v1812_v37, %v545_v11  ;;  %v1587_v18 = vpop.f32.mrb[10].mxu1  ;;  %v1445_v58 = vunpack.c.h.bf16 %v1500_v31  ;;  %v1377_v59 = vunpack.c.h.bf16 %v1483_v32 }
  0xec   :  { %v778_v15 = vadd.f32 %v1372_v61, %v426_v4  ;;  %v429_v17 = vadd.f32 %v1555_v12, %v1812_v37  ;;  %v420_v19 = vpop.f32.mrb[11].mxu0  ;;  %v810_v21 = vadd.f32 %v1436_v1, %v554_v9  ;;  %v557_v23 = vadd.f32 %v1587_v18, %v1812_v37  ;;  %v548_v25 = vpop.f32.mrb[11].mxu1  ;;  %v1502_v12 = vld [vmem:[%s2223_s3 + $0xc8] sm:$0xff]   ;;  %v1501_v18 = vld [vmem:[%s2223_s3 + $0xc0] sm:$0xff]  }
  0xed   :  { %v776_v22 = vadd.f32 %v1368_v2, %v418_v10  ;;  %v421_v24 = vadd.f32 %v1812_v37, %v420_v19  ;;  %v808_v28 = vadd.f32 %v1432_v7, %v546_v16  ;;  %v549_v30 = vadd.f32 %v1812_v37, %v548_v25  ;;  %v1486_v7 = vld [vmem:[%s2223_s3 + $0x48] sm:$0xff]  }
  0xee   :  { %v1296_v27 = vpack.c.bf16 %v778_v15, %v778_v15  ;;  %v779_v29 = vadd.f32 %v1373_v8, %v429_v17  ;;  %v1328_v33 = vpack.c.bf16 %v810_v21, %v810_v21  ;;  %v811_v35 = vadd.f32 %v1437_v13, %v557_v23  ;;  %v1485_v13 = vld [vmem:[%s2223_s3 + $0x40] sm:$0xff]  }
  0xef   :  { %v1294_v34 = vpack.c.bf16 %v776_v22, %v776_v22  ;;  %v777_v36 = vadd.f32 %v1369_v14, %v421_v24  ;;  %v1326_v39 = vpack.c.bf16 %v808_v28, %v808_v28  ;;  %v809_v41 = vadd.f32 %v1433_v20, %v549_v30 }
  0xf0   :  { %1099 = vst.msk [vmem:[%s2225_s4 + $0x28] sm:$0xf] %vm1088_vm2, %v1296_v27  ;;  %v1297_v40 = vpack.c.bf16 %v779_v29, %v779_v29  ;;  %1131 = vst.msk [vmem:[%s2225_s4 + $0xa8] sm:$0xf] %vm1088_vm2, %v1328_v33  ;;  %v1329_v43 = vpack.c.bf16 %v811_v35, %v811_v35  ;;  %v1441_v1 = vunpack.c.h.bf16 %v1499_v38  ;;  %v1388_v22 = vunpack.c.l.bf16 %v1486_v7 }
  0xf1   :  { %1097 = vst.msk [vmem:[%s2225_s4 + $0x20] sm:$0xf] %vm1088_vm2, %v1294_v34  ;;  %v1295_v44 = vpack.c.bf16 %v777_v36, %v777_v36  ;;  %v1558_v45 = vpop.f32.mrb[12].mxu0  ;;  %1129 = vst.msk [vmem:[%s2225_s4 + $0xa0] sm:$0xf] %vm1088_vm2, %v1326_v39  ;;  %v1327_v48 = vpack.c.bf16 %v809_v41, %v809_v41  ;;  %v1590_v50 = vpop.f32.mrb[12].mxu1  ;;  %v1452_v26 = vunpack.c.l.bf16 %v1502_v12  ;;  %v1384_v27 = vunpack.c.l.bf16 %v1485_v13 }
  0xf2   :  { %1100 = vst.msk [vmem:[%s2225_s4 + $0x2c] sm:$0xf] %vm1088_vm2, %v1297_v40  ;;  %v442_v49 = vadd.f32 %v1558_v45, %v1812_v37  ;;  %v433_v51 = vpop.f32.mrb[13].mxu0  ;;  %1132 = vst.msk [vmem:[%s2225_s4 + $0xac] sm:$0xf] %vm1088_vm2, %v1329_v43  ;;  %v570_v54 = vadd.f32 %v1590_v50, %v1812_v37  ;;  %v561_v56 = vpop.f32.mrb[13].mxu1  ;;  %v1448_v32 = vunpack.c.l.bf16 %v1501_v18  ;;  %v1389_v33 = vunpack.c.h.bf16 %v1486_v7 }
  0xf3   :  { %1098 = vst.msk [vmem:[%s2225_s4 + $0x24] sm:$0xf] %vm1088_vm2, %v1295_v44  ;;  %v434_v55 = vadd.f32 %v1812_v37, %v433_v51  ;;  %v1559_v57 = vpop.f32.mrb[14].mxu0  ;;  %1130 = vst.msk [vmem:[%s2225_s4 + $0xa4] sm:$0xf] %vm1088_vm2, %v1327_v48  ;;  %v562_v61 = vadd.f32 %v1812_v37, %v561_v56  ;;  %v1591_v63 = vpop.f32.mrb[14].mxu1  ;;  %v1453_v39 = vunpack.c.h.bf16 %v1502_v12  ;;  %v1385_v40 = vunpack.c.h.bf16 %v1485_v13 }
  0xf4   :  { %v782_v60 = vadd.f32 %v1380_v42, %v442_v49  ;;  %v445_v62 = vadd.f32 %v1559_v57, %v1812_v37  ;;  %v436_v0 = vpop.f32.mrb[15].mxu0  ;;  %v814_v2 = vadd.f32 %v1444_v46, %v570_v54  ;;  %v573_v4 = vadd.f32 %v1591_v63, %v1812_v37  ;;  %v564_v6 = vpop.f32.mrb[15].mxu1  ;;  %v1504_v57 = vld [vmem:[%s2223_s3 + $0xd8] sm:$0xff]   ;;  %v1503_v63 = vld [vmem:[%s2223_s3 + $0xd0] sm:$0xff]  }
  0xf5   :  { %v780_v3 = vadd.f32 %v1376_v47, %v434_v55  ;;  %v437_v5 = vadd.f32 %v1812_v37, %v436_v0  ;;  %v812_v9 = vadd.f32 %v1440_v52, %v562_v61  ;;  %v565_v11 = vadd.f32 %v1812_v37, %v564_v6  ;;  %v1488_v52 = vld [vmem:[%s2223_s3 + $0x58] sm:$0xff]  }
  0xf6   :  { %v1300_v8 = vpack.c.bf16 %v782_v60, %v782_v60  ;;  %v783_v10 = vadd.f32 %v1381_v53, %v445_v62  ;;  %v1332_v14 = vpack.c.bf16 %v814_v2, %v814_v2  ;;  %v815_v16 = vadd.f32 %v1445_v58, %v573_v4  ;;  %v1487_v58 = vld [vmem:[%s2223_s3 + $0x50] sm:$0xff]  }
  0xf7   :  { %v1298_v15 = vpack.c.bf16 %v780_v3, %v780_v3  ;;  %v781_v17 = vadd.f32 %v1377_v59, %v437_v5  ;;  %v1330_v19 = vpack.c.bf16 %v812_v9, %v812_v9  ;;  %v813_v21 = vadd.f32 %v1441_v1, %v565_v11 }
  0xf8   :  { %1103 = vst.msk [vmem:[%s2225_s4 + $0x38] sm:$0xf] %vm1088_vm2, %v1300_v8  ;;  %v1301_v20 = vpack.c.bf16 %v783_v10, %v783_v10  ;;  %1135 = vst.msk [vmem:[%s2225_s4 + $0xb8] sm:$0xf] %vm1088_vm2, %v1332_v14  ;;  %v1333_v23 = vpack.c.bf16 %v815_v16, %v815_v16  ;;  %v1449_v46 = vunpack.c.h.bf16 %v1501_v18  ;;  %v1396_v3 = vunpack.c.l.bf16 %v1488_v52 }
  0xf9   :  { %1101 = vst.msk [vmem:[%s2225_s4 + $0x30] sm:$0xf] %vm1088_vm2, %v1298_v15  ;;  %v1299_v24 = vpack.c.bf16 %v781_v17, %v781_v17  ;;  %v1562_v25 = vpop.f32.mrb[16].mxu0  ;;  %1133 = vst.msk [vmem:[%s2225_s4 + $0xb0] sm:$0xf] %vm1088_vm2, %v1330_v19  ;;  %v1331_v28 = vpack.c.bf16 %v813_v21, %v813_v21  ;;  %v1594_v30 = vpop.f32.mrb[16].mxu1  ;;  %v1460_v7 = vunpack.c.l.bf16 %v1504_v57  ;;  %v1392_v8 = vunpack.c.l.bf16 %v1487_v58 }
  0xfa   :  { %1104 = vst.msk [vmem:[%s2225_s4 + $0x3c] sm:$0xf] %vm1088_vm2, %v1301_v20  ;;  %v458_v29 = vadd.f32 %v1562_v25, %v1812_v37  ;;  %v449_v31 = vpop.f32.mrb[17].mxu0  ;;  %1136 = vst.msk [vmem:[%s2225_s4 + $0xbc] sm:$0xf] %vm1088_vm2, %v1333_v23  ;;  %v586_v34 = vadd.f32 %v1594_v30, %v1812_v37  ;;  %v577_v36 = vpop.f32.mrb[17].mxu1  ;;  %v1456_v13 = vunpack.c.l.bf16 %v1503_v63  ;;  %v1397_v14 = vunpack.c.h.bf16 %v1488_v52 }
  0xfb   :  { %1102 = vst.msk [vmem:[%s2225_s4 + $0x34] sm:$0xf] %vm1088_vm2, %v1299_v24  ;;  %v450_v35 = vadd.f32 %v1812_v37, %v449_v31  ;;  %v1563_v38 = vpop.f32.mrb[18].mxu0  ;;  %1134 = vst.msk [vmem:[%s2225_s4 + $0xb4] sm:$0xf] %vm1088_vm2, %v1331_v28  ;;  %v578_v42 = vadd.f32 %v1812_v37, %v577_v36  ;;  %v1595_v44 = vpop.f32.mrb[18].mxu1  ;;  %v1461_v19 = vunpack.c.h.bf16 %v1504_v57  ;;  %v1393_v20 = vunpack.c.h.bf16 %v1487_v58 }
  0xfc   :  { %v786_v41 = vadd.f32 %v1388_v22, %v458_v29  ;;  %v461_v43 = vadd.f32 %v1563_v38, %v1812_v37  ;;  %v452_v45 = vpop.f32.mrb[19].mxu0  ;;  %v818_v47 = vadd.f32 %v1452_v26, %v586_v34  ;;  %v589_v49 = vadd.f32 %v1595_v44, %v1812_v37  ;;  %v580_v51 = vpop.f32.mrb[19].mxu1  ;;  %v1506_v38 = vld [vmem:[%s2223_s3 + $0xe8] sm:$0xff]   ;;  %v1505_v44 = vld [vmem:[%s2223_s3 + $0xe0] sm:$0xff]  }
  0xfd   :  { %v784_v48 = vadd.f32 %v1384_v27, %v450_v35  ;;  %v453_v50 = vadd.f32 %v1812_v37, %v452_v45  ;;  %v816_v54 = vadd.f32 %v1448_v32, %v578_v42  ;;  %v581_v56 = vadd.f32 %v1812_v37, %v580_v51  ;;  %v1490_v32 = vld [vmem:[%s2223_s3 + $0x68] sm:$0xff]  }
  0xfe   :  { %v1304_v53 = vpack.c.bf16 %v786_v41, %v786_v41  ;;  %v787_v55 = vadd.f32 %v1389_v33, %v461_v43  ;;  %v1336_v59 = vpack.c.bf16 %v818_v47, %v818_v47  ;;  %v819_v61 = vadd.f32 %v1453_v39, %v589_v49  ;;  %v1489_v39 = vld [vmem:[%s2223_s3 + $0x60] sm:$0xff]  }
  0xff   :  { %v1302_v60 = vpack.c.bf16 %v784_v48, %v784_v48  ;;  %v785_v62 = vadd.f32 %v1385_v40, %v453_v50  ;;  %v1334_v0 = vpack.c.bf16 %v816_v54, %v816_v54  ;;  %v817_v2 = vadd.f32 %v1449_v46, %v581_v56 }
 0x100   :  { %1107 = vst.msk [vmem:[%s2225_s4 + $0x48] sm:$0xf] %vm1088_vm2, %v1304_v53  ;;  %v1305_v1 = vpack.c.bf16 %v787_v55, %v787_v55  ;;  %1139 = vst.msk [vmem:[%s2225_s4 + $0xc8] sm:$0xf] %vm1088_vm2, %v1336_v59  ;;  %v1337_v4 = vpack.c.bf16 %v819_v61, %v819_v61  ;;  %v1457_v26 = vunpack.c.h.bf16 %v1503_v63  ;;  %v1404_v48 = vunpack.c.l.bf16 %v1490_v32 }
 0x101   :  { %1105 = vst.msk [vmem:[%s2225_s4 + $0x40] sm:$0xf] %vm1088_vm2, %v1302_v60  ;;  %v1303_v5 = vpack.c.bf16 %v785_v62, %v785_v62  ;;  %v1566_v6 = vpop.f32.mrb[20].mxu0  ;;  %1137 = vst.msk [vmem:[%s2225_s4 + $0xc0] sm:$0xf] %vm1088_vm2, %v1334_v0  ;;  %v1335_v9 = vpack.c.bf16 %v817_v2, %v817_v2  ;;  %v1598_v11 = vpop.f32.mrb[20].mxu1  ;;  %v1468_v52 = vunpack.c.l.bf16 %v1506_v38  ;;  %v1400_v53 = vunpack.c.l.bf16 %v1489_v39 }
 0x102   :  { %1108 = vst.msk [vmem:[%s2225_s4 + $0x4c] sm:$0xf] %vm1088_vm2, %v1305_v1  ;;  %v474_v10 = vadd.f32 %v1566_v6, %v1812_v37  ;;  %v465_v12 = vpop.f32.mrb[21].mxu0  ;;  %1140 = vst.msk [vmem:[%s2225_s4 + $0xcc] sm:$0xf] %vm1088_vm2, %v1337_v4  ;;  %v602_v15 = vadd.f32 %v1598_v11, %v1812_v37  ;;  %v593_v17 = vpop.f32.mrb[21].mxu1  ;;  %v1464_v58 = vunpack.c.l.bf16 %v1505_v44  ;;  %v1405_v59 = vunpack.c.h.bf16 %v1490_v32 }
 0x103   :  { %1106 = vst.msk [vmem:[%s2225_s4 + $0x44] sm:$0xf] %vm1088_vm2, %v1303_v5  ;;  %v466_v16 = vadd.f32 %v1812_v37, %v465_v12  ;;  %v1567_v18 = vpop.f32.mrb[22].mxu0  ;;  %1138 = vst.msk [vmem:[%s2225_s4 + $0xc4] sm:$0xf] %vm1088_vm2, %v1335_v9  ;;  %v594_v22 = vadd.f32 %v1812_v37, %v593_v17  ;;  %v1599_v24 = vpop.f32.mrb[22].mxu1  ;;  %v1469_v0 = vunpack.c.h.bf16 %v1506_v38  ;;  %v1401_v1 = vunpack.c.h.bf16 %v1489_v39 }
 0x104   :  { %v790_v21 = vadd.f32 %v1396_v3, %v474_v10  ;;  %v477_v23 = vadd.f32 %v1567_v18, %v1812_v37  ;;  %v468_v25 = vpop.f32.mrb[23].mxu0  ;;  %v822_v27 = vadd.f32 %v1460_v7, %v602_v15  ;;  %v605_v29 = vadd.f32 %v1599_v24, %v1812_v37  ;;  %v596_v31 = vpop.f32.mrb[23].mxu1  ;;  %v1508_v18 = vld [vmem:[%s2223_s3 + $0xf8] sm:$0xff]   ;;  %v1507_v24 = vld [vmem:[%s2223_s3 + $0xf0] sm:$0xff]  }
 0x105   :  { %v788_v28 = vadd.f32 %v1392_v8, %v466_v16  ;;  %v469_v30 = vadd.f32 %v1812_v37, %v468_v25  ;;  %v820_v34 = vadd.f32 %v1456_v13, %v594_v22  ;;  %v597_v36 = vadd.f32 %v1812_v37, %v596_v31  ;;  %v1492_v13 = vld [vmem:[%s2223_s3 + $0x78] sm:$0xff]  }
 0x106   :  { %v1308_v33 = vpack.c.bf16 %v790_v21, %v790_v21  ;;  %v791_v35 = vadd.f32 %v1397_v14, %v477_v23  ;;  %v1340_v40 = vpack.c.bf16 %v822_v27, %v822_v27  ;;  %v823_v42 = vadd.f32 %v1461_v19, %v605_v29  ;;  %v1491_v19 = vld [vmem:[%s2223_s3 + $0x70] sm:$0xff]  }
 0x107   :  { %v1306_v41 = vpack.c.bf16 %v788_v28, %v788_v28  ;;  %v789_v43 = vadd.f32 %v1393_v20, %v469_v30  ;;  %v1338_v45 = vpack.c.bf16 %v820_v34, %v820_v34  ;;  %v821_v47 = vadd.f32 %v1457_v26, %v597_v36 }
 0x108   :  { %1111 = vst.msk [vmem:[%s2225_s4 + $0x58] sm:$0xf] %vm1088_vm2, %v1308_v33  ;;  %v1309_v46 = vpack.c.bf16 %v791_v35, %v791_v35  ;;  %1143 = vst.msk [vmem:[%s2225_s4 + $0xd8] sm:$0xf] %vm1088_vm2, %v1340_v40  ;;  %v1341_v49 = vpack.c.bf16 %v823_v42, %v823_v42  ;;  %v1465_v7 = vunpack.c.h.bf16 %v1505_v44  ;;  %v1412_v28 = vunpack.c.l.bf16 %v1492_v13 }
 0x109   :  { %1109 = vst.msk [vmem:[%s2225_s4 + $0x50] sm:$0xf] %vm1088_vm2, %v1306_v41  ;;  %v1307_v50 = vpack.c.bf16 %v789_v43, %v789_v43  ;;  %v1570_v51 = vpop.f32.mrb[24].mxu0  ;;  %1141 = vst.msk [vmem:[%s2225_s4 + $0xd0] sm:$0xf] %vm1088_vm2, %v1338_v45  ;;  %v1339_v54 = vpack.c.bf16 %v821_v47, %v821_v47  ;;  %v1602_v56 = vpop.f32.mrb[24].mxu1  ;;  %v1476_v32 = vunpack.c.l.bf16 %v1508_v18  ;;  %v1408_v33 = vunpack.c.l.bf16 %v1491_v19 }
 0x10a   :  { %1112 = vst.msk [vmem:[%s2225_s4 + $0x5c] sm:$0xf] %vm1088_vm2, %v1309_v46  ;;  %v490_v55 = vadd.f32 %v1570_v51, %v1812_v37  ;;  %v481_v57 = vpop.f32.mrb[25].mxu0  ;;  %1144 = vst.msk [vmem:[%s2225_s4 + $0xdc] sm:$0xf] %vm1088_vm2, %v1341_v49  ;;  %v618_v60 = vadd.f32 %v1602_v56, %v1812_v37  ;;  %v609_v62 = vpop.f32.mrb[25].mxu1  ;;  %v1472_v39 = vunpack.c.l.bf16 %v1507_v24  ;;  %v1413_v40 = vunpack.c.h.bf16 %v1492_v13 }
 0x10b   :  { %1110 = vst.msk [vmem:[%s2225_s4 + $0x54] sm:$0xf] %vm1088_vm2, %v1307_v50  ;;  %v482_v61 = vadd.f32 %v1812_v37, %v481_v57  ;;  %v1571_v63 = vpop.f32.mrb[26].mxu0  ;;  %1142 = vst.msk [vmem:[%s2225_s4 + $0xd4] sm:$0xf] %vm1088_vm2, %v1339_v54  ;;  %v610_v3 = vadd.f32 %v1812_v37, %v609_v62  ;;  %v1603_v5 = vpop.f32.mrb[26].mxu1  ;;  %v1477_v45 = vunpack.c.h.bf16 %v1508_v18  ;;  %v1409_v46 = vunpack.c.h.bf16 %v1491_v19 }
 0x10c   :  { %v794_v2 = vadd.f32 %v1404_v48, %v490_v55  ;;  %v493_v4 = vadd.f32 %v1571_v63, %v1812_v37  ;;  %v484_v6 = vpop.f32.mrb[27].mxu0  ;;  %v826_v8 = vadd.f32 %v1468_v52, %v618_v60  ;;  %v621_v10 = vadd.f32 %v1603_v5, %v1812_v37  ;;  %v612_v12 = vpop.f32.mrb[27].mxu1 }
 0x10d   :  { %v792_v9 = vadd.f32 %v1400_v53, %v482_v61  ;;  %v485_v11 = vadd.f32 %v1812_v37, %v484_v6  ;;  %v824_v15 = vadd.f32 %v1464_v58, %v610_v3  ;;  %v613_v17 = vadd.f32 %v1812_v37, %v612_v12 }
 0x10e   :  { %v1312_v14 = vpack.c.bf16 %v794_v2, %v794_v2  ;;  %v795_v16 = vadd.f32 %v1405_v59, %v493_v4  ;;  %v1344_v20 = vpack.c.bf16 %v826_v8, %v826_v8  ;;  %v827_v22 = vadd.f32 %v1469_v0, %v621_v10 }
 0x10f   :  { %v1310_v21 = vpack.c.bf16 %v792_v9, %v792_v9  ;;  %v793_v23 = vadd.f32 %v1401_v1, %v485_v11  ;;  %v1342_v25 = vpack.c.bf16 %v824_v15, %v824_v15  ;;  %v825_v27 = vadd.f32 %v1465_v7, %v613_v17 }
 0x110   :  { %1115 = vst.msk [vmem:[%s2225_s4 + $0x68] sm:$0xf] %vm1088_vm2, %v1312_v14  ;;  %v1313_v26 = vpack.c.bf16 %v795_v16, %v795_v16  ;;  %1147 = vst.msk [vmem:[%s2225_s4 + $0xe8] sm:$0xf] %vm1088_vm2, %v1344_v20  ;;  %v1345_v29 = vpack.c.bf16 %v827_v22, %v827_v22  ;;  %v1473_v52 = vunpack.c.h.bf16 %v1507_v24 }
 0x111   :  { %1113 = vst.msk [vmem:[%s2225_s4 + $0x60] sm:$0xf] %vm1088_vm2, %v1310_v21  ;;  %v1311_v30 = vpack.c.bf16 %v793_v23, %v793_v23  ;;  %v1574_v31 = vpop.f32.mrb[28].mxu0  ;;  %1145 = vst.msk [vmem:[%s2225_s4 + $0xe0] sm:$0xf] %vm1088_vm2, %v1342_v25  ;;  %v1343_v34 = vpack.c.bf16 %v825_v27, %v825_v27  ;;  %v1606_v36 = vpop.f32.mrb[28].mxu1 }
 0x112   :  { %1116 = vst.msk [vmem:[%s2225_s4 + $0x6c] sm:$0xf] %vm1088_vm2, %v1313_v26  ;;  %v506_v35 = vadd.f32 %v1574_v31, %v1812_v37  ;;  %v497_v38 = vpop.f32.mrb[29].mxu0  ;;  %1148 = vst.msk [vmem:[%s2225_s4 + $0xec] sm:$0xf] %vm1088_vm2, %v1345_v29  ;;  %v634_v41 = vadd.f32 %v1606_v36, %v1812_v37  ;;  %v625_v43 = vpop.f32.mrb[29].mxu1 }
 0x113   :  { %1114 = vst.msk [vmem:[%s2225_s4 + $0x64] sm:$0xf] %vm1088_vm2, %v1311_v30  ;;  %v498_v42 = vadd.f32 %v1812_v37, %v497_v38  ;;  %v1575_v44 = vpop.f32.mrb[30].mxu0  ;;  %1146 = vst.msk [vmem:[%s2225_s4 + $0xe4] sm:$0xf] %vm1088_vm2, %v1343_v34  ;;  %v626_v48 = vadd.f32 %v1812_v37, %v625_v43  ;;  %v1607_v50 = vpop.f32.mrb[30].mxu1 }
 0x114   :  { %v798_v47 = vadd.f32 %v1412_v28, %v506_v35  ;;  %v509_v49 = vadd.f32 %v1575_v44, %v1812_v37  ;;  %v500_v51 = vpop.f32.mrb[31].mxu0  ;;  %v830_v53 = vadd.f32 %v1476_v32, %v634_v41  ;;  %v637_v55 = vadd.f32 %v1607_v50, %v1812_v37  ;;  %v628_v57 = vpop.f32.mrb[31].mxu1 }
 0x115   :  { %v796_v54 = vadd.f32 %v1408_v33, %v498_v42  ;;  %v501_v56 = vadd.f32 %v1812_v37, %v500_v51  ;;  %v828_v59 = vadd.f32 %v1472_v39, %v626_v48  ;;  %v629_v61 = vadd.f32 %v1812_v37, %v628_v57 }
 0x116   :  { %v1316_v58 = vpack.c.bf16 %v798_v47, %v798_v47  ;;  %v799_v60 = vadd.f32 %v1413_v40, %v509_v49  ;;  %v1348_v62 = vpack.c.bf16 %v830_v53, %v830_v53  ;;  %v831_v0 = vadd.f32 %v1477_v45, %v637_v55 }
 0x117   :  { %v1314_v63 = vpack.c.bf16 %v796_v54, %v796_v54  ;;  %v797_v1 = vadd.f32 %v1409_v46, %v501_v56  ;;  %v1346_v2 = vpack.c.bf16 %v828_v59, %v828_v59  ;;  %v829_v4 = vadd.f32 %v1473_v52, %v629_v61 }
 0x118   :  { %1119 = vst.msk [vmem:[%s2225_s4 + $0x78] sm:$0xf] %vm1088_vm2, %v1316_v58  ;;  %v1317_v3 = vpack.c.bf16 %v799_v60, %v799_v60  ;;  %1151 = vst.msk [vmem:[%s2225_s4 + $0xf8] sm:$0xf] %vm1088_vm2, %v1348_v62  ;;  %v1349_v37 = vpack.c.bf16 %v831_v0, %v831_v0 }
 0x119   :  { %1117 = vst.msk [vmem:[%s2225_s4 + $0x70] sm:$0xf] %vm1088_vm2, %v1314_v63  ;;  %v1315_v5 = vpack.c.bf16 %v797_v1, %v797_v1  ;;  %1149 = vst.msk [vmem:[%s2225_s4 + $0xf0] sm:$0xf] %vm1088_vm2, %v1346_v2  ;;  %v1347_v6 = vpack.c.bf16 %v829_v4, %v829_v4 }
 0x11a   :  { %1120 = vst.msk [vmem:[%s2225_s4 + $0x7c] sm:$0xf] %vm1088_vm2, %v1317_v3  ;;  %1152 = vst.msk [vmem:[%s2225_s4 + $0xfc] sm:$0xf] %vm1088_vm2, %v1349_v37 }
 0x11b   :  { %1118 = vst.msk [vmem:[%s2225_s4 + $0x74] sm:$0xf] %vm1088_vm2, %v1315_v5  ;;  %1150 = vst.msk [vmem:[%s2225_s4 + $0xf4] sm:$0xf] %vm1088_vm2, %v1347_v6 }

// kernel: fpn_stage_forward.3
= control target key start
LH: loop header
LB: loop body
LE: loop exit
PB: predicated region body
PF: predicated region fallthrough
CT: control target
= control target key end

     0   :  { %vm521_vm0 = vcmask 1043456   ;;  %vm460_vm1 = vcmask 64512   ;;  %vm295_vm2 = vsmask.f32 7424  ;;  %vm1478_vm3 = vcmask 1046528   ;;  %s7090_s6 = smov 16   ;;  %s8950_s2 = inlined_call_operand.vmem [shape: bf16[16,8,8], index: 2, kind: input, shape index: {}]   ;;  %s8951_s0 = inlined_call_operand.vmem [shape: bf16[360,8], index: 0, kind: input, shape index: {}, may-alias: {0,1}]   ;;  %s8952_s1 = inlined_call_operand.vmem [shape: bf16[360,8], index: 1, kind: input, shape index: {}, may-alias: {0,1}]   ;;  %s8953_s3 = inlined_call_operand.vmem [shape: f32[1,32], index: 3, kind: input, shape index: {}]   ;;  %s8954_s4 = inlined_call_operand.vmem [shape: bf16[320,32], index: 4, kind: output, shape index: {}]  }
   0x1   :  { %v5213_v0 = vld [vmem:[%s8950_s2 + $0x14] sm:$0xf]  ;;  %v7124_v2 = vld [vmem:[%s8951_s0] sm:$0xff]   ;;  %v7129_v3 = vld [vmem:[%s8951_s0 + $0x8] sm:$0xff]   ;;  %vm4759_vm4 = vcmask 130048   ;;  %vm4800_vm5 = vcmask 195584  }
   0x2   :  { %7041 = vmatprep.subr.msk.bf16.mxu1 %vm521_vm0, %v5213_v0  ;;  %v1581_v1 = vsel %vm521_vm0, %v5213_v0, 0  ;;  %v5212_v4 = vld [vmem:[%s8950_s2 + $0x10] sm:$0xf]  ;;  %v5128_v5 = vld [vmem:[%s8950_s2 + $0x4] sm:$0xf]  ;;  %v1479_v6 = vrot.slane %v7124_v2, 1 }
   0x3   :  { %6054 = vmatpush3.bf16.msra.mxu1 %v1581_v1  ;;  %7037 = vmatprep.subr.msk.bf16.mxu0 %vm521_vm0, %v5128_v5  ;;  %v7143_v7 = vld [vmem:[%s8951_s0 + $0x10] sm:$0xff]   ;;  %v1480_v8 = vrot.slane %v7129_v3, 1  ;;  %v1777_v9 = vsel %vm521_vm0, %v5212_v4, 0  ;;  %v523_v10 = vsel %vm521_vm0, %v5128_v5, 0  ;;  %v297_v11 = vshrl.u32 %v7124_v2, 16  ;;  %v7163_v20 = vld [vmem:[%s8951_s0 + $0x18] sm:$0xff]  }
   0x4   :  { %7042 = vmatprep.subr.msk.bf16.mxu1 %vm521_vm0, %v5212_v4  ;;  %v291_v12 = vld [vmem:[%s8950_s2] sm:$0xf]  ;;  %v1482_v13 = vrot.slane %v7143_v7, 1  ;;  %5886 = vmatpush3.bf16.msra.mxu0 %v523_v10  ;;  %v299_v14 = vshll.u32 %v7124_v2, 16  ;;  %v304_v15 = vshll.u32 %v7129_v3, 16  ;;  %v308_v16 = vshrl.u32 %v7129_v3, 16 }
   0x5   :  { %v1481_v17 = vsel %vm1478_vm3, %v1479_v6, %v1480_v8  ;;  %v312_v18 = vshll.u32 %v7143_v7, 16  ;;  %v316_v19 = vshrl.u32 %v7143_v7, 16  ;;  %7038 = vmatprep.subr.msk.bf16.mxu0 %vm521_vm0, %v291_v12  ;;  %v759_v21 = vsel %vm521_vm0, %v291_v12, 0  ;;  %v7176_v27 = vld [vmem:[%s8951_s0 + $0x20] sm:$0xff]   ;;  %v7183_v30 = vld [vmem:[%s8951_s0 + $0x28] sm:$0xff]   ;;  %v7212_v44 = vld [vmem:[%s8951_s0 + $0x30] sm:$0xff]  }
   0x6   :  { %6055 = vmatprep.mubr.msk.bf16.mxu1 %vm460_vm1, %v1481_v17  ;;  %v7168_v22 = vsel %vm1478_vm3, %v1480_v8, %v1482_v13  ;;  %v301_v23 = vrot.slane %v299_v14, 1  ;;  %v306_v24 = vrot.slane %v304_v15, 1  ;;  %v1484_v26 = vrot.slane %v7163_v20, 1  ;;  %v7224_v49 = vld [vmem:[%s8951_s0 + $0x38] sm:$0xff]   ;;  %v7250_v62 = vld [vmem:[%s8951_s0 + $0x40] sm:$0xff]   ;;  %v7260_v1 = vld [vmem:[%s8951_s0 + $0x48] sm:$0xff]  }
   0x7   :  { %6056 = vmatmul.mubr.msk.bf16.vlgmr.msra.gmra.mrb[0].mxu1 %vm460_vm1, %v7168_v22  ;;  %v314_v25 = vrot.slane %v312_v18, 1  ;;  %v320_v28 = vshll.u32 %v7163_v20, 16  ;;  %v324_v29 = vshrl.u32 %v7163_v20, 16  ;;  %v1486_v35 = vrot.slane %v7176_v27, 1  ;;  %v7286_v17 = vld [vmem:[%s8951_s0 + $0x50] sm:$0xff]  }
   0x8   :  { %6096 = vmatpush3.bf16.msra.mxu1 %v1777_v9  ;;  %v302_v31 = vor.u32 %v301_v23, %v297_v11  ;;  %v310_v32 = vor.u32 %v308_v16, %v306_v24  ;;  %v7186_v34 = vsel %vm1478_vm3, %v1482_v13, %v1484_v26  ;;  %v328_v39 = vshll.u32 %v7176_v27, 16  ;;  %v7291_v18 = vld [vmem:[%s8950_s2 + $0x18] sm:$0xf] }
   0x9   :  { %v318_v33 = vor.u32 %v316_v19, %v314_v25  ;;  %v322_v36 = vrot.slane %v320_v28, 1  ;;  %6059 = vmatprep.mubr.msk.bf16.mxu1 %vm460_vm1, %v7186_v34  ;;  %v1488_v40 = vrot.slane %v7183_v30, 1  ;;  %v7207_v42 = vsel %vm1478_vm3, %v1484_v26, %v1486_v35  ;;  %v7301_v23 = vld [vmem:[%s8951_s0 + $0x58] sm:$0xff]   ;;  %7043 = vmatprep.subr.msk.bf16.mxu1 %vm521_vm0, %v7291_v18 }
   0xa   :  { %v7190_v37 = vsel %vm295_vm2, %v302_v31, %v306_v24  ;;  %v7193_v38 = vsel %vm295_vm2, %v310_v32, %v314_v25  ;;  %v330_v43 = vrot.slane %v328_v39, 1  ;;  %v332_v45 = vshrl.u32 %v7176_v27, 16  ;;  %v7308_v24 = vld [vmem:[%s8950_s2 + $0x8] sm:$0xf] }
   0xb   :  { %5887 = vmatprep.mubr.msk.bf16.mxu0 %vm460_vm1, %v7190_v37  ;;  %v7202_v41 = vsel %vm295_vm2, %v318_v33, %v322_v36  ;;  %v336_v46 = vshll.u32 %v7183_v30, 16  ;;  %v326_v47 = vor.u32 %v324_v29, %v322_v36  ;;  %v7219_v48 = vsel %vm1478_vm3, %v1486_v35, %v1488_v40 }
   0xc   :  { %5888 = vmatmul.mubr.msk.bf16.vlgmr.msra.gmra.mrb[0].mxu0 %vm460_vm1, %v7193_v38  ;;  %v334_v50 = vor.u32 %v332_v45, %v330_v43  ;;  %v1490_v52 = vrot.slane %v7212_v44, 1  ;;  %v344_v53 = vshll.u32 %v7212_v44, 16  ;;  %v340_v55 = vshrl.u32 %v7183_v30, 16  ;;  %v7336_v45 = vld [vmem:[%s8951_s0 + $0x60] sm:$0xff]  }
   0xd   :  { %5928 = vmatpush3.bf16.msra.mxu0 %v759_v21  ;;  %5891 = vmatprep.mubr.msk.bf16.mxu0 %vm460_vm1, %v7202_v41  ;;  %v338_v51 = vrot.slane %v336_v46, 1  ;;  %v7233_v54 = vsel %vm295_vm2, %v326_v47, %v330_v43  ;;  %v1492_v56 = vrot.slane %v7224_v49, 1  ;;  %v348_v58 = vshrl.u32 %v7212_v44, 16 }
   0xe   :  { %v352_v59 = vshll.u32 %v7224_v49, 16  ;;  %v7245_v60 = vsel %vm1478_vm3, %v1488_v40, %v1490_v52  ;;  %v346_v61 = vrot.slane %v344_v53, 1  ;;  %v1494_v6 = vrot.slane %v7250_v62, 1  ;;  %7039 = vmatprep.subr.msk.bf16.mxu0 %vm521_vm0, %v7308_v24 }
   0xf   :  { %6060 = vmatmul.mubr.msk.bf16.gmra.mrb[4].mxu1 %vm460_vm1, %v7207_v42  ;;  %v7238_v57 = vsel %vm295_vm2, %v334_v50, %v338_v51  ;;  %v342_v63 = vor.u32 %v340_v55, %v338_v51  ;;  %v7255_v0 = vsel %vm1478_vm3, %v1490_v52, %v1492_v56  ;;  %v360_v8 = vshll.u32 %v7250_v62, 16  ;;  %v7346_v50 = vld [vmem:[%s8951_s0 + $0x68] sm:$0xff]  }
  0x10   :  { %6063 = vmatprep.mubr.msk.bf16.mxu1 %vm460_vm1, %v7219_v48  ;;  %v350_v4 = vor.u32 %v348_v58, %v346_v61  ;;  %v354_v5 = vrot.slane %v352_v59, 1  ;;  %v356_v10 = vshrl.u32 %v7224_v49, 16  ;;  %v1496_v11 = vrot.slane %v7260_v1, 1 }
  0x11   :  { %v7269_v9 = vsel %vm295_vm2, %v342_v63, %v346_v61  ;;  %v364_v13 = vshrl.u32 %v7250_v62, 16  ;;  %v368_v14 = vshll.u32 %v7260_v1, 16  ;;  %v7281_v15 = vsel %vm1478_vm3, %v1492_v56, %v1494_v6 }
  0x12   :  { %v7274_v12 = vsel %vm295_vm2, %v350_v4, %v354_v5  ;;  %v362_v16 = vrot.slane %v360_v8, 1  ;;  %v358_v19 = vor.u32 %v356_v10, %v354_v5  ;;  %v7296_v21 = vsel %vm1478_vm3, %v1494_v6, %v1496_v11  ;;  %v7372_v8 = vld [vmem:[%s8951_s0 + $0x70] sm:$0xff]  }
  0x13   :  { %8979 = vst [vmem:[#allocation2_spill] sm:$0xff] %v7296_v21  ;;  %v370_v26 = vrot.slane %v368_v14, 1  ;;  %v1498_v28 = vrot.slane %v7286_v17, 1  ;;  %v376_v29 = vshll.u32 %v7286_v17, 16  ;;  %v372_v32 = vshrl.u32 %v7260_v1, 16 }
  0x14   :  { %5892 = vmatmul.mubr.msk.bf16.gmra.mrb[4].mxu0 %vm460_vm1, %v7233_v54  ;;  %v366_v25 = vor.u32 %v364_v13, %v362_v16  ;;  %v7319_v31 = vsel %vm295_vm2, %v358_v19, %v362_v16  ;;  %v1500_v33 = vrot.slane %v7301_v23, 1  ;;  %v380_v36 = vshrl.u32 %v7286_v17, 16  ;;  %v7382_v13 = vld [vmem:[%s8951_s0 + $0x78] sm:$0xff]  }
  0x15   :  { %5895 = vmatprep.mubr.msk.bf16.mxu0 %vm460_vm1, %v7238_v57  ;;  %v384_v39 = vshll.u32 %v7301_v23, 16  ;;  %v7331_v40 = vsel %vm1478_vm3, %v1496_v11, %v1498_v28  ;;  %v378_v43 = vrot.slane %v376_v29, 1  ;;  %v374_v46 = vor.u32 %v372_v32, %v370_v26 }
  0x16   :  { %v7324_v35 = vsel %vm295_vm2, %v366_v25, %v370_v26  ;;  %8980 = vst [vmem:[#allocation3_spill] sm:$0xff] %v7331_v40  ;;  %v7341_v47 = vsel %vm1478_vm3, %v1498_v28, %v1500_v33  ;;  %v1502_v53 = vrot.slane %v7336_v45, 1  ;;  %v392_v55 = vshll.u32 %v7336_v45, 16 }
  0x17   :  { %6064 = vmatmul.mubr.msk.bf16.gmra.mrb[8].mxu1 %vm460_vm1, %v7245_v60  ;;  %8981 = vst [vmem:[#allocation4_spill] sm:$0xff] %v7341_v47  ;;  %v382_v51 = vor.u32 %v380_v36, %v378_v43  ;;  %v386_v52 = vrot.slane %v384_v39, 1  ;;  %v7355_v56 = vsel %vm295_vm2, %v374_v46, %v378_v43  ;;  %v388_v58 = vshrl.u32 %v7301_v23, 16  ;;  %v7408_v46 = vld [vmem:[%s8951_s0 + $0x80] sm:$0xff]  }
  0x18   :  { %6067 = vmatprep.mubr.msk.bf16.mxu1 %vm460_vm1, %v7255_v0  ;;  %v1504_v59 = vrot.slane %v7346_v50, 1  ;;  %v396_v63 = vshrl.u32 %v7336_v45, 16  ;;  %v400_v4 = vshll.u32 %v7346_v50, 16  ;;  %v7367_v5 = vsel %vm1478_vm3, %v1500_v33, %v1502_v53 }
  0x19   :  { %v7360_v61 = vsel %vm295_vm2, %v382_v51, %v386_v52  ;;  %8982 = vst [vmem:[#allocation5_spill] sm:$0xff] %v7367_v5  ;;  %v394_v6 = vrot.slane %v392_v55, 1  ;;  %v390_v10 = vor.u32 %v388_v58, %v386_v52  ;;  %v1506_v19 = vrot.slane %v7372_v8, 1 }
  0x1a   :  { %v7377_v11 = vsel %vm1478_vm3, %v1502_v53, %v1504_v59  ;;  %v402_v16 = vrot.slane %v400_v4, 1  ;;  %v408_v25 = vshll.u32 %v7372_v8, 16  ;;  %v404_v28 = vshrl.u32 %v7346_v50, 16  ;;  %v7418_v53 = vld [vmem:[%s8951_s0 + $0x88] sm:$0xff]  }
  0x1b   :  { %8983 = vst [vmem:[#allocation6_spill] sm:$0xff] %v7377_v11  ;;  %v398_v14 = vor.u32 %v396_v63, %v394_v6  ;;  %v7391_v26 = vsel %vm295_vm2, %v390_v10, %v394_v6  ;;  %v1508_v29 = vrot.slane %v7382_v13, 1  ;;  %v412_v33 = vshrl.u32 %v7372_v8, 16 }
  0x1c   :  { %5896 = vmatmul.mubr.msk.bf16.gmra.mrb[8].mxu0 %vm460_vm1, %v7269_v9  ;;  %v416_v36 = vshll.u32 %v7382_v13, 16  ;;  %v7403_v39 = vsel %vm1478_vm3, %v1504_v59, %v1506_v19  ;;  %v410_v43 = vrot.slane %v408_v25, 1  ;;  %v406_v51 = vor.u32 %v404_v28, %v402_v16 }
  0x1d   :  { %5899 = vmatprep.mubr.msk.bf16.mxu0 %vm460_vm1, %v7274_v12  ;;  %v7396_v32 = vsel %vm295_vm2, %v398_v14, %v402_v16  ;;  %8984 = vst [vmem:[#allocation7_spill] sm:$0xff] %v7403_v39  ;;  %v7413_v52 = vsel %vm1478_vm3, %v1506_v19, %v1508_v29  ;;  %v1510_v59 = vrot.slane %v7408_v46, 1  ;;  %v424_v63 = vshll.u32 %v7408_v46, 16 }
  0x1e   :  { %8985 = vst [vmem:[#allocation8_spill] sm:$0xff] %v7413_v52  ;;  %v414_v55 = vor.u32 %v412_v33, %v410_v43  ;;  %v418_v58 = vrot.slane %v416_v36, 1  ;;  %v7427_v4 = vsel %vm295_vm2, %v406_v51, %v410_v43  ;;  %v420_v6 = vshrl.u32 %v7382_v13, 16  ;;  %v7444_v33 = vld [vmem:[%s8951_s0 + $0x90] sm:$0xff]   ;;  %v7454_v51 = vld [vmem:[%s8951_s0 + $0x98] sm:$0xff]  }
  0x1f   :  { %6068 = vmatmul.mubr.msk.bf16.gmra.mrb[12].mxu1 %vm460_vm1, %v7281_v15  ;;  %v1512_v10 = vrot.slane %v7418_v53, 1  ;;  %v428_v16 = vshrl.u32 %v7408_v46, 16  ;;  %v432_v19 = vshll.u32 %v7418_v53, 16  ;;  %v7439_v25 = vsel %vm1478_vm3, %v1508_v29, %v1510_v59  ;;  %8988 = vst [vmem:[#allocation11_spill] sm:$0xff] %v7454_v51 }
  0x20   :  { %6071 = vmatprep.mubr.msk.bf16.mxu1 %vm460_vm1, %v7296_v21  ;;  %v7432_v14 = vsel %vm295_vm2, %v414_v55, %v418_v58  ;;  %8986 = vst [vmem:[#allocation9_spill] sm:$0xff] %v7439_v25  ;;  %v426_v28 = vrot.slane %v424_v63, 1  ;;  %v422_v36 = vor.u32 %v420_v6, %v418_v58  ;;  %v1514_v63 = vrot.slane %v7444_v33, 1 }
  0x21   :  { %v7449_v43 = vsel %vm1478_vm3, %v1510_v59, %v1512_v10  ;;  %v434_v55 = vrot.slane %v432_v19, 1  ;;  %v440_v58 = vshll.u32 %v7444_v33, 16  ;;  %v436_v6 = vshrl.u32 %v7418_v53, 16 }
  0x22   :  { %8987 = vst [vmem:[#allocation10_spill] sm:$0xff] %v7449_v43  ;;  %v430_v29 = vor.u32 %v428_v16, %v426_v28  ;;  %v7463_v59 = vsel %vm295_vm2, %v422_v36, %v426_v28  ;;  %v7472_v16 = vld [vmem:[%s8952_s1 + $0xa0] sm:$0xf]  ;;  %v7482_v28 = vsel %vm1478_vm3, %v1512_v10, %v1514_v63  ;;  %vm5048_vm6 = vcmask 257024  }
  0x23   :  { %v442_v36 = vrot.slane %v440_v58, 1 }
  0x24   :  { %5900 = vmatmul.mubr.msk.bf16.gmra.mrb[12].mxu0 %vm460_vm1, %v7319_v31  ;;  %v7475_v19 = vsel %vm295_vm2, %v430_v29, %v434_v55 }
  0x25   :  { %5903 = vmatprep.mubr.msk.bf16.mxu0 %vm460_vm1, %v7324_v35 }
  0x27   :  { %6072 = vmatmul.mubr.msk.bf16.gmra.mrb[16].mxu1 %vm460_vm1, %v7331_v40  ;;  %v452_v40 = vshrl.u32 %v7454_v51, 16 }
  0x28   :  { %6075 = vmatprep.mubr.msk.bf16.mxu1 %vm460_vm1, %v7341_v47 }
  0x2c   :  { %5904 = vmatmul.mubr.msk.bf16.gmra.mrb[16].mxu0 %vm460_vm1, %v7355_v56 }
  0x2d   :  { %5907 = vmatprep.mubr.msk.bf16.mxu0 %vm460_vm1, %v7360_v61 }
  0x2f   :  { %6076 = vmatmul.mubr.msk.bf16.gmra.mrb[20].mxu1 %vm460_vm1, %v7367_v5 }
  0x30   :  { %6079 = vmatprep.mubr.msk.bf16.mxu1 %vm460_vm1, %v7377_v11  ;;  %v438_v11 = vor.u32 %v436_v6, %v434_v55 }
  0x32   :  { %v7497_v58 = vsel %vm295_vm2, %v438_v11, %v442_v36  ;;  %v1975_v11 = vsel %vm521_vm0, %v7291_v18, 0 }
  0x34   :  { %5908 = vmatmul.mubr.msk.bf16.gmra.mrb[20].mxu0 %vm460_vm1, %v7391_v26 }
  0x35   :  { %5911 = vmatprep.mubr.msk.bf16.mxu0 %vm460_vm1, %v7396_v32 }
  0x37   :  { %6080 = vmatmul.mubr.msk.bf16.gmra.mrb[24].mxu1 %vm460_vm1, %v7403_v39  ;;  %v5506_v39 = vcombine.low %v7472_v16, %v7472_v16 }
  0x38   :  { %6083 = vmatprep.mubr.msk.bf16.mxu1 %vm460_vm1, %v7413_v52  ;;  %v7467_v52 = vrot.slane %v7454_v51, 1 }
  0x39   :  { %v1518_v10 = vrot.slane %v5506_v39, 1  ;;  %v456_v21 = vshll.u32 %v5506_v39, 16  ;;  %v5100_v39 = vld [vmem:[%s8952_s1 + $0xa4] sm:$0xf] }
  0x3a   :  { %v7490_v29 = vsel %vm1478_vm3, %v1514_v63, %v7467_v52  ;;  %v7676_v6 = vcombine.low %v7472_v16, %v5100_v39  ;;  %v8993_v39 = vld [vmem:[#allocation3_spill] sm:$0xff] }
  0x3b   :  { %v458_v63 = vrot.slane %v456_v21, 1  ;;  %v5275_v21 = vld [vmem:[%s8950_s2 + $0x1c] sm:$0xf] }
  0x3c   :  { %5912 = vmatmul.mubr.msk.bf16.gmra.mrb[24].mxu0 %vm460_vm1, %v7427_v4  ;;  %v2225_v18 = vsel %vm521_vm0, %v5275_v21, 0  ;;  %8989 = vst [vmem:[#allocation12_spill] sm:$0xff] %v7676_v6 }
  0x3d   :  { %5915 = vmatprep.mubr.msk.bf16.mxu0 %vm460_vm1, %v7432_v14 }
  0x3f   :  { %6084 = vmatmul.mubr.msk.bf16.gmra.mrb[28].mxu1 %vm460_vm1, %v7439_v25  ;;  %v448_v25 = vshll.u32 %v7454_v51, 16 }
  0x40   :  { %6087 = vmatprep.mubr.msk.bf16.mxu1 %vm460_vm1, %v7449_v43  ;;  %v444_v43 = vshrl.u32 %v7444_v33, 16 }
  0x41   :  { %v450_v47 = vrot.slane %v448_v25, 1  ;;  %v1519_v25 = vsel %vm1478_vm3, %v7467_v52, %v1518_v10  ;;  %v7686_v10 = vld [vmem:[%s8952_s1 + $0xa8] sm:$0xf] }
  0x42   :  { %v446_v5 = vor.u32 %v444_v43, %v442_v36  ;;  %v1199_v36 = vshll.u32 %v7676_v6, 16  ;;  %8990 = vst [vmem:[#allocation13_spill] sm:$0xff] %v7686_v10  ;;  %v7694_v16 = vcombine.low %v7686_v10, %v7686_v10 }
  0x43   :  { %v7509_v43 = vor.u32 %v452_v40, %v450_v47 }
  0x44   :  { %5916 = vmatmul.mubr.msk.bf16.gmra.mrb[28].mxu0 %vm460_vm1, %v7463_v59  ;;  %v7501_v55 = vsel %vm295_vm2, %v446_v5, %v450_v47  ;;  %v5297_v47 = vld [vmem:[%s8950_s2 + $0x24] sm:$0xf] }
  0x45   :  { %5919 = vmatprep.mubr.msk.bf16.mxu0 %vm460_vm1, %v7475_v19  ;;  %v459_v5 = vsel %vm295_vm2, %v7509_v43, %v458_v63  ;;  %v1203_v63 = vshrl.u32 %v7676_v6, 16 }
  0x47   :  { %6088 = vmatmul.mubr.msk.bf16.gmra.mrb[32].mxu1 %vm460_vm1, %v7482_v28 }
  0x48   :  { %6091 = vmatprep.mubr.msk.bf16.mxu1 %vm460_vm1, %v7490_v29 }
  0x4c   :  { %5920 = vmatmul.mubr.msk.bf16.gmra.mrb[32].mxu0 %vm460_vm1, %v7497_v58 }
  0x4d   :  { %5923 = vmatprep.mubr.msk.bf16.mxu0 %vm460_vm1, %v7501_v55 }
  0x4f   :  { %6092 = vmatmul.mubr.msk.bf16.gmra.mrb[36].mxu1 %vm460_vm1, %v1519_v25  ;;  %v1201_v25 = vrot.slane %v1199_v36, 1  ;;  %v8994_v36 = vld [vmem:[#allocation4_spill] sm:$0xff] }
  0x50   :  { %6097 = vmatprep.mubr.msk.bf16.mxu1 %vm460_vm1, %v7190_v37  ;;  %v961_v37 = vsel %vm521_vm0, %v7308_v24, 0  ;;  %v5382_v24 = vld [vmem:[%s8950_s2 + $0x34] sm:$0xf] }
  0x54   :  { %5924 = vmatmul.mubr.msk.bf16.gmra.mrb[36].mxu0 %vm460_vm1, %v459_v5 }
  0x55   :  { %5929 = vmatprep.mubr.msk.bf16.mxu0 %vm460_vm1, %v7124_v2  ;;  %v5191_v2 = vld [vmem:[%s8950_s2 + $0xc] sm:$0xf] }
  0x56   :  { %v1218_v40 = vsel %vm521_vm0, %v5191_v2, 0 }
  0x57   :  { %6098 = vmatmul.mubr.msk.bf16.vlgmr.msra.gmra.mrb[0].mxu1 %vm460_vm1, %v7193_v38 }
  0x58   :  { %6138 = vmatpush3.bf16.msra.mxu1 %v1975_v11  ;;  %6101 = vmatprep.mubr.msk.bf16.mxu1 %vm460_vm1, %v7202_v41  ;;  %v7704_v11 = vsel %vm295_vm2, %v7509_v43, %v1201_v25  ;;  %v3360_v43 = vsel %vm521_vm0, %v5382_v24, 0 }
  0x59   :  { %7044 = vmatprep.subr.msk.bf16.mxu1 %vm521_vm0, %v5275_v21  ;;  %v7710_v21 = vor.u32 %v1203_v63, %v1201_v25  ;;  %v8995_v25 = vld [vmem:[#allocation5_spill] sm:$0xff]  ;;  %v8996_v63 = vld [vmem:[#allocation6_spill] sm:$0xff] }
  0x5b   :  { %8991 = vst [vmem:[#allocation14_spill] sm:$0xff] %v7710_v21 }
  0x5c   :  { %5930 = vmatmul.mubr.msk.bf16.vlgmr.msra.gmra.mrb[0].mxu0 %vm460_vm1, %v7129_v3 }
  0x5d   :  { %5970 = vmatpush3.bf16.msra.mxu0 %v961_v37  ;;  %5933 = vmatprep.mubr.msk.bf16.mxu0 %vm460_vm1, %v7143_v7 }
  0x5e   :  { %7040 = vmatprep.subr.msk.bf16.mxu0 %vm521_vm0, %v5191_v2 }
  0x5f   :  { %6102 = vmatmul.mubr.msk.bf16.gmra.mrb[4].mxu1 %vm460_vm1, %v7233_v54 }
  0x60   :  { %6105 = vmatprep.mubr.msk.bf16.mxu1 %vm460_vm1, %v7238_v57 }
  0x64   :  { %5934 = vmatmul.mubr.msk.bf16.gmra.mrb[4].mxu0 %vm460_vm1, %v7163_v20 }
  0x65   :  { %5937 = vmatprep.mubr.msk.bf16.mxu0 %vm460_vm1, %v7176_v27 }
  0x67   :  { %6106 = vmatmul.mubr.msk.bf16.gmra.mrb[8].mxu1 %vm460_vm1, %v7269_v9 }
  0x68   :  { %6109 = vmatprep.mubr.msk.bf16.mxu1 %vm460_vm1, %v7274_v12 }
  0x6c   :  { %5938 = vmatmul.mubr.msk.bf16.gmra.mrb[8].mxu0 %vm460_vm1, %v7183_v30 }
  0x6d   :  { %5941 = vmatprep.mubr.msk.bf16.mxu0 %vm460_vm1, %v7212_v44 }
  0x6f   :  { %6110 = vmatmul.mubr.msk.bf16.gmra.mrb[12].mxu1 %vm460_vm1, %v7319_v31 }
  0x70   :  { %6113 = vmatprep.mubr.msk.bf16.mxu1 %vm460_vm1, %v7324_v35 }
  0x74   :  { %5942 = vmatmul.mubr.msk.bf16.gmra.mrb[12].mxu0 %vm460_vm1, %v7224_v49 }
  0x75   :  { %5945 = vmatprep.mubr.msk.bf16.mxu0 %vm460_vm1, %v7250_v62 }
  0x77   :  { %6114 = vmatmul.mubr.msk.bf16.gmra.mrb[16].mxu1 %vm460_vm1, %v7355_v56 }
  0x78   :  { %6117 = vmatprep.mubr.msk.bf16.mxu1 %vm460_vm1, %v7360_v61 }
  0x7c   :  { %5946 = vmatmul.mubr.msk.bf16.gmra.mrb[16].mxu0 %vm460_vm1, %v7260_v1 }
  0x7d   :  { %5949 = vmatprep.mubr.msk.bf16.mxu0 %vm460_vm1, %v7286_v17 }
  0x7f   :  { %6118 = vmatmul.mubr.msk.bf16.gmra.mrb[20].mxu1 %vm460_vm1, %v7391_v26 }
  0x80   :  { %6121 = vmatprep.mubr.msk.bf16.mxu1 %vm460_vm1, %v7396_v32 }
  0x84   :  { %5950 = vmatmul.mubr.msk.bf16.gmra.mrb[20].mxu0 %vm460_vm1, %v7301_v23 }
  0x85   :  { %5953 = vmatprep.mubr.msk.bf16.mxu0 %vm460_vm1, %v7336_v45 }
  0x87   :  { %6122 = vmatmul.mubr.msk.bf16.gmra.mrb[24].mxu1 %vm460_vm1, %v7427_v4 }
  0x88   :  { %6125 = vmatprep.mubr.msk.bf16.mxu1 %vm460_vm1, %v7432_v14 }
  0x8c   :  { %5954 = vmatmul.mubr.msk.bf16.gmra.mrb[24].mxu0 %vm460_vm1, %v7346_v50 }
  0x8d   :  { %5957 = vmatprep.mubr.msk.bf16.mxu0 %vm460_vm1, %v7372_v8 }
  0x8f   :  { %6126 = vmatmul.mubr.msk.bf16.gmra.mrb[28].mxu1 %vm460_vm1, %v7463_v59 }
  0x90   :  { %6129 = vmatprep.mubr.msk.bf16.mxu1 %vm460_vm1, %v7475_v19 }
  0x94   :  { %5958 = vmatmul.mubr.msk.bf16.gmra.mrb[28].mxu0 %vm460_vm1, %v7382_v13 }
  0x95   :  { %5961 = vmatprep.mubr.msk.bf16.mxu0 %vm460_vm1, %v7408_v46 }
  0x97   :  { %6130 = vmatmul.mubr.msk.bf16.gmra.mrb[32].mxu1 %vm460_vm1, %v7497_v58 }
  0x98   :  { %6133 = vmatprep.mubr.msk.bf16.mxu1 %vm460_vm1, %v7501_v55 }
  0x9c   :  { %5962 = vmatmul.mubr.msk.bf16.gmra.mrb[32].mxu0 %vm460_vm1, %v7418_v53 }
  0x9d   :  { %5965 = vmatprep.mubr.msk.bf16.mxu0 %vm460_vm1, %v7444_v33 }
  0x9f   :  { %6134 = vmatmul.mubr.msk.bf16.gmra.mrb[36].mxu1 %vm460_vm1, %v459_v5  ;;  %v1207_v5 = vshll.u32 %v7694_v16, 16 }
  0xa0   :  { %6139 = vmatprep.mubr.msk.bf16.mxu1 %vm460_vm1, %v7193_v38 }
  0xa1   :  { %v1209_v37 = vrot.slane %v1207_v5, 1  ;;  %v8997_v5 = vld [vmem:[#allocation7_spill] sm:$0xff] }
  0xa3   :  { %v7716_v2 = vsel %vm295_vm2, %v7710_v21, %v1209_v37  ;;  %v8998_v37 = vld [vmem:[#allocation8_spill] sm:$0xff]  ;;  %v7799_v21 = vrot.slane %v7676_v6, 1 }
  0xa4   :  { %5966 = vmatmul.mubr.msk.bf16.gmra.mrb[36].mxu0 %vm460_vm1, %v7454_v51 }
  0xa5   :  { %5971 = vmatprep.mubr.msk.bf16.mxu0 %vm460_vm1, %v7129_v3  ;;  %v7808_v10 = vsel %vm1478_vm3, %v7467_v52, %v7799_v21 }
  0xa7   :  { %6140 = vmatmul.mubr.msk.bf16.vlgmr.msra.gmra.mrb[0].mxu1 %vm460_vm1, %v7202_v41 }
  0xa8   :  { %6180 = vmatpush3.bf16.msra.mxu1 %v2225_v18  ;;  %6143 = vmatprep.mubr.msk.bf16.mxu1 %vm460_vm1, %v7233_v54  ;;  %v5381_v18 = vld [vmem:[%s8950_s2 + $0x30] sm:$0xf] }
  0xa9   :  { %7049 = vmatprep.subr.msk.bf16.mxu1 %vm521_vm0, %v5382_v24  ;;  %v5296_v24 = vld [vmem:[%s8950_s2 + $0x20] sm:$0xf]  ;;  %v3556_v52 = vsel %vm521_vm0, %v5381_v18, 0 }
  0xac   :  { %5972 = vmatmul.mubr.msk.bf16.vlgmr.msra.gmra.mrb[0].mxu0 %vm460_vm1, %v7143_v7 }
  0xad   :  { %6012 = vmatpush3.bf16.msra.mxu0 %v1218_v40  ;;  %5975 = vmatprep.mubr.msk.bf16.mxu0 %vm460_vm1, %v7163_v20  ;;  %v2465_v40 = vsel %vm521_vm0, %v5297_v47, 0 }
  0xae   :  { %7045 = vmatprep.subr.msk.bf16.mxu0 %vm521_vm0, %v5297_v47  ;;  %v8992_v47 = vld [vmem:[#allocation2_spill] sm:$0xff] }
  0xaf   :  { %6144 = vmatmul.mubr.msk.bf16.gmra.mrb[4].mxu1 %vm460_vm1, %v7238_v57 }
  0xb0   :  { %6147 = vmatprep.mubr.msk.bf16.mxu1 %vm460_vm1, %v7269_v9 }
  0xb4   :  { %5976 = vmatmul.mubr.msk.bf16.gmra.mrb[4].mxu0 %vm460_vm1, %v7176_v27 }
  0xb5   :  { %5979 = vmatprep.mubr.msk.bf16.mxu0 %vm460_vm1, %v7183_v30 }
  0xb7   :  { %6148 = vmatmul.mubr.msk.bf16.gmra.mrb[8].mxu1 %vm460_vm1, %v7274_v12 }
  0xb8   :  { %6151 = vmatprep.mubr.msk.bf16.mxu1 %vm460_vm1, %v7319_v31 }
  0xbc   :  { %5980 = vmatmul.mubr.msk.bf16.gmra.mrb[8].mxu0 %vm460_vm1, %v7212_v44 }
  0xbd   :  { %5983 = vmatprep.mubr.msk.bf16.mxu0 %vm460_vm1, %v7224_v49 }
  0xbf   :  { %6152 = vmatmul.mubr.msk.bf16.gmra.mrb[12].mxu1 %vm460_vm1, %v7324_v35 }
  0xc0   :  { %6155 = vmatprep.mubr.msk.bf16.mxu1 %vm460_vm1, %v7355_v56 }
  0xc4   :  { %5984 = vmatmul.mubr.msk.bf16.gmra.mrb[12].mxu0 %vm460_vm1, %v7250_v62 }
  0xc5   :  { %5987 = vmatprep.mubr.msk.bf16.mxu0 %vm460_vm1, %v7260_v1 }
  0xc7   :  { %6156 = vmatmul.mubr.msk.bf16.gmra.mrb[16].mxu1 %vm460_vm1, %v7360_v61 }
  0xc8   :  { %6159 = vmatprep.mubr.msk.bf16.mxu1 %vm460_vm1, %v7391_v26 }
  0xcc   :  { %5988 = vmatmul.mubr.msk.bf16.gmra.mrb[16].mxu0 %vm460_vm1, %v7286_v17 }
  0xcd   :  { %5991 = vmatprep.mubr.msk.bf16.mxu0 %vm460_vm1, %v7301_v23 }
  0xcf   :  { %6160 = vmatmul.mubr.msk.bf16.gmra.mrb[20].mxu1 %vm460_vm1, %v7396_v32 }
  0xd0   :  { %6163 = vmatprep.mubr.msk.bf16.mxu1 %vm460_vm1, %v7427_v4 }
  0xd4   :  { %5992 = vmatmul.mubr.msk.bf16.gmra.mrb[20].mxu0 %vm460_vm1, %v7336_v45 }
  0xd5   :  { %5995 = vmatprep.mubr.msk.bf16.mxu0 %vm460_vm1, %v7346_v50 }
  0xd7   :  { %6164 = vmatmul.mubr.msk.bf16.gmra.mrb[24].mxu1 %vm460_vm1, %v7432_v14 }
  0xd8   :  { %6167 = vmatprep.mubr.msk.bf16.mxu1 %vm460_vm1, %v7463_v59 }
  0xdc   :  { %5996 = vmatmul.mubr.msk.bf16.gmra.mrb[24].mxu0 %vm460_vm1, %v7372_v8 }
  0xdd   :  { %5999 = vmatprep.mubr.msk.bf16.mxu0 %vm460_vm1, %v7382_v13 }
  0xdf   :  { %6168 = vmatmul.mubr.msk.bf16.gmra.mrb[28].mxu1 %vm460_vm1, %v7475_v19 }
  0xe0   :  { %6171 = vmatprep.mubr.msk.bf16.mxu1 %vm460_vm1, %v7497_v58 }
  0xe4   :  { %6000 = vmatmul.mubr.msk.bf16.gmra.mrb[28].mxu0 %vm460_vm1, %v7408_v46 }
  0xe5   :  { %6003 = vmatprep.mubr.msk.bf16.mxu0 %vm460_vm1, %v7418_v53 }
  0xe7   :  { %6172 = vmatmul.mubr.msk.bf16.gmra.mrb[32].mxu1 %vm460_vm1, %v7501_v55 }
  0xe8   :  { %6175 = vmatprep.mubr.msk.bf16.mxu1 %vm460_vm1, %v7704_v11 }
  0xec   :  { %6004 = vmatmul.mubr.msk.bf16.gmra.mrb[32].mxu0 %vm460_vm1, %v7444_v33 }
  0xed   :  { %6007 = vmatprep.mubr.msk.bf16.mxu0 %vm460_vm1, %v7454_v51 }
  0xef   :  { %6176 = vmatmul.mubr.msk.bf16.gmra.mrb[36].mxu1 %vm460_vm1, %v7716_v2 }
  0xf0   :  { %6181 = vmatprep.mubr.msk.bf16.mxu1 %vm460_vm1, %v7168_v22 }
  0xf4   :  { %6008 = vmatmul.mubr.msk.bf16.gmra.mrb[36].mxu0 %vm460_vm1, %v7676_v6  ;;  %v2216_v6 = vrot.slane %v7694_v16, 1  ;;  %v5338_v16 = vld [vmem:[%s8950_s2 + $0x28] sm:$0xf] }
  0xf5   :  { %6013 = vmatprep.mubr.msk.bf16.mxu0 %vm460_vm1, %v7193_v38 }
  0xf6   :  { %v2217_v51 = vsel %vm1478_vm3, %v7799_v21, %v2216_v6  ;;  %v5423_v6 = vld [vmem:[%s8950_s2 + $0x38] sm:$0xf] }
  0xf7   :  { %6182 = vmatmul.mubr.msk.bf16.vlgmr.msra.gmra.mrb[0].mxu1 %vm460_vm1, %v7186_v34 }
  0xf8   :  { %6390 = vmatpush3.bf16.msra.mxu1 %v3360_v43  ;;  %6185 = vmatprep.mubr.msk.bf16.mxu1 %vm460_vm1, %v7207_v42  ;;  %v8999_v43 = vld [vmem:[#allocation9_spill] sm:$0xff] }
  0xf9   :  { %7050 = vmatprep.subr.msk.bf16.mxu1 %vm521_vm0, %v5381_v18  ;;  %v3754_v18 = vsel %vm521_vm0, %v5423_v6, 0 }
  0xfc   :  { %6014 = vmatmul.mubr.msk.bf16.vlgmr.msra.gmra.mrb[0].mxu0 %vm460_vm1, %v7202_v41 }
  0xfd   :  { %6222 = vmatpush3.bf16.msra.mxu0 %v2465_v40  ;;  %6017 = vmatprep.mubr.msk.bf16.mxu0 %vm460_vm1, %v7233_v54  ;;  %v9000_v40 = vld [vmem:[#allocation10_spill] sm:$0xff] }
  0xfe   :  { %7046 = vmatprep.subr.msk.bf16.mxu0 %vm521_vm0, %v5296_v24 }
  0xff   :  { %6186 = vmatmul.mubr.msk.bf16.gmra.mrb[4].mxu1 %vm460_vm1, %v7219_v48 }
 0x100   :  { %6189 = vmatprep.mubr.msk.bf16.mxu1 %vm460_vm1, %v7245_v60 }
 0x104   :  { %6018 = vmatmul.mubr.msk.bf16.gmra.mrb[4].mxu0 %vm460_vm1, %v7238_v57 }
 0x105   :  { %6021 = vmatprep.mubr.msk.bf16.mxu0 %vm460_vm1, %v7269_v9 }
 0x107   :  { %6190 = vmatmul.mubr.msk.bf16.gmra.mrb[8].mxu1 %vm460_vm1, %v7255_v0 }
 0x108   :  { %6193 = vmatprep.mubr.msk.bf16.mxu1 %vm460_vm1, %v7281_v15 }
 0x10c   :  { %6022 = vmatmul.mubr.msk.bf16.gmra.mrb[8].mxu0 %vm460_vm1, %v7274_v12 }
 0x10d   :  { %6025 = vmatprep.mubr.msk.bf16.mxu0 %vm460_vm1, %v7319_v31 }
 0x10f   :  { %6194 = vmatmul.mubr.msk.bf16.gmra.mrb[12].mxu1 %vm460_vm1, %v8992_v47 }
 0x110   :  { %6197 = vmatprep.mubr.msk.bf16.mxu1 %vm460_vm1, %v8993_v39 }
 0x114   :  { %6026 = vmatmul.mubr.msk.bf16.gmra.mrb[12].mxu0 %vm460_vm1, %v7324_v35 }
 0x115   :  { %6029 = vmatprep.mubr.msk.bf16.mxu0 %vm460_vm1, %v7355_v56 }
 0x117   :  { %6198 = vmatmul.mubr.msk.bf16.gmra.mrb[16].mxu1 %vm460_vm1, %v8994_v36 }
 0x118   :  { %6201 = vmatprep.mubr.msk.bf16.mxu1 %vm460_vm1, %v8995_v25 }
 0x11c   :  { %6030 = vmatmul.mubr.msk.bf16.gmra.mrb[16].mxu0 %vm460_vm1, %v7360_v61 }
 0x11d   :  { %6033 = vmatprep.mubr.msk.bf16.mxu0 %vm460_vm1, %v7391_v26 }
 0x11f   :  { %6202 = vmatmul.mubr.msk.bf16.gmra.mrb[20].mxu1 %vm460_vm1, %v8996_v63 }
 0x120   :  { %6205 = vmatprep.mubr.msk.bf16.mxu1 %vm460_vm1, %v8997_v5 }
 0x124   :  { %6034 = vmatmul.mubr.msk.bf16.gmra.mrb[20].mxu0 %vm460_vm1, %v7396_v32 }
 0x125   :  { %6037 = vmatprep.mubr.msk.bf16.mxu0 %vm460_vm1, %v7427_v4 }
 0x127   :  { %6206 = vmatmul.mubr.msk.bf16.gmra.mrb[24].mxu1 %vm460_vm1, %v8998_v37 }
 0x128   :  { %6209 = vmatprep.mubr.msk.bf16.mxu1 %vm460_vm1, %v8999_v43 }
 0x12c   :  { %6038 = vmatmul.mubr.msk.bf16.gmra.mrb[24].mxu0 %vm460_vm1, %v7432_v14 }
 0x12d   :  { %6041 = vmatprep.mubr.msk.bf16.mxu0 %vm460_vm1, %v7463_v59 }
 0x12f   :  { %6210 = vmatmul.mubr.msk.bf16.gmra.mrb[28].mxu1 %vm460_vm1, %v9000_v40 }
 0x130   :  { %6213 = vmatprep.mubr.msk.bf16.mxu1 %vm460_vm1, %v7482_v28 }
 0x134   :  { %6042 = vmatmul.mubr.msk.bf16.gmra.mrb[28].mxu0 %vm460_vm1, %v7475_v19 }
 0x135   :  { %6045 = vmatprep.mubr.msk.bf16.mxu0 %vm460_vm1, %v7497_v58 }
 0x137   :  { %6214 = vmatmul.mubr.msk.bf16.gmra.mrb[32].mxu1 %vm460_vm1, %v7490_v29 }
 0x138   :  { %6217 = vmatprep.mubr.msk.bf16.mxu1 %vm460_vm1, %v7808_v10 }
 0x13c   :  { %6046 = vmatmul.mubr.msk.bf16.gmra.mrb[32].mxu0 %vm460_vm1, %v7501_v55 }
 0x13d   :  { %6049 = vmatprep.mubr.msk.bf16.mxu0 %vm460_vm1, %v7704_v11 }
 0x13f   :  { %6218 = vmatmul.mubr.msk.bf16.gmra.mrb[36].mxu1 %vm460_vm1, %v2217_v51 }
 0x140   :  { %6391 = vmatprep.mubr.msk.bf16.mxu1 %vm460_vm1, %v7168_v22  ;;  %v2661_v22 = vsel %vm521_vm0, %v5296_v24, 0  ;;  %v7921_v24 = vld [vmem:[%s8950_s2 + $0x3c] sm:$0xf] }
 0x144   :  { %6050 = vmatmul.mubr.msk.bf16.gmra.mrb[36].mxu0 %vm460_vm1, %v7716_v2 }
 0x145   :  { %6223 = vmatprep.mubr.msk.bf16.mxu0 %vm460_vm1, %v7193_v38 }
 0x147   :  { %6392 = vmatmul.mubr.msk.bf16.vlgmr.msra.gmra.mrb[40].mxu1 %vm460_vm1, %v7186_v34 }
 0x148   :  { %6432 = vmatpush3.bf16.msra.mxu1 %v3556_v52  ;;  %6395 = vmatprep.mubr.msk.bf16.mxu1 %vm460_vm1, %v7207_v42 }
 0x149   :  { %7051 = vmatprep.subr.msk.bf16.mxu1 %vm521_vm0, %v5423_v6 }
 0x14c   :  { %6224 = vmatmul.mubr.msk.bf16.vlgmr.msra.gmra.mrb[40].mxu0 %vm460_vm1, %v7202_v41 }
 0x14d   :  { %6264 = vmatpush3.bf16.msra.mxu0 %v2661_v22  ;;  %6227 = vmatprep.mubr.msk.bf16.mxu0 %vm460_vm1, %v7233_v54 }
 0x14e   :  { %7047 = vmatprep.subr.msk.bf16.mxu0 %vm521_vm0, %v5338_v16 }
 0x14f   :  { %6396 = vmatmul.mubr.msk.bf16.gmra.mrb[44].mxu1 %vm460_vm1, %v7219_v48 }
 0x150   :  { %6399 = vmatprep.mubr.msk.bf16.mxu1 %vm460_vm1, %v7245_v60 }
 0x154   :  { %6228 = vmatmul.mubr.msk.bf16.gmra.mrb[44].mxu0 %vm460_vm1, %v7238_v57 }
 0x155   :  { %6231 = vmatprep.mubr.msk.bf16.mxu0 %vm460_vm1, %v7269_v9 }
 0x157   :  { %6400 = vmatmul.mubr.msk.bf16.gmra.mrb[48].mxu1 %vm460_vm1, %v7255_v0 }
 0x158   :  { %6403 = vmatprep.mubr.msk.bf16.mxu1 %vm460_vm1, %v7281_v15 }
 0x15c   :  { %6232 = vmatmul.mubr.msk.bf16.gmra.mrb[48].mxu0 %vm460_vm1, %v7274_v12 }
 0x15d   :  { %6235 = vmatprep.mubr.msk.bf16.mxu0 %vm460_vm1, %v7319_v31 }
 0x15f   :  { %6404 = vmatmul.mubr.msk.bf16.gmra.mrb[52].mxu1 %vm460_vm1, %v8992_v47 }
 0x160   :  { %6407 = vmatprep.mubr.msk.bf16.mxu1 %vm460_vm1, %v8993_v39 }
 0x164   :  { %6236 = vmatmul.mubr.msk.bf16.gmra.mrb[52].mxu0 %vm460_vm1, %v7324_v35 }
 0x165   :  { %6239 = vmatprep.mubr.msk.bf16.mxu0 %vm460_vm1, %v7355_v56 }
 0x167   :  { %6408 = vmatmul.mubr.msk.bf16.gmra.mrb[56].mxu1 %vm460_vm1, %v8994_v36 }
 0x168   :  { %6411 = vmatprep.mubr.msk.bf16.mxu1 %vm460_vm1, %v8995_v25 }
 0x16c   :  { %6240 = vmatmul.mubr.msk.bf16.gmra.mrb[56].mxu0 %vm460_vm1, %v7360_v61 }
 0x16d   :  { %6243 = vmatprep.mubr.msk.bf16.mxu0 %vm460_vm1, %v7391_v26 }
 0x16f   :  { %6412 = vmatmul.mubr.msk.bf16.gmra.mrb[60].mxu1 %vm460_vm1, %v8996_v63 }
 0x170   :  { %6415 = vmatprep.mubr.msk.bf16.mxu1 %vm460_vm1, %v8997_v5 }
 0x174   :  { %6244 = vmatmul.mubr.msk.bf16.gmra.mrb[60].mxu0 %vm460_vm1, %v7396_v32 }
 0x175   :  { %6247 = vmatprep.mubr.msk.bf16.mxu0 %vm460_vm1, %v7427_v4 }
 0x177   :  { %6416 = vmatmul.mubr.msk.bf16.gmra.mrb[64].mxu1 %vm460_vm1, %v8998_v37 }
 0x178   :  { %6419 = vmatprep.mubr.msk.bf16.mxu1 %vm460_vm1, %v8999_v43 }
 0x17c   :  { %6248 = vmatmul.mubr.msk.bf16.gmra.mrb[64].mxu0 %vm460_vm1, %v7432_v14 }
 0x17d   :  { %6251 = vmatprep.mubr.msk.bf16.mxu0 %vm460_vm1, %v7463_v59 }
 0x17f   :  { %6420 = vmatmul.mubr.msk.bf16.gmra.mrb[68].mxu1 %vm460_vm1, %v9000_v40 }
 0x180   :  { %6423 = vmatprep.mubr.msk.bf16.mxu1 %vm460_vm1, %v7482_v28 }
 0x184   :  { %6252 = vmatmul.mubr.msk.bf16.gmra.mrb[68].mxu0 %vm460_vm1, %v7475_v19 }
 0x185   :  { %6255 = vmatprep.mubr.msk.bf16.mxu0 %vm460_vm1, %v7497_v58 }
 0x187   :  { %6424 = vmatmul.mubr.msk.bf16.gmra.mrb[72].mxu1 %vm460_vm1, %v7490_v29 }
 0x188   :  { %6427 = vmatprep.mubr.msk.bf16.mxu1 %vm460_vm1, %v7808_v10 }
 0x18c   :  { %6256 = vmatmul.mubr.msk.bf16.gmra.mrb[72].mxu0 %vm460_vm1, %v7501_v55 }
 0x18d   :  { %6259 = vmatprep.mubr.msk.bf16.mxu0 %vm460_vm1, %v7704_v11 }
 0x18f   :  { %6428 = vmatmul.mubr.msk.bf16.gmra.mrb[76].mxu1 %vm460_vm1, %v2217_v51 }
 0x190   :  { %6433 = vmatprep.mubr.msk.bf16.mxu1 %vm460_vm1, %v7193_v38  ;;  %v2863_v38 = vsel %vm521_vm0, %v5338_v16, 0 }
 0x194   :  { %6260 = vmatmul.mubr.msk.bf16.gmra.mrb[76].mxu0 %vm460_vm1, %v7716_v2 }
 0x195   :  { %6265 = vmatprep.mubr.msk.bf16.mxu0 %vm460_vm1, %v7129_v3  ;;  %v7933_v3 = vld [vmem:[%s8950_s2 + $0x2c] sm:$0xf]  ;;  %s7088_s2 = smov 8  }
 0x197   :  { %6434 = vmatmul.mubr.msk.bf16.vlgmr.msra.gmra.mrb[40].mxu1 %vm460_vm1, %v7202_v41 }
 0x198   :  { %6474 = vmatpush3.bf16.msra.mxu1 %v3754_v18  ;;  %6437 = vmatprep.mubr.msk.bf16.mxu1 %vm460_vm1, %v7233_v54 }
 0x199   :  { %7052 = vmatprep.subr.msk.bf16.mxu1 %vm521_vm0, %v7921_v24 }
 0x19c   :  { %6266 = vmatmul.mubr.msk.bf16.vlgmr.msra.gmra.mrb[40].mxu0 %vm460_vm1, %v7143_v7 }
 0x19d   :  { %6306 = vmatpush3.bf16.msra.mxu0 %v2863_v38  ;;  %6269 = vmatprep.mubr.msk.bf16.mxu0 %vm460_vm1, %v7163_v20 }
 0x19e   :  { %7048 = vmatprep.subr.msk.bf16.mxu0 %vm521_vm0, %v7933_v3 }
 0x19f   :  { %6438 = vmatmul.mubr.msk.bf16.gmra.mrb[44].mxu1 %vm460_vm1, %v7238_v57 }
 0x1a0   :  { %6441 = vmatprep.mubr.msk.bf16.mxu1 %vm460_vm1, %v7269_v9 }
 0x1a4   :  { %6270 = vmatmul.mubr.msk.bf16.gmra.mrb[44].mxu0 %vm460_vm1, %v7176_v27 }
 0x1a5   :  { %6273 = vmatprep.mubr.msk.bf16.mxu0 %vm460_vm1, %v7183_v30 }
 0x1a7   :  { %6442 = vmatmul.mubr.msk.bf16.gmra.mrb[48].mxu1 %vm460_vm1, %v7274_v12 }
 0x1a8   :  { %6445 = vmatprep.mubr.msk.bf16.mxu1 %vm460_vm1, %v7319_v31 }
 0x1ac   :  { %6274 = vmatmul.mubr.msk.bf16.gmra.mrb[48].mxu0 %vm460_vm1, %v7212_v44 }
 0x1ad   :  { %6277 = vmatprep.mubr.msk.bf16.mxu0 %vm460_vm1, %v7224_v49 }
 0x1af   :  { %6446 = vmatmul.mubr.msk.bf16.gmra.mrb[52].mxu1 %vm460_vm1, %v7324_v35 }
 0x1b0   :  { %6449 = vmatprep.mubr.msk.bf16.mxu1 %vm460_vm1, %v7355_v56 }
 0x1b4   :  { %6278 = vmatmul.mubr.msk.bf16.gmra.mrb[52].mxu0 %vm460_vm1, %v7250_v62 }
 0x1b5   :  { %6281 = vmatprep.mubr.msk.bf16.mxu0 %vm460_vm1, %v7260_v1 }
 0x1b7   :  { %6450 = vmatmul.mubr.msk.bf16.gmra.mrb[56].mxu1 %vm460_vm1, %v7360_v61 }
 0x1b8   :  { %6453 = vmatprep.mubr.msk.bf16.mxu1 %vm460_vm1, %v7391_v26 }
 0x1bc   :  { %6282 = vmatmul.mubr.msk.bf16.gmra.mrb[56].mxu0 %vm460_vm1, %v7286_v17 }
 0x1bd   :  { %6285 = vmatprep.mubr.msk.bf16.mxu0 %vm460_vm1, %v7301_v23 }
 0x1bf   :  { %6454 = vmatmul.mubr.msk.bf16.gmra.mrb[60].mxu1 %vm460_vm1, %v7396_v32 }
 0x1c0   :  { %6457 = vmatprep.mubr.msk.bf16.mxu1 %vm460_vm1, %v7427_v4 }
 0x1c4   :  { %6286 = vmatmul.mubr.msk.bf16.gmra.mrb[60].mxu0 %vm460_vm1, %v7336_v45 }
 0x1c5   :  { %6289 = vmatprep.mubr.msk.bf16.mxu0 %vm460_vm1, %v7346_v50 }
 0x1c7   :  { %6458 = vmatmul.mubr.msk.bf16.gmra.mrb[64].mxu1 %vm460_vm1, %v7432_v14 }
 0x1c8   :  { %6461 = vmatprep.mubr.msk.bf16.mxu1 %vm460_vm1, %v7463_v59 }
 0x1ca   :  { %v6183_v7 = vpop.f32.mrb[0].mxu1 }
 0x1cb   :  { %4283 = vrot.lane.b32.xlu1 %v6183_v7, %s7088_s2  ;;  %v2261_v20 = vpop.f32.mrb[1].mxu1 }
 0x1cc   :  { %6290 = vmatmul.mubr.msk.bf16.gmra.mrb[64].mxu0 %vm460_vm1, %v7372_v8  ;;  %4279 = vrot.lane.b32.xlu0 %v2261_v20, %s7088_s2  ;;  %v6184_v27 = vpop.f32.mrb[2].mxu1 }
 0x1cd   :  { %v2264_v30 = vpop.f32.mrb[3].mxu1  ;;  %6293 = vmatprep.mubr.msk.bf16.mxu0 %vm460_vm1, %v7382_v13 }
 0x1cf   :  { %v7991_v44 = vpop.f32.mrb[0].mxu0  ;;  %6462 = vmatmul.mubr.msk.bf16.gmra.mrb[68].mxu1 %vm460_vm1, %v7475_v19  ;;  %4285 = vrot.lane.b32.xlu1 %v6184_v27, %s7088_s2 }
 0x1d0   :  { %9001 = vst [vmem:[#allocation2_spill] sm:$0xff] %v7991_v44  ;;  %v7996_v49 = vpop.f32.mrb[1].mxu0  ;;  %4281 = vrot.lane.b32.xlu0 %v2264_v30, %s7088_s2  ;;  %6465 = vmatprep.mubr.msk.bf16.mxu1 %vm460_vm1, %v7497_v58 }
 0x1d1   :  { %9002 = vst [vmem:[#allocation3_spill] sm:$0xff] %v7996_v49  ;;  %v8001_v1 = vpop.f32.mrb[2].mxu0 }
 0x1d2   :  { %9003 = vst [vmem:[#allocation4_spill] sm:$0xff] %v8001_v1  ;;  %v8003_v51 = vpop.f32.mrb[3].mxu0  ;;  %v6187_v52 = vpop.f32.mrb[4].mxu1 }
 0x1d3   :  { %9004 = vst [vmem:[#allocation5_spill] sm:$0xff] %v8003_v51  ;;  %v2277_v6 = vpop.f32.mrb[5].mxu1 }
 0x1d4   :  { %6294 = vmatmul.mubr.msk.bf16.gmra.mrb[68].mxu0 %vm460_vm1, %v7408_v46  ;;  %4291 = vrot.lane.b32.xlu0 %v6187_v52, %s7088_s2  ;;  %v6188_v22 = vpop.f32.mrb[6].mxu1 }
 0x1d5   :  { %4293 = vrot.lane.b32.xlu1 %v6188_v22, %s7088_s2  ;;  %v2280_v16 = vpop.f32.mrb[7].mxu1  ;;  %6297 = vmatprep.mubr.msk.bf16.mxu0 %vm460_vm1, %v7418_v53  ;;  %v9009_v22 = vld [vmem:[#allocation11_spill] sm:$0xff] }
 0x1d7   :  { %v8011_v18 = vpop.f32.mrb[4].mxu0  ;;  %6466 = vmatmul.mubr.msk.bf16.gmra.mrb[72].mxu1 %vm460_vm1, %v7501_v55 }
 0x1d8   :  { %9005 = vst [vmem:[#allocation6_spill] sm:$0xff] %v8011_v18  ;;  %v8015_v38 = vpop.f32.mrb[5].mxu0  ;;  %4287 = vrot.lane.b32.xlu0 %v2277_v6, %s7088_s2  ;;  %6469 = vmatprep.mubr.msk.bf16.mxu1 %vm460_vm1, %v7704_v11  ;;  %v9014_v18 = vld [vmem:[#allocation12_spill] sm:$0xff] }
 0x1d9   :  { %9006 = vst [vmem:[#allocation7_spill] sm:$0xff] %v8015_v38  ;;  %v8020_v7 = vpop.f32.mrb[6].mxu0  ;;  %4289 = vrot.lane.b32.xlu1 %v2280_v16, %s7088_s2 }
 0x1da   :  { %9007 = vst [vmem:[#allocation8_spill] sm:$0xff] %v8020_v7  ;;  %v8023_v20 = vpop.f32.mrb[7].mxu0  ;;  %v6191_v27 = vpop.f32.mrb[8].mxu1 }
 0x1db   :  { %9008 = vst [vmem:[#allocation9_spill] sm:$0xff] %v8023_v20  ;;  %v2293_v30 = vpop.f32.mrb[9].mxu1 }
 0x1dc   :  { %6298 = vmatmul.mubr.msk.bf16.gmra.mrb[72].mxu0 %vm460_vm1, %v7444_v33  ;;  %4299 = vrot.lane.b32.xlu0 %v6191_v27, %s7088_s2  ;;  %v6192_v52 = vpop.f32.mrb[10].mxu1 }
 0x1dd   :  { %4301 = vrot.lane.b32.xlu1 %v6192_v52, %s7088_s2  ;;  %v2296_v6 = vpop.f32.mrb[11].mxu1  ;;  %6301 = vmatprep.mubr.msk.bf16.mxu0 %vm460_vm1, %v9009_v22 }
 0x1df   :  { %v8031_v38 = vpop.f32.mrb[8].mxu0  ;;  %6470 = vmatmul.mubr.msk.bf16.gmra.mrb[76].mxu1 %vm460_vm1, %v7716_v2 }
 0x1e0   :  { %9010 = vst [vmem:[#allocation10_spill] sm:$0xff] %v8031_v38  ;;  %v8035_v16 = vpop.f32.mrb[9].mxu0  ;;  %4295 = vrot.lane.b32.xlu0 %v2293_v30, %s7088_s2  ;;  %6475 = vmatprep.mubr.msk.bf16.mxu1 %vm460_vm1, %v7202_v41 }
 0x1e1   :  { %9011 = vst [vmem:[#allocation11_spill] sm:$0xff] %v8035_v16  ;;  %v8040_v27 = vpop.f32.mrb[10].mxu0  ;;  %4297 = vrot.lane.b32.xlu1 %v2296_v6, %s7088_s2  ;;  %v4004_v16 = vsel %vm521_vm0, %v7921_v24, 0  ;;  %v7081_v6 = vld [vmem:[%s8951_s0 + $0x10] sm:$0xff]  }
 0x1e2   :  { %9012 = vst [vmem:[#allocation15_spill] sm:$0xff] %v8040_v27  ;;  %v8043_v52 = vpop.f32.mrb[11].mxu0  ;;  %v6195_v20 = vpop.f32.mrb[12].mxu1 }
 0x1e3   :  { %9013 = vst [vmem:[#allocation16_spill] sm:$0xff] %v8043_v52  ;;  %v2309_v7 = vpop.f32.mrb[13].mxu1 }
 0x1e4   :  { %6302 = vmatmul.mubr.msk.bf16.gmra.mrb[76].mxu0 %vm460_vm1, %v9014_v18  ;;  %4307 = vrot.lane.b32.xlu0 %v6195_v20, %s7088_s2  ;;  %v6196_v2 = vpop.f32.mrb[14].mxu1 }
 0x1e5   :  { %4309 = vrot.lane.b32.xlu1 %v6196_v2, %s7088_s2  ;;  %v2312_v30 = vpop.f32.mrb[15].mxu1  ;;  %6307 = vmatprep.mubr.msk.bf16.mxu0 %vm460_vm1, %v7081_v6  ;;  %v3120_v6 = vsel %vm521_vm0, %v7933_v3, 0 }
 0x1e7   :  { %v8055_v52 = vpop.f32.mrb[12].mxu0  ;;  %6476 = vmatmul.mubr.msk.bf16.vlgmr.msra.gmra.mrb[40].mxu1 %vm460_vm1, %v7233_v54 }
 0x1e8   :  { %9015 = vst [vmem:[#allocation12_spill] sm:$0xff] %v8055_v52  ;;  %v8059_v27 = vpop.f32.mrb[13].mxu0  ;;  %6516 = vmatpush3.bf16.msra.mxu1 %v4004_v16  ;;  %4303 = vrot.lane.b32.xlu0 %v2309_v7, %s7088_s2  ;;  %v7082_v16 = vld [vmem:[%s8951_s0 + $0x18] sm:$0xff]  }
 0x1e9   :  { %9016 = vst [vmem:[#allocation17_spill] sm:$0xff] %v8059_v27  ;;  %v8062_v20 = vpop.f32.mrb[14].mxu0  ;;  %4305 = vrot.lane.b32.xlu1 %v2312_v30, %s7088_s2  ;;  %6479 = vmatprep.mubr.msk.bf16.mxu1 %vm460_vm1, %v7238_v57 }
 0x1ea   :  { %9017 = vst [vmem:[#allocation18_spill] sm:$0xff] %v8062_v20  ;;  %v8067_v24 = vpop.f32.mrb[15].mxu0  ;;  %v6199_v2 = vpop.f32.mrb[16].mxu1  ;;  %v7087_v20 = vld [vmem:[%s8951_s0 + $0x48] sm:$0xff]  }
 0x1eb   :  { %9018 = vst [vmem:[#allocation19_spill] sm:$0xff] %v8067_v24  ;;  %v2325_v52 = vpop.f32.mrb[17].mxu1  ;;  %v7083_v24 = vld [vmem:[%s8951_s0 + $0x20] sm:$0xff]  }
 0x1ec   :  { %6308 = vmatmul.mubr.msk.bf16.vlgmr.msra.gmra.mrb[40].mxu0 %vm460_vm1, %v7082_v16  ;;  %4315 = vrot.lane.b32.xlu0 %v6199_v2, %s7088_s2  ;;  %v6200_v7 = vpop.f32.mrb[18].mxu1 }
 0x1ed   :  { %4317 = vrot.lane.b32.xlu1 %v6200_v7, %s7088_s2  ;;  %v2328_v30 = vpop.f32.mrb[19].mxu1  ;;  %6348 = vmatpush3.bf16.msra.mxu0 %v3120_v6  ;;  %v7084_v7 = vld [vmem:[%s8951_s0 + $0x28] sm:$0xff]  }
 0x1ee   :  { %6311 = vmatprep.mubr.msk.bf16.mxu0 %vm460_vm1, %v7083_v24 }
 0x1ef   :  { %v8081_v3 = vpop.f32.mrb[16].mxu0  ;;  %6480 = vmatmul.mubr.msk.bf16.gmra.mrb[44].mxu1 %vm460_vm1, %v7269_v9 }
 0x1f0   :  { %9019 = vst [vmem:[#allocation20_spill] sm:$0xff] %v8081_v3  ;;  %v8085_v27 = vpop.f32.mrb[17].mxu0  ;;  %4311 = vrot.lane.b32.xlu0 %v2325_v52, %s7088_s2  ;;  %6483 = vmatprep.mubr.msk.bf16.mxu1 %vm460_vm1, %v7274_v12 }
 0x1f1   :  { %9020 = vst [vmem:[#allocation21_spill] sm:$0xff] %v8085_v27  ;;  %v8090_v2 = vpop.f32.mrb[18].mxu0  ;;  %4313 = vrot.lane.b32.xlu1 %v2328_v30, %s7088_s2  ;;  %v7085_v30 = vld [vmem:[%s8951_s0 + $0x30] sm:$0xff]  }
 0x1f2   :  { %9021 = vst [vmem:[#allocation22_spill] sm:$0xff] %v8090_v2  ;;  %v8093_v6 = vpop.f32.mrb[19].mxu0  ;;  %v6203_v16 = vpop.f32.mrb[20].mxu1 }
 0x1f3   :  { %9022 = vst [vmem:[#allocation23_spill] sm:$0xff] %v8093_v6  ;;  %v2341_v24 = vpop.f32.mrb[21].mxu1 }
 0x1f4   :  { %6312 = vmatmul.mubr.msk.bf16.gmra.mrb[44].mxu0 %vm460_vm1, %v7084_v7  ;;  %4323 = vrot.lane.b32.xlu0 %v6203_v16, %s7088_s2  ;;  %v6204_v52 = vpop.f32.mrb[22].mxu1 }
 0x1f5   :  { %4325 = vrot.lane.b32.xlu1 %v6204_v52, %s7088_s2  ;;  %v2344_v27 = vpop.f32.mrb[23].mxu1  ;;  %6315 = vmatprep.mubr.msk.bf16.mxu0 %vm460_vm1, %v7085_v30 }
 0x1f7   :  { %v8105_v6 = vpop.f32.mrb[20].mxu0  ;;  %6484 = vmatmul.mubr.msk.bf16.gmra.mrb[48].mxu1 %vm460_vm1, %v7319_v31 }
 0x1f8   :  { %9023 = vst [vmem:[#allocation24_spill] sm:$0xff] %v8105_v6  ;;  %v8109_v2 = vpop.f32.mrb[21].mxu0  ;;  %4319 = vrot.lane.b32.xlu0 %v2341_v24, %s7088_s2  ;;  %6487 = vmatprep.mubr.msk.bf16.mxu1 %vm460_vm1, %v7324_v35  ;;  %v7086_v6 = vld [vmem:[%s8951_s0 + $0x38] sm:$0xff]  }
 0x1f9   :  { %v8114_v16 = vpop.f32.mrb[22].mxu0  ;;  %4321 = vrot.lane.b32.xlu1 %v2344_v27, %s7088_s2 }
 0x1fa   :  { %9024 = vst [vmem:[#allocation25_spill] sm:$0xff] %v8114_v16  ;;  %v8117_v7 = vpop.f32.mrb[23].mxu0  ;;  %v6207_v52 = vpop.f32.mrb[24].mxu1 }
 0x1fb   :  { %v2357_v30 = vpop.f32.mrb[25].mxu1 }
 0x1fc   :  { %6316 = vmatmul.mubr.msk.bf16.gmra.mrb[48].mxu0 %vm460_vm1, %v7086_v6  ;;  %4331 = vrot.lane.b32.xlu0 %v6207_v52, %s7088_s2  ;;  %v6208_v24 = vpop.f32.mrb[26].mxu1 }
 0x1fd   :  { %4333 = vrot.lane.b32.xlu1 %v6208_v24, %s7088_s2  ;;  %v2360_v3 = vpop.f32.mrb[27].mxu1  ;;  %6319 = vmatprep.mubr.msk.bf16.mxu0 %vm460_vm1, %v7250_v62 }
 0x1ff   :  { %v8127_v27 = vpop.f32.mrb[24].mxu0  ;;  %6488 = vmatmul.mubr.msk.bf16.gmra.mrb[52].mxu1 %vm460_vm1, %v7355_v56 }
 0x200   :  { %v8131_v16 = vpop.f32.mrb[25].mxu0  ;;  %4327 = vrot.lane.b32.xlu0 %v2357_v30, %s7088_s2  ;;  %6491 = vmatprep.mubr.msk.bf16.mxu1 %vm460_vm1, %v7360_v61 }
 0x201   :  { %v8136_v6 = vpop.f32.mrb[26].mxu0  ;;  %4329 = vrot.lane.b32.xlu1 %v2360_v3, %s7088_s2 }
 0x202   :  { %v8139_v52 = vpop.f32.mrb[27].mxu0  ;;  %v6211_v24 = vpop.f32.mrb[28].mxu1 }
 0x203   :  { %v2373_v62 = vpop.f32.mrb[29].mxu1 }
 0x204   :  { %6320 = vmatmul.mubr.msk.bf16.gmra.mrb[52].mxu0 %vm460_vm1, %v7087_v20  ;;  %4339 = vrot.lane.b32.xlu0 %v6211_v24, %s7088_s2  ;;  %v6212_v30 = vpop.f32.mrb[30].mxu1 }
 0x205   :  { %4341 = vrot.lane.b32.xlu1 %v6212_v30, %s7088_s2  ;;  %v2376_v38 = vpop.f32.mrb[31].mxu1  ;;  %6323 = vmatprep.mubr.msk.bf16.mxu0 %vm460_vm1, %v7286_v17 }
 0x207   :  { %v8149_v3 = vpop.f32.mrb[28].mxu0  ;;  %6492 = vmatmul.mubr.msk.bf16.gmra.mrb[56].mxu1 %vm460_vm1, %v7391_v26 }
 0x208   :  { %v8153_v51 = vpop.f32.mrb[29].mxu0  ;;  %4335 = vrot.lane.b32.xlu0 %v2373_v62, %s7088_s2  ;;  %6495 = vmatprep.mubr.msk.bf16.mxu1 %vm460_vm1, %v7396_v32 }
 0x209   :  { %v8158_v20 = vpop.f32.mrb[30].mxu0  ;;  %4337 = vrot.lane.b32.xlu1 %v2376_v38, %s7088_s2 }
 0x20a   :  { %v8161_v24 = vpop.f32.mrb[31].mxu0  ;;  %v6215_v30 = vpop.f32.mrb[32].mxu1 }
 0x20b   :  { %v2389_v17 = vpop.f32.mrb[33].mxu1 }
 0x20c   :  { %6324 = vmatmul.mubr.msk.bf16.gmra.mrb[56].mxu0 %vm460_vm1, %v7301_v23  ;;  %4347 = vrot.lane.b32.xlu0 %v6215_v30, %s7088_s2  ;;  %v6216_v49 = vpop.f32.mrb[34].mxu1 }
 0x20d   :  { %4349 = vrot.lane.b32.xlu1 %v6216_v49, %s7088_s2  ;;  %v2392_v62 = vpop.f32.mrb[35].mxu1  ;;  %6327 = vmatprep.mubr.msk.bf16.mxu0 %vm460_vm1, %v7336_v45 }
 0x20f   :  { %v8169_v1 = vpop.f32.mrb[32].mxu0  ;;  %6496 = vmatmul.mubr.msk.bf16.gmra.mrb[60].mxu1 %vm460_vm1, %v7427_v4 }
 0x210   :  { %v8173_v38 = vpop.f32.mrb[33].mxu0  ;;  %4343 = vrot.lane.b32.xlu0 %v2389_v17, %s7088_s2  ;;  %6499 = vmatprep.mubr.msk.bf16.mxu1 %vm460_vm1, %v7432_v14 }
 0x211   :  { %9025 = vst [vmem:[#allocation26_spill] sm:$0xff] %v8173_v38  ;;  %v8178_v23 = vpop.f32.mrb[34].mxu0  ;;  %4345 = vrot.lane.b32.xlu1 %v2392_v62, %s7088_s2  ;;  %v5102_v62 = vld [vmem:[%s8952_s1 + $0xac] sm:$0xf] }
 0x212   :  { %v8181_v49 = vpop.f32.mrb[35].mxu0  ;;  %v6219_v30 = vpop.f32.mrb[36].mxu1 }
 0x213   :  { %9026 = vst [vmem:[#allocation27_spill] sm:$0xff] %v8181_v49  ;;  %v2405_v45 = vpop.f32.mrb[37].mxu1 }
 0x214   :  { %6328 = vmatmul.mubr.msk.bf16.gmra.mrb[60].mxu0 %vm460_vm1, %v7346_v50  ;;  %4355 = vrot.lane.b32.xlu0 %v6219_v30, %s7088_s2  ;;  %v6220_v44 = vpop.f32.mrb[38].mxu1  ;;  %v9028_v50 = vld [vmem:[#allocation13_spill] sm:$0xff] }
 0x215   :  { %4357 = vrot.lane.b32.xlu1 %v6220_v44, %s7088_s2  ;;  %v2408_v17 = vpop.f32.mrb[39].mxu1  ;;  %6331 = vmatprep.mubr.msk.bf16.mxu0 %vm460_vm1, %v7372_v8  ;;  %v8202_v44 = vcombine.low %v9028_v50, %v5102_v62  ;;  %v9030_v50 = vld [vmem:[#allocation14_spill] sm:$0xff] }
 0x217   :  { %v8192_v38 = vpop.f32.mrb[36].mxu0  ;;  %6500 = vmatmul.mubr.msk.bf16.gmra.mrb[64].mxu1 %vm460_vm1, %v7463_v59 }
 0x218   :  { %v8196_v49 = vpop.f32.mrb[37].mxu0  ;;  %4351 = vrot.lane.b32.xlu0 %v2405_v45, %s7088_s2  ;;  %6503 = vmatprep.mubr.msk.bf16.mxu1 %vm460_vm1, %v7475_v19  ;;  %v3101_v45 = vshll.u32 %v8202_v44, 16 }
 0x219   :  { %9027 = vst [vmem:[#allocation28_spill] sm:$0xff] %v8196_v49  ;;  %v8204_v8 = vpop.f32.mrb[38].mxu0  ;;  %4353 = vrot.lane.b32.xlu1 %v2408_v17, %s7088_s2  ;;  %v8221_v17 = vld [vmem:[%s8952_s1 + $0xb0] ss:$0 sps:$4 sm:$0xff]   ;;  %s7089_s1 = smov 24  }
 0x21a   :  { %v8207_v30 = vpop.f32.mrb[39].mxu0  ;;  %v3103_v62 = vrot.slane %v3101_v45, 1 }
 0x21b   :  { %9029 = vst [vmem:[#allocation13_spill] sm:$0xff] %v8207_v30 }
 0x21c   :  { %6332 = vmatmul.mubr.msk.bf16.gmra.mrb[64].mxu0 %vm460_vm1, %v7382_v13  ;;  %v3105_v13 = vshrl.u32 %v8202_v44, 16  ;;  %v8231_v30 = vsel %vm295_vm2, %v9030_v50, %v3103_v62 }
 0x21d   :  { %6335 = vmatprep.mubr.msk.bf16.mxu0 %vm460_vm1, %v7408_v46  ;;  %v3109_v46 = vshll.u32 %v8221_v17, 16 }
 0x21e   :  { %v3107_v45 = vor.u32 %v3105_v13, %v3103_v62  ;;  %v9047_v13 = vld [vmem:[#allocation27_spill] sm:$0xff] }
 0x21f   :  { %6504 = vmatmul.mubr.msk.bf16.gmra.mrb[68].mxu1 %vm460_vm1, %v7497_v58  ;;  %v3111_v49 = vrot.slane %v3109_v46, 1 }
 0x220   :  { %6507 = vmatprep.mubr.msk.bf16.mxu1 %vm460_vm1, %v7501_v55 }
 0x224   :  { %6336 = vmatmul.mubr.msk.bf16.gmra.mrb[68].mxu0 %vm460_vm1, %v7418_v53  ;;  %v8240_v53 = vsel %vm295_vm2, %v3107_v45, %v3111_v49 }
 0x225   :  { %6339 = vmatprep.mubr.msk.bf16.mxu0 %vm460_vm1, %v7444_v33 }
 0x227   :  { %6508 = vmatmul.mubr.msk.bf16.gmra.mrb[72].mxu1 %vm460_vm1, %v7704_v11 }
 0x228   :  { %6511 = vmatprep.mubr.msk.bf16.mxu1 %vm460_vm1, %v8231_v30 }
 0x22c   :  { %6340 = vmatmul.mubr.msk.bf16.gmra.mrb[72].mxu0 %vm460_vm1, %v9009_v22 }
 0x22d   :  { %6343 = vmatprep.mubr.msk.bf16.mxu0 %vm460_vm1, %v9014_v18 }
 0x22f   :  { %6512 = vmatmul.mubr.msk.bf16.gmra.mrb[76].mxu1 %vm460_vm1, %v8240_v53 }
 0x230   :  { %6517 = vmatprep.mubr.msk.bf16.mxu1 %vm460_vm1, %v7186_v34 }
 0x234   :  { %6344 = vmatmul.mubr.msk.bf16.gmra.mrb[76].mxu0 %vm460_vm1, %v8202_v44 }
 0x235   :  { %6349 = vmatprep.mubr.msk.bf16.mxu0 %vm460_vm1, %v7202_v41 }
 0x237   :  { %6518 = vmatmul.mubr.msk.bf16.vlgmr.msra.gmra.mrb[40].mxu1 %vm460_vm1, %v7207_v42 }
 0x238   :  { %6521 = vmatprep.mubr.msk.bf16.mxu1 %vm460_vm1, %v7219_v48 }
 0x23c   :  { %6350 = vmatmul.mubr.msk.bf16.vlgmr.msra.gmra.mrb[40].mxu0 %vm460_vm1, %v7233_v54 }
 0x23d   :  { %v8258_v33 = vpop.permute.xlu1 %4283  ;;  %6353 = vmatprep.mubr.msk.bf16.mxu0 %vm460_vm1, %v7238_v57 }
 0x23e   :  { %v8262_v34 = vpop.permute.xlu0 %4279 }
 0x23f   :  { %6522 = vmatmul.mubr.msk.bf16.gmra.mrb[44].mxu1 %vm460_vm1, %v7245_v60 }
 0x240   :  { %6525 = vmatprep.mubr.msk.bf16.mxu1 %vm460_vm1, %v7255_v0 }
 0x241   :  { %v8270_v42 = vpop.permute.xlu1 %4285 }
 0x242   :  { %v8268_v41 = vpop.permute.xlu0 %4281 }
 0x244   :  { %6354 = vmatmul.mubr.msk.bf16.gmra.mrb[44].mxu0 %vm460_vm1, %v7269_v9 }
 0x245   :  { %6357 = vmatprep.mubr.msk.bf16.mxu0 %vm460_vm1, %v7274_v12 }
 0x246   :  { %v8276_v48 = vpop.permute.xlu0 %4291 }
 0x247   :  { %6526 = vmatmul.mubr.msk.bf16.gmra.mrb[48].mxu1 %vm460_vm1, %v7281_v15  ;;  %v8280_v54 = vpop.permute.xlu1 %4293 }
 0x248   :  { %6529 = vmatprep.mubr.msk.bf16.mxu1 %vm460_vm1, %v8992_v47 }
 0x24a   :  { %v8284_v57 = vpop.permute.xlu0 %4287 }
 0x24b   :  { %v8286_v60 = vpop.permute.xlu1 %4289 }
 0x24c   :  { %6358 = vmatmul.mubr.msk.bf16.gmra.mrb[48].mxu0 %vm460_vm1, %v7319_v31 }
 0x24d   :  { %6361 = vmatprep.mubr.msk.bf16.mxu0 %vm460_vm1, %v7324_v35 }
 0x24e   :  { %v8292_v0 = vpop.permute.xlu0 %4299 }
 0x24f   :  { %6530 = vmatmul.mubr.msk.bf16.gmra.mrb[52].mxu1 %vm460_vm1, %v8993_v39  ;;  %v8296_v9 = vpop.permute.xlu1 %4301 }
 0x250   :  { %6533 = vmatprep.mubr.msk.bf16.mxu1 %vm460_vm1, %v8994_v36 }
 0x252   :  { %v8300_v12 = vpop.permute.xlu0 %4295 }
 0x253   :  { %v8302_v15 = vpop.permute.xlu1 %4297 }
 0x254   :  { %6362 = vmatmul.mubr.msk.bf16.gmra.mrb[52].mxu0 %vm460_vm1, %v7355_v56 }
 0x255   :  { %6365 = vmatprep.mubr.msk.bf16.mxu0 %vm460_vm1, %v7360_v61 }
 0x256   :  { %v8308_v31 = vpop.permute.xlu0 %4307 }
 0x257   :  { %6534 = vmatmul.mubr.msk.bf16.gmra.mrb[56].mxu1 %vm460_vm1, %v8995_v25  ;;  %v8312_v35 = vpop.permute.xlu1 %4309 }
 0x258   :  { %6537 = vmatprep.mubr.msk.bf16.mxu1 %vm460_vm1, %v8996_v63 }
 0x25a   :  { %v8316_v47 = vpop.permute.xlu0 %4303 }
 0x25b   :  { %v8318_v39 = vpop.permute.xlu1 %4305 }
 0x25c   :  { %6366 = vmatmul.mubr.msk.bf16.gmra.mrb[56].mxu0 %vm460_vm1, %v7391_v26 }
 0x25d   :  { %6369 = vmatprep.mubr.msk.bf16.mxu0 %vm460_vm1, %v7396_v32 }
 0x25e   :  { %v8324_v56 = vpop.permute.xlu0 %4315 }
 0x25f   :  { %6538 = vmatmul.mubr.msk.bf16.gmra.mrb[60].mxu1 %vm460_vm1, %v8997_v5  ;;  %v8328_v61 = vpop.permute.xlu1 %4317 }
 0x260   :  { %6541 = vmatprep.mubr.msk.bf16.mxu1 %vm460_vm1, %v8998_v37 }
 0x262   :  { %v8332_v36 = vpop.permute.xlu0 %4311 }
 0x263   :  { %v8334_v25 = vpop.permute.xlu1 %4313 }
 0x264   :  { %6370 = vmatmul.mubr.msk.bf16.gmra.mrb[60].mxu0 %vm460_vm1, %v7427_v4 }
 0x265   :  { %6373 = vmatprep.mubr.msk.bf16.mxu0 %vm460_vm1, %v7432_v14 }
 0x266   :  { %v8340_v26 = vpop.permute.xlu0 %4323 }
 0x267   :  { %9031 = vst [vmem:[#allocation14_spill] sm:$0xff] %v8340_v26  ;;  %6542 = vmatmul.mubr.msk.bf16.gmra.mrb[64].mxu1 %vm460_vm1, %v8999_v43  ;;  %v8344_v32 = vpop.permute.xlu1 %4325 }
 0x268   :  { %9032 = vst [vmem:[#allocation29_spill] sm:$0xff] %v8344_v32  ;;  %6545 = vmatprep.mubr.msk.bf16.mxu1 %vm460_vm1, %v9000_v40 }
 0x26a   :  { %v4320_v63 = vpop.permute.xlu0 %4319 }
 0x26b   :  { %v8350_v5 = vsel %vm460_vm1, %v8109_v2, %v4320_v63  ;;  %v4322_v37 = vpop.permute.xlu1 %4321 }
 0x26c   :  { %9033 = vst [vmem:[#allocation30_spill] sm:$0xff] %v8350_v5  ;;  %v8354_v4 = vsel %vm460_vm1, %v8117_v7, %v4322_v37  ;;  %6374 = vmatmul.mubr.msk.bf16.gmra.mrb[64].mxu0 %vm460_vm1, %v7463_v59  ;;  %v3993_v59 = vrot.slane %v8202_v44, 1 }
 0x26d   :  { %9034 = vst [vmem:[#allocation31_spill] sm:$0xff] %v8354_v4  ;;  %6377 = vmatprep.mubr.msk.bf16.mxu0 %vm460_vm1, %v7475_v19 }
 0x26e   :  { %v4332_v14 = vpop.permute.xlu0 %4331 }
 0x26f   :  { %v8362_v43 = vsel %vm460_vm1, %v8127_v27, %v4332_v14  ;;  %6546 = vmatmul.mubr.msk.bf16.gmra.mrb[68].mxu1 %vm460_vm1, %v7482_v28  ;;  %v4334_v40 = vpop.permute.xlu1 %4333  ;;  %v3994_v28 = vsel %vm1478_vm3, %v7799_v21, %v3993_v59 }
 0x270   :  { %9035 = vst [vmem:[#allocation32_spill] sm:$0xff] %v8362_v43  ;;  %v8368_v18 = vsel %vm460_vm1, %v8136_v6, %v4334_v40  ;;  %6549 = vmatprep.mubr.msk.bf16.mxu1 %vm460_vm1, %v7490_v29 }
 0x271   :  { %9036 = vst [vmem:[#allocation33_spill] sm:$0xff] %v8368_v18 }
 0x272   :  { %v4328_v22 = vpop.permute.xlu0 %4327 }
 0x273   :  { %v8375_v19 = vsel %vm460_vm1, %v8131_v16, %v4328_v22  ;;  %v4330_v2 = vpop.permute.xlu1 %4329 }
 0x274   :  { %9037 = vst [vmem:[#allocation34_spill] sm:$0xff] %v8375_v19  ;;  %v8379_v7 = vsel %vm460_vm1, %v8139_v52, %v4330_v2  ;;  %6378 = vmatmul.mubr.msk.bf16.gmra.mrb[68].mxu0 %vm460_vm1, %v7497_v58  ;;  %v3995_v58 = vrot.slane %v8221_v17, 1  ;;  %v9045_v17 = vld [vmem:[#allocation26_spill] sm:$0xff] }
 0x275   :  { %9038 = vst [vmem:[#allocation35_spill] sm:$0xff] %v8379_v7  ;;  %6381 = vmatprep.mubr.msk.bf16.mxu0 %vm460_vm1, %v7501_v55 }
 0x276   :  { %v4340_v29 = vpop.permute.xlu0 %4339 }
 0x277   :  { %v8389_v27 = vsel %vm460_vm1, %v8149_v3, %v4340_v29  ;;  %6550 = vmatmul.mubr.msk.bf16.gmra.mrb[72].mxu1 %vm460_vm1, %v7808_v10  ;;  %v4342_v16 = vpop.permute.xlu1 %4341  ;;  %v3996_v10 = vsel %vm1478_vm3, %v3993_v59, %v3995_v58 }
 0x278   :  { %9039 = vst [vmem:[#allocation36_spill] sm:$0xff] %v8389_v27  ;;  %v8395_v6 = vsel %vm460_vm1, %v8158_v20, %v4342_v16  ;;  %6553 = vmatprep.mubr.msk.bf16.mxu1 %vm460_vm1, %v3994_v28 }
 0x279   :  { %9040 = vst [vmem:[#allocation37_spill] sm:$0xff] %v8395_v6 }
 0x27a   :  { %v4336_v55 = vpop.permute.xlu0 %4335 }
 0x27b   :  { %v8401_v21 = vsel %vm460_vm1, %v8153_v51, %v4336_v55  ;;  %v4338_v52 = vpop.permute.xlu1 %4337 }
 0x27c   :  { %9041 = vst [vmem:[#allocation38_spill] sm:$0xff] %v8401_v21  ;;  %v8405_v3 = vsel %vm460_vm1, %v8161_v24, %v4338_v52  ;;  %6382 = vmatmul.mubr.msk.bf16.gmra.mrb[72].mxu0 %vm460_vm1, %v7704_v11 }
 0x27d   :  { %9042 = vst [vmem:[#allocation39_spill] sm:$0xff] %v8405_v3  ;;  %6385 = vmatprep.mubr.msk.bf16.mxu0 %vm460_vm1, %v8231_v30 }
 0x27e   :  { %v4348_v20 = vpop.permute.xlu0 %4347 }
 0x27f   :  { %v8414_v49 = vsel %vm460_vm1, %v8169_v1, %v4348_v20  ;;  %6554 = vmatmul.mubr.msk.bf16.gmra.mrb[76].mxu1 %vm460_vm1, %v3996_v10  ;;  %v4350_v51 = vpop.permute.xlu1 %4349 }
 0x280   :  { %9043 = vst [vmem:[#allocation40_spill] sm:$0xff] %v8414_v49  ;;  %v8419_v24 = vsel %vm460_vm1, %v8178_v23, %v4350_v51 }
 0x281   :  { %9044 = vst [vmem:[#allocation41_spill] sm:$0xff] %v8419_v24 }
 0x282   :  { %v4344_v44 = vpop.permute.xlu0 %4343 }
 0x283   :  { %v8423_v11 = vsel %vm460_vm1, %v9045_v17, %v4344_v44  ;;  %v4346_v62 = vpop.permute.xlu1 %4345 }
 0x284   :  { %9046 = vst [vmem:[#allocation26_spill] sm:$0xff] %v8423_v11  ;;  %v8427_v30 = vsel %vm460_vm1, %v9047_v13, %v4346_v62  ;;  %6386 = vmatmul.mubr.msk.bf16.gmra.mrb[76].mxu0 %vm460_vm1, %v8240_v53 }
 0x285   :  { %9048 = vst [vmem:[#allocation27_spill] sm:$0xff] %v8427_v30 }
 0x286   :  { %v4356_v1 = vpop.permute.xlu0 %4355 }
 0x287   :  { %v8433_v46 = vsel %vm460_vm1, %v8192_v38, %v4356_v1  ;;  %v4358_v23 = vpop.permute.xlu1 %4357 }
 0x288   :  { %9049 = vst [vmem:[#allocation42_spill] sm:$0xff] %v8433_v46  ;;  %v8437_v50 = vsel %vm460_vm1, %v8204_v8, %v4358_v23 }
 0x289   :  { %9050 = vst [vmem:[#allocation43_spill] sm:$0xff] %v8437_v50 }
 0x30a   :  { %v6519_v45 = vpop.f32.mrb[40].mxu1 }
 0x30b   :  { %4603 = vrot.lane.b32.xlu0 %v6519_v45, %s7089_s1  ;;  %v4040_v63 = vpop.f32.mrb[41].mxu1 }
 0x30c   :  { %v6520_v37 = vpop.f32.mrb[42].mxu1 }
 0x30d   :  { %4605 = vrot.lane.b32.xlu1 %v6520_v37, %s7089_s1  ;;  %v4043_v14 = vpop.f32.mrb[43].mxu1 }
 0x30f   :  { %v6351_v53 = vpop.f32.mrb[40].mxu0  ;;  %4599 = vrot.lane.b32.xlu0 %v4040_v63, %s7089_s1 }
 0x310   :  { %v3156_v40 = vpop.f32.mrb[41].mxu0 }
 0x311   :  { %v6352_v38 = vpop.f32.mrb[42].mxu0  ;;  %4601 = vrot.lane.b32.xlu1 %v4043_v14, %s7089_s1 }
 0x312   :  { %v3159_v59 = vpop.f32.mrb[43].mxu0  ;;  %v6523_v22 = vpop.f32.mrb[44].mxu1 }
 0x313   :  { %v4056_v8 = vpop.f32.mrb[45].mxu1  ;;  %4443 = vrot.lane.b32.xlu0 %v6351_v53, %s7090_s6 }
 0x314   :  { %v6524_v2 = vpop.f32.mrb[46].mxu1 }
 0x315   :  { %v4059_v28 = vpop.f32.mrb[47].mxu1  ;;  %4445 = vrot.lane.b32.xlu1 %v6352_v38, %s7090_s6 }
 0x317   :  { %v6355_v29 = vpop.f32.mrb[44].mxu0  ;;  %4439 = vrot.lane.b32.xlu0 %v3156_v40, %s7090_s6 }
 0x318   :  { %v3172_v16 = vpop.f32.mrb[45].mxu0 }
 0x319   :  { %v6356_v58 = vpop.f32.mrb[46].mxu0  ;;  %4441 = vrot.lane.b32.xlu1 %v3159_v59, %s7090_s6 }
 0x31a   :  { %v3175_v55 = vpop.f32.mrb[47].mxu0  ;;  %v6527_v52 = vpop.f32.mrb[48].mxu1 }
 0x31b   :  { %v4072_v10 = vpop.f32.mrb[49].mxu1  ;;  %4611 = vrot.lane.b32.xlu0 %v6523_v22, %s7089_s1 }
 0x31c   :  { %v6528_v20 = vpop.f32.mrb[50].mxu1 }
 0x31d   :  { %v4075_v51 = vpop.f32.mrb[51].mxu1  ;;  %4613 = vrot.lane.b32.xlu1 %v6524_v2, %s7089_s1 }
 0x31f   :  { %v6359_v44 = vpop.f32.mrb[48].mxu0  ;;  %4607 = vrot.lane.b32.xlu0 %v4056_v8, %s7089_s1 }
 0x320   :  { %v3188_v17 = vpop.f32.mrb[49].mxu0 }
 0x321   :  { %v6360_v62 = vpop.f32.mrb[50].mxu0  ;;  %4609 = vrot.lane.b32.xlu1 %v4059_v28, %s7089_s1 }
 0x322   :  { %v3191_v13 = vpop.f32.mrb[51].mxu0  ;;  %v6531_v1 = vpop.f32.mrb[52].mxu1 }
 0x323   :  { %v4088_v23 = vpop.f32.mrb[53].mxu1  ;;  %4451 = vrot.lane.b32.xlu0 %v6355_v29, %s7090_s6 }
 0x324   :  { %v6532_v45 = vpop.f32.mrb[54].mxu1 }
 0x325   :  { %v4091_v63 = vpop.f32.mrb[55].mxu1  ;;  %4453 = vrot.lane.b32.xlu1 %v6356_v58, %s7090_s6 }
 0x327   :  { %v6363_v37 = vpop.f32.mrb[52].mxu0  ;;  %4447 = vrot.lane.b32.xlu0 %v3172_v16, %s7090_s6 }
 0x328   :  { %v3204_v14 = vpop.f32.mrb[53].mxu0 }
 0x329   :  { %v6364_v53 = vpop.f32.mrb[54].mxu0  ;;  %4449 = vrot.lane.b32.xlu1 %v3175_v55, %s7090_s6 }
 0x32a   :  { %v3207_v40 = vpop.f32.mrb[55].mxu0  ;;  %v6535_v38 = vpop.f32.mrb[56].mxu1 }
 0x32b   :  { %v4104_v59 = vpop.f32.mrb[57].mxu1  ;;  %4619 = vrot.lane.b32.xlu0 %v6527_v52, %s7089_s1 }
 0x32c   :  { %v6536_v22 = vpop.f32.mrb[58].mxu1 }
 0x32d   :  { %v4107_v8 = vpop.f32.mrb[59].mxu1  ;;  %4621 = vrot.lane.b32.xlu1 %v6528_v20, %s7089_s1 }
 0x32f   :  { %v6367_v2 = vpop.f32.mrb[56].mxu0  ;;  %4615 = vrot.lane.b32.xlu0 %v4072_v10, %s7089_s1 }
 0x330   :  { %v3220_v28 = vpop.f32.mrb[57].mxu0 }
 0x331   :  { %v6368_v29 = vpop.f32.mrb[58].mxu0  ;;  %4617 = vrot.lane.b32.xlu1 %v4075_v51, %s7089_s1 }
 0x332   :  { %v3223_v16 = vpop.f32.mrb[59].mxu0  ;;  %v6539_v58 = vpop.f32.mrb[60].mxu1 }
 0x333   :  { %v4120_v50 = vpop.f32.mrb[61].mxu1  ;;  %4459 = vrot.lane.b32.xlu0 %v6359_v44, %s7090_s6 }
 0x334   :  { %v6540_v55 = vpop.f32.mrb[62].mxu1 }
 0x335   :  { %v4123_v46 = vpop.f32.mrb[63].mxu1  ;;  %4461 = vrot.lane.b32.xlu1 %v6360_v62, %s7090_s6 }
 0x337   :  { %v6371_v52 = vpop.f32.mrb[60].mxu0  ;;  %4455 = vrot.lane.b32.xlu0 %v3188_v17, %s7090_s6 }
 0x338   :  { %v3236_v20 = vpop.f32.mrb[61].mxu0 }
 0x339   :  { %v6372_v30 = vpop.f32.mrb[62].mxu0  ;;  %4457 = vrot.lane.b32.xlu1 %v3191_v13, %s7090_s6 }
 0x33a   :  { %v3239_v10 = vpop.f32.mrb[63].mxu0  ;;  %v6543_v11 = vpop.f32.mrb[64].mxu1 }
 0x33b   :  { %v4136_v24 = vpop.f32.mrb[65].mxu1  ;;  %4627 = vrot.lane.b32.xlu0 %v6531_v1, %s7089_s1 }
 0x33c   :  { %v6544_v51 = vpop.f32.mrb[66].mxu1 }
 0x33d   :  { %v4139_v49 = vpop.f32.mrb[67].mxu1  ;;  %4629 = vrot.lane.b32.xlu1 %v6532_v45, %s7089_s1 }
 0x33f   :  { %v6375_v44 = vpop.f32.mrb[64].mxu0  ;;  %4623 = vrot.lane.b32.xlu0 %v4088_v23, %s7089_s1 }
 0x340   :  { %v3252_v62 = vpop.f32.mrb[65].mxu0 }
 0x341   :  { %v6376_v3 = vpop.f32.mrb[66].mxu0  ;;  %4625 = vrot.lane.b32.xlu1 %v4091_v63, %s7089_s1 }
 0x342   :  { %v3255_v17 = vpop.f32.mrb[67].mxu0  ;;  %v6547_v21 = vpop.f32.mrb[68].mxu1 }
 0x343   :  { %v4152_v6 = vpop.f32.mrb[69].mxu1  ;;  %4467 = vrot.lane.b32.xlu0 %v6363_v37, %s7090_s6 }
 0x344   :  { %v6548_v13 = vpop.f32.mrb[70].mxu1 }
 0x345   :  { %v4155_v27 = vpop.f32.mrb[71].mxu1  ;;  %4469 = vrot.lane.b32.xlu1 %v6364_v53, %s7090_s6 }
 0x347   :  { %v6379_v1 = vpop.f32.mrb[68].mxu0  ;;  %4463 = vrot.lane.b32.xlu0 %v3204_v14, %s7090_s6 }
 0x348   :  { %v8470_v45 = vpop.f32.mrb[69].mxu0 }
 0x349   :  { %v6380_v7 = vpop.f32.mrb[70].mxu0  ;;  %4465 = vrot.lane.b32.xlu1 %v3207_v40, %s7090_s6 }
 0x34a   :  { %v8473_v23 = vpop.f32.mrb[71].mxu0  ;;  %v8475_v63 = vpop.f32.mrb[72].mxu1 }
 0x34b   :  { %v8477_v19 = vpop.f32.mrb[73].mxu1  ;;  %4635 = vrot.lane.b32.xlu0 %v6535_v38, %s7089_s1 }
 0x34c   :  { %v8480_v37 = vpop.f32.mrb[74].mxu1 }
 0x34d   :  { %v8482_v18 = vpop.f32.mrb[75].mxu1  ;;  %4637 = vrot.lane.b32.xlu1 %v6536_v22, %s7089_s1 }
 0x34f   :  { %v8485_v14 = vpop.f32.mrb[72].mxu0  ;;  %4631 = vrot.lane.b32.xlu0 %v4104_v59, %s7089_s1 }
 0x350   :  { %v8488_v53 = vpop.f32.mrb[73].mxu0 }
 0x351   :  { %v8490_v40 = vpop.f32.mrb[74].mxu0  ;;  %4633 = vrot.lane.b32.xlu1 %v4107_v8, %s7089_s1 }
 0x352   :  { %v8493_v43 = vpop.f32.mrb[75].mxu0  ;;  %v8495_v4 = vpop.f32.mrb[76].mxu1 }
 0x353   :  { %v8497_v38 = vpop.f32.mrb[77].mxu1  ;;  %4475 = vrot.lane.b32.xlu0 %v6367_v2, %s7090_s6 }
 0x354   :  { %v8500_v5 = vpop.f32.mrb[78].mxu1 }
 0x355   :  { %v8502_v22 = vpop.f32.mrb[79].mxu1  ;;  %4477 = vrot.lane.b32.xlu1 %v6368_v29, %s7090_s6 }
 0x357   :  { %v8505_v59 = vpop.f32.mrb[76].mxu0  ;;  %4471 = vrot.lane.b32.xlu0 %v3220_v28, %s7090_s6 }
 0x358   :  { %v8508_v32 = vpop.f32.mrb[77].mxu0 }
 0x359   :  { %v8510_v8 = vpop.f32.mrb[78].mxu0  ;;  %4473 = vrot.lane.b32.xlu1 %v3223_v16, %s7090_s6 }
 0x35a   :  { %v8513_v26 = vpop.f32.mrb[79].mxu0 }
 0x35b   :  { %4643 = vrot.lane.b32.xlu0 %v6539_v58, %s7089_s1 }
 0x35d   :  { %4645 = vrot.lane.b32.xlu1 %v6540_v55, %s7089_s1 }
 0x35f   :  { %4639 = vrot.lane.b32.xlu0 %v4120_v50, %s7089_s1  ;;  %v9051_v50 = vld [vmem:[#allocation2_spill] sm:$0xff] }
 0x360   :  { %v4721_v2 = vsel %vm460_vm1, %v9051_v50, %v8258_v33 }
 0x361   :  { %4641 = vrot.lane.b32.xlu1 %v4123_v46, %s7089_s1  ;;  %v8530_v46 = vpop.permute.xlu0 %4351 }
 0x363   :  { %4483 = vrot.lane.b32.xlu0 %v6371_v52, %s7090_s6  ;;  %v9053_v52 = vld [vmem:[#allocation3_spill] sm:$0xff] }
 0x365   :  { %4485 = vrot.lane.b32.xlu1 %v6372_v30, %s7090_s6  ;;  %v8533_v30 = vpop.permute.xlu1 %4353 }
 0x367   :  { %4479 = vrot.lane.b32.xlu0 %v3236_v20, %s7090_s6 }
 0x369   :  { %4481 = vrot.lane.b32.xlu1 %v3239_v10, %s7090_s6 }
 0x36b   :  { %4651 = vrot.lane.b32.xlu0 %v6543_v11, %s7089_s1 }
 0x36d   :  { %4653 = vrot.lane.b32.xlu1 %v6544_v51, %s7089_s1 }
 0x36f   :  { %4647 = vrot.lane.b32.xlu0 %v4136_v24, %s7089_s1 }
 0x371   :  { %4649 = vrot.lane.b32.xlu1 %v4139_v49, %s7089_s1 }
 0x373   :  { %4491 = vrot.lane.b32.xlu0 %v6375_v44, %s7090_s6 }
 0x375   :  { %4493 = vrot.lane.b32.xlu1 %v6376_v3, %s7090_s6 }
 0x377   :  { %4487 = vrot.lane.b32.xlu0 %v3252_v62, %s7090_s6  ;;  %v9054_v62 = vld [vmem:[#allocation5_spill] sm:$0xff] }
 0x379   :  { %4489 = vrot.lane.b32.xlu1 %v3255_v17, %s7090_s6  ;;  %v4720_v17 = vsel %vm460_vm1, %v9054_v62, %v8268_v41 }
 0x37b   :  { %4659 = vrot.lane.b32.xlu0 %v6547_v21, %s7089_s1  ;;  %v8546_v21 = vld [vmem:[%s8953_s3] ss:$0 sm:$0xff] }
 0x37d   :  { %v4604_v11 = vpop.permute.xlu0 %4603  ;;  %4661 = vrot.lane.b32.xlu1 %v6548_v13, %s7089_s1 }
 0x37f   :  { %v4606_v24 = vpop.permute.xlu1 %4605  ;;  %4655 = vrot.lane.b32.xlu0 %v4152_v6, %s7089_s1 }
 0x381   :  { %v4600_v49 = vpop.permute.xlu0 %4599  ;;  %4657 = vrot.lane.b32.xlu1 %v4155_v27, %s7089_s1  ;;  %v9052_v27 = vld [vmem:[#allocation4_spill] sm:$0xff] }
 0x382   :  { %v4722_v29 = vsel %vm460_vm1, %v9052_v27, %v8270_v42 }
 0x383   :  { %v4602_v3 = vpop.permute.xlu1 %4601  ;;  %4499 = vrot.lane.b32.xlu0 %v6379_v1, %s7090_s6 }
 0x385   :  { %v4444_v28 = vpop.permute.xlu0 %4443  ;;  %4501 = vrot.lane.b32.xlu1 %v6380_v7, %s7090_s6  ;;  %v4719_v7 = vsel %vm460_vm1, %v9053_v52, %v8262_v34 }
 0x386   :  { %v4762_v6 = vsel %vm4759_vm4, %v4721_v2, %v4444_v28 }
 0x387   :  { %v4803_v16 = vsel %vm4800_vm5, %v4762_v6, %v4604_v11  ;;  %v4446_v58 = vpop.permute.xlu1 %4445  ;;  %4495 = vrot.lane.b32.xlu0 %v8470_v45, %s7090_s6 }
 0x388   :  { %v4850_v33 = vadd.f32 %v8546_v21, %v4803_v16  ;;  %v4763_v55 = vsel %vm4759_vm4, %v4722_v29, %v4446_v58  ;;  %v9057_v58 = vld [vmem:[#allocation7_spill] sm:$0xff] }
 0x389   :  { %v4804_v20 = vsel %vm4800_vm5, %v4763_v55, %v4606_v24  ;;  %v4440_v10 = vpop.permute.xlu0 %4439  ;;  %4497 = vrot.lane.b32.xlu1 %v8473_v23, %s7090_s6 }
 0x38a   :  { %v5511_v42 = vpack.c.bf16 %v4850_v33, %v4850_v33  ;;  %v4851_v51 = vadd.f32 %v8546_v21, %v4804_v20  ;;  %v4760_v44 = vsel %vm4759_vm4, %v4719_v7, %v4440_v10 }
 0x38b   :  { %v4801_v13 = vsel %vm4800_vm5, %v4760_v44, %v4600_v49  ;;  %v4442_v1 = vpop.permute.xlu1 %4441  ;;  %4667 = vrot.lane.b32.xlu0 %v8475_v63, %s7089_s1 }
 0x38c   :  { %5051 = vst.msk [vmem:[%s8954_s4 + $0x8] sm:$0xf] %vm5048_vm6, %v5511_v42  ;;  %v5512_v34 = vpack.c.bf16 %v4851_v51, %v4851_v51  ;;  %v4848_v45 = vadd.f32 %v8546_v21, %v4801_v13  ;;  %v4761_v23 = vsel %vm4759_vm4, %v4720_v17, %v4442_v1 }
 0x38d   :  { %v4802_v11 = vsel %vm4800_vm5, %v4761_v23, %v4602_v3  ;;  %v4612_v24 = vpop.permute.xlu0 %4611  ;;  %4669 = vrot.lane.b32.xlu1 %v8480_v37, %s7089_s1 }
 0x38e   :  { %5052 = vst.msk [vmem:[%s8954_s4 + $0xc] sm:$0xf] %vm5048_vm6, %v5512_v34  ;;  %v5509_v41 = vpack.c.bf16 %v4848_v45, %v4848_v45  ;;  %v4849_v63 = vadd.f32 %v8546_v21, %v4802_v11 }
 0x38f   :  { %v4614_v49 = vpop.permute.xlu1 %4613  ;;  %4663 = vrot.lane.b32.xlu0 %v8477_v19, %s7089_s1  ;;  %v9055_v19 = vld [vmem:[#allocation6_spill] sm:$0xff] }
 0x390   :  { %5049 = vst.msk [vmem:[%s8954_s4] sm:$0xf] %vm5048_vm6, %v5509_v41  ;;  %v5510_v3 = vpack.c.bf16 %v4849_v63, %v4849_v63  ;;  %v4725_v2 = vsel %vm460_vm1, %v9055_v19, %v8276_v48  ;;  %v9061_v63 = vld [vmem:[#allocation11_spill] sm:$0xff] }
 0x391   :  { %v4608_v50 = vpop.permute.xlu0 %4607  ;;  %4665 = vrot.lane.b32.xlu1 %v8482_v18, %s7089_s1  ;;  %v9056_v18 = vld [vmem:[#allocation8_spill] sm:$0xff] }
 0x392   :  { %5050 = vst.msk [vmem:[%s8954_s4 + $0x4] sm:$0xf] %vm5048_vm6, %v5510_v3  ;;  %v4726_v27 = vsel %vm460_vm1, %v9056_v18, %v8280_v54 }
 0x393   :  { %v4610_v37 = vpop.permute.xlu1 %4609  ;;  %4507 = vrot.lane.b32.xlu0 %v8485_v14, %s7090_s6 }
 0x395   :  { %v4452_v28 = vpop.permute.xlu0 %4451  ;;  %4509 = vrot.lane.b32.xlu1 %v8490_v40, %s7090_s6  ;;  %v4723_v40 = vsel %vm460_vm1, %v9057_v58, %v8284_v57 }
 0x396   :  { %v4766_v6 = vsel %vm4759_vm4, %v4725_v2, %v4452_v28 }
 0x397   :  { %v4807_v29 = vsel %vm4800_vm5, %v4766_v6, %v4612_v24  ;;  %v4454_v16 = vpop.permute.xlu1 %4453  ;;  %4503 = vrot.lane.b32.xlu0 %v8488_v53, %s7090_s6  ;;  %v9058_v53 = vld [vmem:[#allocation9_spill] sm:$0xff] }
 0x398   :  { %v4854_v14 = vadd.f32 %v8546_v21, %v4807_v29  ;;  %v4767_v48 = vsel %vm4759_vm4, %v4726_v27, %v4454_v16  ;;  %v4724_v20 = vsel %vm460_vm1, %v9058_v53, %v8286_v60 }
 0x399   :  { %v4808_v33 = vsel %vm4800_vm5, %v4767_v48, %v4614_v49  ;;  %v4448_v55 = vpop.permute.xlu0 %4447  ;;  %4505 = vrot.lane.b32.xlu1 %v8493_v43, %s7090_s6 }
 0x39a   :  { %v5515_v54 = vpack.c.bf16 %v4854_v14, %v4854_v14  ;;  %v4855_v52 = vadd.f32 %v8546_v21, %v4808_v33  ;;  %v4764_v7 = vsel %vm4759_vm4, %v4723_v40, %v4448_v55  ;;  %v9063_v40 = vld [vmem:[#allocation12_spill] sm:$0xff] }
 0x39b   :  { %v4805_v10 = vsel %vm4800_vm5, %v4764_v7, %v4608_v50  ;;  %v4450_v42 = vpop.permute.xlu1 %4449  ;;  %4671 = vrot.lane.b32.xlu0 %v8497_v38, %s7089_s1  ;;  %v4733_v33 = vsel %vm460_vm1, %v9063_v40, %v8308_v31 }
 0x39c   :  { %5055 = vst.msk [vmem:[%s8954_s4 + $0x18] sm:$0xf] %vm5048_vm6, %v5515_v54  ;;  %v5516_v57 = vpack.c.bf16 %v4855_v52, %v4855_v52  ;;  %v4852_v43 = vadd.f32 %v8546_v21, %v4805_v10  ;;  %v4765_v51 = vsel %vm4759_vm4, %v4724_v20, %v4450_v42  ;;  %v9064_v52 = vld [vmem:[#allocation18_spill] sm:$0xff] }
 0x39d   :  { %v4806_v44 = vsel %vm4800_vm5, %v4765_v51, %v4610_v37  ;;  %v4620_v62 = vpop.permute.xlu0 %4619  ;;  %4673 = vrot.lane.b32.xlu1 %v8502_v22, %s7089_s1  ;;  %v4734_v7 = vsel %vm460_vm1, %v9064_v52, %v8312_v35  ;;  %v9066_v35 = vld [vmem:[#allocation19_spill] sm:$0xff]  ;;  %v9072_v52 = vld [vmem:[#allocation24_spill] sm:$0xff] }
 0x39e   :  { %5056 = vst.msk [vmem:[%s8954_s4 + $0x1c] sm:$0xf] %vm5048_vm6, %v5516_v57  ;;  %v5513_v60 = vpack.c.bf16 %v4852_v43, %v4852_v43  ;;  %v4853_v38 = vadd.f32 %v8546_v21, %v4806_v44  ;;  %v9065_v57 = vld [vmem:[#allocation17_spill] sm:$0xff] }
 0x39f   :  { %v4622_v17 = vpop.permute.xlu1 %4621  ;;  %4515 = vrot.lane.b32.xlu0 %v8505_v59, %s7090_s6  ;;  %v9059_v59 = vld [vmem:[#allocation10_spill] sm:$0xff]  ;;  %v4731_v43 = vsel %vm460_vm1, %v9065_v57, %v8316_v47 }
 0x3a0   :  { %5053 = vst.msk [vmem:[%s8954_s4 + $0x10] sm:$0xf] %vm5048_vm6, %v5513_v60  ;;  %v5514_v13 = vpack.c.bf16 %v4853_v38, %v4853_v38  ;;  %v4729_v34 = vsel %vm460_vm1, %v9059_v59, %v8292_v0  ;;  %v4732_v38 = vsel %vm460_vm1, %v9066_v35, %v8318_v39 }
 0x3a1   :  { %v4616_v1 = vpop.permute.xlu0 %4615  ;;  %4517 = vrot.lane.b32.xlu1 %v8510_v8, %s7090_s6  ;;  %v9060_v8 = vld [vmem:[#allocation15_spill] sm:$0xff] }
 0x3a2   :  { %5054 = vst.msk [vmem:[%s8954_s4 + $0x14] sm:$0xf] %vm5048_vm6, %v5514_v13  ;;  %v4730_v11 = vsel %vm460_vm1, %v9060_v8, %v8296_v9 }
 0x3a3   :  { %v4618_v22 = vpop.permute.xlu1 %4617  ;;  %4511 = vrot.lane.b32.xlu0 %v8508_v32, %s7090_s6 }
 0x3a5   :  { %v4460_v45 = vpop.permute.xlu0 %4459  ;;  %4513 = vrot.lane.b32.xlu1 %v8513_v26, %s7090_s6  ;;  %v4727_v26 = vsel %vm460_vm1, %v9061_v63, %v8300_v12 }
 0x3a6   :  { %v4770_v23 = vsel %vm4759_vm4, %v4729_v34, %v4460_v45 }
 0x3a7   :  { %v4811_v24 = vsel %vm4800_vm5, %v4770_v23, %v4620_v62  ;;  %v4462_v41 = vpop.permute.xlu1 %4461  ;;  %4675 = vrot.lane.b32.xlu0 %v8495_v4, %s7089_s1  ;;  %v9062_v4 = vld [vmem:[#allocation16_spill] sm:$0xff] }
 0x3a8   :  { %v4858_v32 = vadd.f32 %v8546_v21, %v4811_v24  ;;  %v4771_v0 = vsel %vm4759_vm4, %v4730_v11, %v4462_v41  ;;  %v4728_v19 = vsel %vm460_vm1, %v9062_v4, %v8302_v15  ;;  %v9067_v41 = vld [vmem:[#allocation20_spill] sm:$0xff]  ;;  %v9069_v4 = vld [vmem:[#allocation21_spill] sm:$0xff] }
 0x3a9   :  { %v4812_v49 = vsel %vm4800_vm5, %v4771_v0, %v4622_v17  ;;  %v4456_v3 = vpop.permute.xlu0 %4455  ;;  %4677 = vrot.lane.b32.xlu1 %v8500_v5, %s7089_s1 }
 0x3aa   :  { %v5519_v9 = vpack.c.bf16 %v4858_v32, %v4858_v32  ;;  %v4859_v50 = vadd.f32 %v8546_v21, %v4812_v49  ;;  %v4768_v37 = vsel %vm4759_vm4, %v4727_v26, %v4456_v3  ;;  %v4737_v32 = vsel %vm460_vm1, %v9067_v41, %v8324_v56  ;;  %v9068_v26 = vld [vmem:[#allocation22_spill] sm:$0xff] }
 0x3ab   :  { %v4809_v2 = vsel %vm4800_vm5, %v4768_v37, %v4616_v1  ;;  %v4458_v28 = vpop.permute.xlu1 %4457  ;;  %v4738_v49 = vsel %vm460_vm1, %v9068_v26, %v8328_v61  ;;  %v9070_v61 = vld [vmem:[#allocation23_spill] sm:$0xff]  ;;  %v9077_v26 = vld [vmem:[#allocation32_spill] sm:$0xff] }
 0x3ac   :  { %5059 = vst.msk [vmem:[%s8954_s4 + $0x28] sm:$0xf] %vm5048_vm6, %v5519_v9  ;;  %v5520_v12 = vpack.c.bf16 %v4859_v50, %v4859_v50  ;;  %v4856_v5 = vadd.f32 %v8546_v21, %v4809_v2  ;;  %v4769_v6 = vsel %vm4759_vm4, %v4728_v19, %v4458_v28  ;;  %v4735_v19 = vsel %vm460_vm1, %v9069_v4, %v8332_v36 }
 0x3ad   :  { %v4810_v18 = vsel %vm4800_vm5, %v4769_v6, %v4618_v22  ;;  %v4628_v27 = vpop.permute.xlu0 %4627  ;;  %v4736_v6 = vsel %vm460_vm1, %v9070_v61, %v8334_v25 }
 0x3ae   :  { %5060 = vst.msk [vmem:[%s8954_s4 + $0x2c] sm:$0xf] %vm5048_vm6, %v5520_v12  ;;  %v5517_v15 = vpack.c.bf16 %v4856_v5, %v4856_v5  ;;  %v4857_v29 = vadd.f32 %v8546_v21, %v4810_v18 }
 0x3af   :  { %v4630_v16 = vpop.permute.xlu1 %4629 }
 0x3b0   :  { %5057 = vst.msk [vmem:[%s8954_s4 + $0x20] sm:$0xf] %vm5048_vm6, %v5517_v15  ;;  %v5518_v14 = vpack.c.bf16 %v4857_v29, %v4857_v29 }
 0x3b1   :  { %v4624_v48 = vpop.permute.xlu0 %4623 }
 0x3b2   :  { %5058 = vst.msk [vmem:[%s8954_s4 + $0x24] sm:$0xf] %vm5048_vm6, %v5518_v14 }
 0x3b3   :  { %v4626_v58 = vpop.permute.xlu1 %4625 }
 0x3b5   :  { %v4468_v55 = vpop.permute.xlu0 %4467 }
 0x3b6   :  { %v4774_v54 = vsel %vm4759_vm4, %v4733_v33, %v4468_v55 }
 0x3b7   :  { %v4815_v53 = vsel %vm4800_vm5, %v4774_v54, %v4628_v27  ;;  %v4470_v20 = vpop.permute.xlu1 %4469  ;;  %v9071_v54 = vld [vmem:[#allocation14_spill] sm:$0xff] }
 0x3b8   :  { %v4862_v10 = vadd.f32 %v8546_v21, %v4815_v53  ;;  %v4775_v42 = vsel %vm4759_vm4, %v4734_v7, %v4470_v20  ;;  %v4741_v7 = vsel %vm460_vm1, %v9072_v52, %v9071_v54  ;;  %v9081_v54 = vld [vmem:[#allocation36_spill] sm:$0xff] }
 0x3b9   :  { %v4816_v31 = vsel %vm4800_vm5, %v4775_v42, %v4630_v16  ;;  %v4464_v51 = vpop.permute.xlu0 %4463  ;;  %v9074_v42 = vld [vmem:[#allocation25_spill] sm:$0xff] }
 0x3ba   :  { %v5523_v44 = vpack.c.bf16 %v4862_v10, %v4862_v10  ;;  %v4863_v62 = vadd.f32 %v8546_v21, %v4816_v31  ;;  %v4772_v60 = vsel %vm4759_vm4, %v4731_v43, %v4464_v51  ;;  %v9073_v10 = vld [vmem:[#allocation29_spill] sm:$0xff] }
 0x3bb   :  { %v4813_v17 = vsel %vm4800_vm5, %v4772_v60, %v4624_v48  ;;  %v4466_v13 = vpop.permute.xlu1 %4465  ;;  %v4742_v57 = vsel %vm460_vm1, %v9074_v42, %v9073_v10  ;;  %v9082_v10 = vld [vmem:[#allocation37_spill] sm:$0xff] }
 0x3bc   :  { %5063 = vst.msk [vmem:[%s8954_s4 + $0x38] sm:$0xf] %vm5048_vm6, %v5523_v44  ;;  %v5524_v47 = vpack.c.bf16 %v4863_v62, %v4863_v62  ;;  %v4860_v1 = vadd.f32 %v8546_v21, %v4813_v17  ;;  %v4773_v22 = vsel %vm4759_vm4, %v4732_v38, %v4466_v13  ;;  %v9075_v17 = vld [vmem:[#allocation30_spill] sm:$0xff] }
 0x3bd   :  { %v4814_v59 = vsel %vm4800_vm5, %v4773_v22, %v4626_v58  ;;  %v4636_v34 = vpop.permute.xlu0 %4635 }
 0x3be   :  { %5064 = vst.msk [vmem:[%s8954_s4 + $0x3c] sm:$0xf] %vm5048_vm6, %v5524_v47  ;;  %v5521_v39 = vpack.c.bf16 %v4860_v1, %v4860_v1  ;;  %v4861_v45 = vadd.f32 %v8546_v21, %v4814_v59 }
 0x3bf   :  { %v4638_v23 = vpop.permute.xlu1 %4637 }
 0x3c0   :  { %5061 = vst.msk [vmem:[%s8954_s4 + $0x30] sm:$0xf] %vm5048_vm6, %v5521_v39  ;;  %v5522_v8 = vpack.c.bf16 %v4861_v45, %v4861_v45 }
 0x3c1   :  { %v4632_v11 = vpop.permute.xlu0 %4631 }
 0x3c2   :  { %5062 = vst.msk [vmem:[%s8954_s4 + $0x34] sm:$0xf] %vm5048_vm6, %v5522_v8 }
 0x3c3   :  { %v4634_v24 = vpop.permute.xlu1 %4633 }
 0x3c5   :  { %v4476_v0 = vpop.permute.xlu0 %4475 }
 0x3c6   :  { %v4778_v63 = vsel %vm4759_vm4, %v4737_v32, %v4476_v0 }
 0x3c7   :  { %v4819_v3 = vsel %vm4800_vm5, %v4778_v63, %v4636_v34  ;;  %v4478_v9 = vpop.permute.xlu1 %4477  ;;  %v9076_v34 = vld [vmem:[#allocation31_spill] sm:$0xff] }
 0x3c8   :  { %v4866_v50 = vadd.f32 %v8546_v21, %v4819_v3  ;;  %v4779_v37 = vsel %vm4759_vm4, %v4738_v49, %v4478_v9 }
 0x3c9   :  { %v4820_v56 = vsel %vm4800_vm5, %v4779_v37, %v4638_v23  ;;  %v4472_v2 = vpop.permute.xlu0 %4471  ;;  %v9078_v37 = vld [vmem:[#allocation33_spill] sm:$0xff] }
 0x3ca   :  { %v5527_v28 = vpack.c.bf16 %v4866_v50, %v4866_v50  ;;  %v4867_v12 = vadd.f32 %v8546_v21, %v4820_v56  ;;  %v4776_v5 = vsel %vm4759_vm4, %v4735_v19, %v4472_v2 }
 0x3cb   :  { %v4817_v18 = vsel %vm4800_vm5, %v4776_v5, %v4632_v11  ;;  %v4474_v27 = vpop.permute.xlu1 %4473 }
 0x3cc   :  { %5067 = vst.msk [vmem:[%s8954_s4 + $0x48] sm:$0xf] %vm5048_vm6, %v5527_v28  ;;  %v5528_v36 = vpack.c.bf16 %v4867_v12, %v4867_v12  ;;  %v4864_v15 = vadd.f32 %v8546_v21, %v4817_v18  ;;  %v4777_v29 = vsel %vm4759_vm4, %v4736_v6, %v4474_v27  ;;  %v9079_v12 = vld [vmem:[#allocation34_spill] sm:$0xff] }
 0x3cd   :  { %v4818_v16 = vsel %vm4800_vm5, %v4777_v29, %v4634_v24  ;;  %v4644_v14 = vpop.permute.xlu0 %4643 }
 0x3ce   :  { %5068 = vst.msk [vmem:[%s8954_s4 + $0x4c] sm:$0xf] %vm5048_vm6, %v5528_v36  ;;  %v5525_v25 = vpack.c.bf16 %v4864_v15, %v4864_v15  ;;  %v4865_v48 = vadd.f32 %v8546_v21, %v4818_v16  ;;  %v9080_v36 = vld [vmem:[#allocation35_spill] sm:$0xff] }
 0x3cf   :  { %v4646_v58 = vpop.permute.xlu1 %4645 }
 0x3d0   :  { %5065 = vst.msk [vmem:[%s8954_s4 + $0x40] sm:$0xf] %vm5048_vm6, %v5525_v25  ;;  %v5526_v40 = vpack.c.bf16 %v4865_v48, %v4865_v48 }
 0x3d1   :  { %v4640_v33 = vpop.permute.xlu0 %4639 }
 0x3d2   :  { %5066 = vst.msk [vmem:[%s8954_s4 + $0x44] sm:$0xf] %vm5048_vm6, %v5526_v40 }
 0x3d3   :  { %v4642_v55 = vpop.permute.xlu1 %4641 }
 0x3d5   :  { %v4484_v53 = vpop.permute.xlu0 %4483 }
 0x3d6   :  { %v4782_v20 = vsel %vm4759_vm4, %v4741_v7, %v4484_v53 }
 0x3d7   :  { %v4823_v43 = vsel %vm4800_vm5, %v4782_v20, %v4644_v14  ;;  %v4486_v31 = vpop.permute.xlu1 %4485 }
 0x3d8   :  { %v4870_v51 = vadd.f32 %v8546_v21, %v4823_v43  ;;  %v4783_v44 = vsel %vm4759_vm4, %v4742_v57, %v4486_v31 }
 0x3d9   :  { %v4824_v62 = vsel %vm4800_vm5, %v4783_v44, %v4646_v58  ;;  %v4480_v60 = vpop.permute.xlu0 %4479  ;;  %v9083_v44 = vld [vmem:[#allocation38_spill] sm:$0xff] }
 0x3da   :  { %v5531_v35 = vpack.c.bf16 %v4870_v51, %v4870_v51  ;;  %v4871_v38 = vadd.f32 %v8546_v21, %v4824_v62  ;;  %v4780_v13 = vsel %vm4759_vm4, %v9075_v17, %v4480_v60 }
 0x3db   :  { %v4821_v47 = vsel %vm4800_vm5, %v4780_v13, %v4640_v33  ;;  %v4482_v1 = vpop.permute.xlu1 %4481  ;;  %v9084_v13 = vld [vmem:[#allocation39_spill] sm:$0xff] }
 0x3dc   :  { %5071 = vst.msk [vmem:[%s8954_s4 + $0x58] sm:$0xf] %vm5048_vm6, %v5531_v35  ;;  %v5532_v22 = vpack.c.bf16 %v4871_v38, %v4871_v38  ;;  %v4868_v59 = vadd.f32 %v8546_v21, %v4821_v47  ;;  %v4781_v39 = vsel %vm4759_vm4, %v9076_v34, %v4482_v1 }
 0x3dd   :  { %v4822_v45 = vsel %vm4800_vm5, %v4781_v39, %v4642_v55  ;;  %v4652_v23 = vpop.permute.xlu0 %4651 }
 0x3de   :  { %5072 = vst.msk [vmem:[%s8954_s4 + $0x5c] sm:$0xf] %vm5048_vm6, %v5532_v22  ;;  %v5529_v8 = vpack.c.bf16 %v4868_v59, %v4868_v59  ;;  %v4869_v11 = vadd.f32 %v8546_v21, %v4822_v45 }
 0x3df   :  { %v4654_v24 = vpop.permute.xlu1 %4653 }
 0x3e0   :  { %5069 = vst.msk [vmem:[%s8954_s4 + $0x50] sm:$0xf] %vm5048_vm6, %v5529_v8  ;;  %v5530_v41 = vpack.c.bf16 %v4869_v11, %v4869_v11 }
 0x3e1   :  { %v4648_v32 = vpop.permute.xlu0 %4647 }
 0x3e2   :  { %5070 = vst.msk [vmem:[%s8954_s4 + $0x54] sm:$0xf] %vm5048_vm6, %v5530_v41 }
 0x3e3   :  { %v4650_v0 = vpop.permute.xlu1 %4649 }
 0x3e5   :  { %v4492_v63 = vpop.permute.xlu0 %4491 }
 0x3e6   :  { %v4786_v49 = vsel %vm4759_vm4, %v9077_v26, %v4492_v63  ;;  %v9086_v26 = vld [vmem:[#allocation41_spill] sm:$0xff] }
 0x3e7   :  { %v4827_v3 = vsel %vm4800_vm5, %v4786_v49, %v4652_v23  ;;  %v4494_v9 = vpop.permute.xlu1 %4493 }
 0x3e8   :  { %v4874_v50 = vadd.f32 %v8546_v21, %v4827_v3  ;;  %v4787_v4 = vsel %vm4759_vm4, %v9078_v37, %v4494_v9 }
 0x3e9   :  { %v4828_v19 = vsel %vm4800_vm5, %v4787_v4, %v4654_v24  ;;  %v4488_v56 = vpop.permute.xlu0 %4487  ;;  %v9085_v24 = vld [vmem:[#allocation40_spill] sm:$0xff]  ;;  %v9087_v4 = vld [vmem:[#allocation26_spill] sm:$0xff] }
 0x3ea   :  { %v5535_v2 = vpack.c.bf16 %v4874_v50, %v4874_v50  ;;  %v4875_v28 = vadd.f32 %v8546_v21, %v4828_v19  ;;  %v4784_v5 = vsel %vm4759_vm4, %v9079_v12, %v4488_v56 }
 0x3eb   :  { %v4825_v61 = vsel %vm4800_vm5, %v4784_v5, %v4648_v32  ;;  %v4490_v6 = vpop.permute.xlu1 %4489  ;;  %v9088_v5 = vld [vmem:[#allocation27_spill] sm:$0xff] }
 0x3ec   :  { %5075 = vst.msk [vmem:[%s8954_s4 + $0x68] sm:$0xf] %vm5048_vm6, %v5535_v2  ;;  %v5536_v18 = vpack.c.bf16 %v4875_v28, %v4875_v28  ;;  %v4872_v27 = vadd.f32 %v8546_v21, %v4825_v61  ;;  %v4785_v15 = vsel %vm4759_vm4, %v9080_v36, %v4490_v6 }
 0x3ed   :  { %v4826_v29 = vsel %vm4800_vm5, %v4785_v15, %v4650_v0  ;;  %v4660_v16 = vpop.permute.xlu0 %4659 }
 0x3ee   :  { %5076 = vst.msk [vmem:[%s8954_s4 + $0x6c] sm:$0xf] %vm5048_vm6, %v5536_v18  ;;  %v5533_v14 = vpack.c.bf16 %v4872_v27, %v4872_v27  ;;  %v4873_v25 = vadd.f32 %v8546_v21, %v4826_v29 }
 0x3ef   :  { %v4662_v48 = vpop.permute.xlu1 %4661 }
 0x3f0   :  { %5073 = vst.msk [vmem:[%s8954_s4 + $0x60] sm:$0xf] %vm5048_vm6, %v5533_v14  ;;  %v5534_v58 = vpack.c.bf16 %v4873_v25, %v4873_v25  ;;  %v9089_v25 = vld [vmem:[#allocation28_spill] sm:$0xff] }
 0x3f1   :  { %v4656_v40 = vpop.permute.xlu0 %4655 }
 0x3f2   :  { %5074 = vst.msk [vmem:[%s8954_s4 + $0x64] sm:$0xf] %vm5048_vm6, %v5534_v58 }
 0x3f3   :  { %v4658_v33 = vpop.permute.xlu1 %4657 }
 0x3f5   :  { %v4500_v55 = vpop.permute.xlu0 %4499 }
 0x3f6   :  { %v4790_v52 = vsel %vm4759_vm4, %v9081_v54, %v4500_v55 }
 0x3f7   :  { %v4831_v7 = vsel %vm4800_vm5, %v4790_v52, %v4660_v16  ;;  %v4502_v53 = vpop.permute.xlu1 %4501 }
 0x3f8   :  { %v4878_v20 = vadd.f32 %v8546_v21, %v4831_v7  ;;  %v4791_v42 = vsel %vm4759_vm4, %v9082_v10, %v4502_v53 }
 0x3f9   :  { %v4832_v57 = vsel %vm4800_vm5, %v4791_v42, %v4662_v48  ;;  %v4496_v43 = vpop.permute.xlu0 %4495  ;;  %v4755_v48 = vsel %vm460_vm1, %v9089_v25, %v8530_v46 }
 0x3fa   :  { %v5539_v31 = vpack.c.bf16 %v4878_v20, %v4878_v20  ;;  %v4879_v51 = vadd.f32 %v8546_v21, %v4832_v57  ;;  %v4788_v62 = vsel %vm4759_vm4, %v9083_v44, %v4496_v43  ;;  %v9091_v20 = vld [vmem:[#allocation42_spill] sm:$0xff] }
 0x3fb   :  { %v4829_v60 = vsel %vm4800_vm5, %v4788_v62, %v4656_v40  ;;  %v4498_v35 = vpop.permute.xlu1 %4497 }
 0x3fc   :  { %5079 = vst.msk [vmem:[%s8954_s4 + $0x78] sm:$0xf] %vm5048_vm6, %v5539_v31  ;;  %v5540_v38 = vpack.c.bf16 %v4879_v51, %v4879_v51  ;;  %v4876_v17 = vadd.f32 %v8546_v21, %v4829_v60  ;;  %v4789_v47 = vsel %vm4759_vm4, %v9084_v13, %v4498_v35  ;;  %v9092_v51 = vld [vmem:[#allocation43_spill] sm:$0xff] }
 0x3fd   :  { %v4830_v1 = vsel %vm4800_vm5, %v4789_v47, %v4658_v33  ;;  %v4668_v22 = vpop.permute.xlu0 %4667  ;;  %v9090_v33 = vld [vmem:[#allocation13_spill] sm:$0xff] }
 0x3fe   :  { %5080 = vst.msk [vmem:[%s8954_s4 + $0x7c] sm:$0xf] %vm5048_vm6, %v5540_v38  ;;  %v5537_v59 = vpack.c.bf16 %v4876_v17, %v4876_v17  ;;  %v4877_v34 = vadd.f32 %v8546_v21, %v4830_v1  ;;  %v4756_v55 = vsel %vm460_vm1, %v9090_v33, %v8533_v30 }
 0x3ff   :  { %v4670_v39 = vpop.permute.xlu1 %4669 }
 0x400   :  { %5077 = vst.msk [vmem:[%s8954_s4 + $0x70] sm:$0xf] %vm5048_vm6, %v5537_v59  ;;  %v5538_v45 = vpack.c.bf16 %v4877_v34, %v4877_v34 }
 0x401   :  { %v4664_v23 = vpop.permute.xlu0 %4663 }
 0x402   :  { %5078 = vst.msk [vmem:[%s8954_s4 + $0x74] sm:$0xf] %vm5048_vm6, %v5538_v45 }
 0x403   :  { %v4666_v8 = vpop.permute.xlu1 %4665 }
 0x405   :  { %v4508_v11 = vpop.permute.xlu0 %4507 }
 0x406   :  { %v4794_v41 = vsel %vm4759_vm4, %v9085_v24, %v4508_v11 }
 0x407   :  { %v4835_v32 = vsel %vm4800_vm5, %v4794_v41, %v4668_v22  ;;  %v4510_v0 = vpop.permute.xlu1 %4509 }
 0x408   :  { %v4882_v63 = vadd.f32 %v8546_v21, %v4835_v32  ;;  %v4795_v49 = vsel %vm4759_vm4, %v9086_v26, %v4510_v0 }
 0x409   :  { %v4836_v3 = vsel %vm4800_vm5, %v4795_v49, %v4670_v39  ;;  %v4504_v9 = vpop.permute.xlu0 %4503 }
 0x40a   :  { %v5543_v50 = vpack.c.bf16 %v4882_v63, %v4882_v63  ;;  %v4883_v37 = vadd.f32 %v8546_v21, %v4836_v3  ;;  %v4792_v19 = vsel %vm4759_vm4, %v9087_v4, %v4504_v9 }
 0x40b   :  { %v4833_v56 = vsel %vm4800_vm5, %v4792_v19, %v4664_v23  ;;  %v4506_v2 = vpop.permute.xlu1 %4505 }
 0x40c   :  { %5083 = vst.msk [vmem:[%s8954_s4 + $0x88] sm:$0xf] %vm5048_vm6, %v5543_v50  ;;  %v5544_v28 = vpack.c.bf16 %v4883_v37, %v4883_v37  ;;  %v4880_v12 = vadd.f32 %v8546_v21, %v4833_v56  ;;  %v4793_v61 = vsel %vm4759_vm4, %v9088_v5, %v4506_v2 }
 0x40d   :  { %v4834_v6 = vsel %vm4800_vm5, %v4793_v61, %v4666_v8  ;;  %v4672_v18 = vpop.permute.xlu0 %4671 }
 0x40e   :  { %5084 = vst.msk [vmem:[%s8954_s4 + $0x8c] sm:$0xf] %vm5048_vm6, %v5544_v28  ;;  %v5541_v27 = vpack.c.bf16 %v4880_v12, %v4880_v12  ;;  %v4881_v36 = vadd.f32 %v8546_v21, %v4834_v6 }
 0x40f   :  { %v4674_v15 = vpop.permute.xlu1 %4673 }
 0x410   :  { %5081 = vst.msk [vmem:[%s8954_s4 + $0x80] sm:$0xf] %vm5048_vm6, %v5541_v27  ;;  %v5542_v29 = vpack.c.bf16 %v4881_v36, %v4881_v36 }
 0x411   :  { %v4516_v16 = vpop.permute.xlu0 %4515 }
 0x412   :  { %5082 = vst.msk [vmem:[%s8954_s4 + $0x84] sm:$0xf] %vm5048_vm6, %v5542_v29  ;;  %v4798_v10 = vsel %vm4759_vm4, %v9091_v20, %v4516_v16 }
 0x413   :  { %v4518_v14 = vpop.permute.xlu1 %4517 }
 0x414   :  { %v4799_v30 = vsel %vm4759_vm4, %v9092_v51, %v4518_v14 }
 0x415   :  { %v4512_v58 = vpop.permute.xlu0 %4511 }
 0x416   :  { %v4796_v40 = vsel %vm4759_vm4, %v4755_v48, %v4512_v58 }
 0x417   :  { %v4837_v54 = vsel %vm4800_vm5, %v4796_v40, %v4672_v18  ;;  %v4514_v52 = vpop.permute.xlu1 %4513 }
 0x418   :  { %v4884_v7 = vadd.f32 %v8546_v21, %v4837_v54  ;;  %v4797_v53 = vsel %vm4759_vm4, %v4756_v55, %v4514_v52 }
 0x419   :  { %v4838_v42 = vsel %vm4800_vm5, %v4797_v53, %v4674_v15  ;;  %v4676_v46 = vpop.permute.xlu0 %4675 }
 0x41a   :  { %v5545_v57 = vpack.c.bf16 %v4884_v7, %v4884_v7  ;;  %v4885_v43 = vadd.f32 %v8546_v21, %v4838_v42  ;;  %v4839_v31 = vsel %vm4800_vm5, %v4798_v10, %v4676_v46 }
 0x41b   :  { %v4886_v44 = vadd.f32 %v8546_v21, %v4839_v31  ;;  %v4678_v62 = vpop.permute.xlu1 %4677 }
 0x41c   :  { %5085 = vst.msk [vmem:[%s8954_s4 + $0x90] sm:$0xf] %vm5048_vm6, %v5545_v57  ;;  %v5546_v60 = vpack.c.bf16 %v4885_v43, %v4885_v43  ;;  %v4840_v35 = vsel %vm4800_vm5, %v4799_v30, %v4678_v62 }
 0x41d   :  { %v5547_v38 = vpack.c.bf16 %v4886_v44, %v4886_v44  ;;  %v4887_v17 = vadd.f32 %v8546_v21, %v4840_v35 }
 0x41e   :  { %5086 = vst.msk [vmem:[%s8954_s4 + $0x94] sm:$0xf] %vm5048_vm6, %v5546_v60 }
 0x41f   :  { %5087 = vst.msk [vmem:[%s8954_s4 + $0x98] sm:$0xf] %vm5048_vm6, %v5547_v38  ;;  %v5548_v13 = vpack.c.bf16 %v4887_v17, %v4887_v17 }
 0x421   :  { %5088 = vst.msk [vmem:[%s8954_s4 + $0x9c] sm:$0xf] %vm5048_vm6, %v5548_v13 }

// kernel: fpn_stage_forward.5
= control target key start
LH: loop header
LB: loop body
LE: loop exit
PB: predicated region body
PF: predicated region fallthrough
CT: control target
= control target key end

     0   :  { %s6407_s15 = smov 0   ;;  %s7804_s0 = inlined_call_operand.vmem [shape: bf16[952,8], index: 0, kind: input, shape index: {}, may-alias: {0,1}]   ;;  %s7805_s1 = inlined_call_operand.vmem [shape: bf16[952,8], index: 1, kind: input, shape index: {}, may-alias: {0,1}]   ;;  %s7806_s2 = inlined_call_operand.vmem [shape: bf16[9,8,8], index: 2, kind: input, shape index: {}]   ;;  %s7807_s3 = inlined_call_operand.vmem [shape: f32[1,8], index: 3, kind: input, shape index: {}]   ;;  %s7808_s4 = inlined_call_operand.vmem [shape: f32[896,8], index: 4, kind: output, shape index: {}]  }
   0x1 LB: > { %s4723_s16 = sadd.s32 4294967295, %s6380_s15   ;;  %p4729_p0 = scmp.ge.s32.totalorder %s6380_s15, 1  ;;  %s6380_s15 = sphi %s6407_s15, %s14_s15  }
   0x2   : > { %p190_p1 = scmp.lt.s32.totalorder %s6380_s15, 3 }
   0x4   : > { %p191_p2 = pnand %p4729_p0, %p190_p1 }
   0x6   : > { %194 = sbr.rel (%p191_p2) target bundleno = 748 (0x2ec), region = 36 }
   0xd   : > { %v4768_v0 = vld [vmem:[%s7806_s2 + $0x4] sm:$0xf]  ;;  %vm920_vm0 = vcmask 1043456   ;;  %s6420_s19 = smul.u32 56, %s4723_s16  ;;  %v4884_v2 = vld [vmem:[%s7806_s2 + $0x10] sm:$0xf] }
   0xe   : > { %6275 = vmatprep.subr.msk.bf16.mxu1 %vm920_vm0, %v4768_v0  ;;  %v922_v1 = vsel %vm920_vm0, %v4768_v0, 0  ;;  %v602_v3 = vld [vmem:[%s7806_s2] sm:$0xf]  ;;  %6279 = vmatprep.subr.msk.bf16.mxu0 %vm920_vm0, %v4884_v2  ;;  %v6433_v4 = vsel %vm920_vm0, %v4884_v2, 0  ;;  %v4913_v5 = vld [vmem:[%s7806_s2 + $0x14] sm:$0xf] }
   0xf   : > { %5304 = vmatpush3.bf16.msra.mxu1 %v922_v1  ;;  %p232_p3 = scmp.lt.s32.totalorder %s6420_s19, 118  ;;  %7856 = vst [vmem:[#allocation2_spill] sm:$0xff] %v6433_v4  ;;  %5536 = vmatpush3.bf16.msra.mxu0 %v6433_v4  ;;  %vm606_vm1 = vsmask.f32 7424  ;;  %vm835_vm2 = vcmask 64512   ;;  %v1238_v8 = vsel %vm920_vm0, %v602_v3, 0 }
  0x10   : > { %6276 = vmatprep.subr.msk.bf16.mxu1 %vm920_vm0, %v602_v3  ;;  %6281 = vmatprep.subr.msk.bf16.mxu0 %vm920_vm0, %v4913_v5  ;;  %v3192_v10 = vsel %vm920_vm0, %v4913_v5, 0  ;;  %v6492_v34 = vld [vmem:[%s7806_s2 + $0x8] sm:$0xf]  ;;  %v6513_v51 = vld [vmem:[%s7806_s2 + $0x18] sm:$0xf]  ;;  %s6607_s9 = sadd.s32 1, %s4723_s16 }
  0x11   : > { %s233_s26 = scalar_select %p232_p3, %s6420_s19, 118  ;;  %vm1528_vm3 = vcmask 1046528  }
  0x12   : > { %s4732_s10 = smul.u32 56, %s6607_s9  ;;  %p252_p5 = scmp.lt.s32.totalorder %s6420_s19, 111 }
  0x13   : > { %s4730_s27 = sshll.u32 %s233_s26, 2 }
  0x14   : > { %s6445_s30 = scalar_lea.vmem %s7804_s0, %s4730_s27  ;;  %p6659_p4 = scmp.lt.s32.totalorder %s4732_s10, 118 }
  0x15   : > { %v6448_v6 = vld [vmem:[%s6445_s30] sm:$0xff]   ;;  %v6451_v7 = vld [vmem:[%s6445_s30 + $0x8] sm:$0xff]   ;;  %v6455_v9 = vld [vmem:[%s6445_s30 + $0x10] sm:$0xff]   ;;  %s7929_s19 = smov (!%p252_p5, %s6420_s19), 111 }
  0x16   : > { %v608_v11 = vshrl.u32 %v6448_v6, 16  ;;  %v610_v12 = vshll.u32 %v6448_v6, 16  ;;  %v615_v13 = vshll.u32 %v6451_v7, 16  ;;  %v619_v14 = vshrl.u32 %v6451_v7, 16  ;;  %v6464_v16 = vld [vmem:[%s6445_s30 + $0x18] sm:$0xff]   ;;  %v6475_v24 = vld [vmem:[%s6445_s30 + $0x20] sm:$0xff]  }
  0x17   : > { %v623_v15 = vshll.u32 %v6455_v9, 16  ;;  %v6467_v17 = vld [vmem:[%s6445_s30 + $0xc] ss:$4 sps:$4 sm:$0xff]   ;;  %v6470_v20 = vld [vmem:[%s6445_s30 + $0x14] ss:$4 sps:$4 sm:$0xff]   ;;  %v627_v31 = vshrl.u32 %v6455_v9, 16 }
  0x18   : > { %v612_v18 = vrot.slane %v610_v12, 1  ;;  %v617_v19 = vrot.slane %v615_v13, 1  ;;  %v2419_v22 = vshrl.u32 %v6467_v17, 16  ;;  %v2421_v23 = vshll.u32 %v6467_v17, 16  ;;  %v6480_v29 = vld [vmem:[%s6445_s30 + $0x1c] ss:$4 sps:$4 sm:$0xff]  }
  0x19   : > { %v625_v21 = vrot.slane %v623_v15, 1  ;;  %v2425_v27 = vshll.u32 %v6470_v20, 16  ;;  %v2429_v28 = vshrl.u32 %v6470_v20, 16  ;;  %v6484_v32 = vld [vmem:[%s6445_s30 + $0x28] sm:$0xff]   ;;  %v6487_v33 = vld [vmem:[%s6445_s30 + $0x30] sm:$0xff]   ;;  %v2432_v38 = vshll.u32 %v6480_v29, 16 }
  0x1a   : > { %v613_v25 = vor.u32 %v612_v18, %v608_v11  ;;  %v621_v26 = vor.u32 %v619_v14, %v617_v19  ;;  %v2423_v30 = vrot.slane %v2421_v23, 1  ;;  %v6498_v39 = vld [vmem:[%s6445_s30 + $0x24] ss:$4 sps:$4 sm:$0xff]   ;;  %v631_v42 = vshll.u32 %v6464_v16, 16  ;;  %v6504_v44 = vld [vmem:[%s6445_s30 + $0x2c] ss:$4 sps:$4 sm:$0xff]  }
  0x1b   : > { %v2427_v37 = vrot.slane %v2425_v27, 1  ;;  %v629_v41 = vor.u32 %v627_v31, %v625_v21  ;;  %v635_v43 = vshrl.u32 %v6464_v16, 16  ;;  %v2434_v46 = vrot.slane %v2432_v38, 1  ;;  %v6523_v58 = vld [vmem:[%s6445_s30 + $0x38] sm:$0xff]   ;;  %v6539_v5 = vld [vmem:[%s6445_s30 + $0x40] sm:$0xff]   ;;  %s7927_s10 = smov (!%p6659_p4, %s4732_s10), 118 }
  0x1c   : > { %v618_v35 = vsel %vm606_vm1, %v613_v25, %v617_v19  ;;  %v626_v36 = vsel %vm606_vm1, %v621_v26, %v625_v21  ;;  %v2424_v40 = vor.u32 %v2423_v30, %v2419_v22  ;;  %v639_v47 = vshll.u32 %v6475_v24, 16  ;;  %v6530_v63 = vld [vmem:[%s6445_s30 + $0x34] ss:$4 sps:$4 sm:$0xff]   ;;  %v6558_v26 = vld [vmem:[%s6445_s30 + $0x48] sm:$0xff]   ;;  %s4733_s12 = sshll.u32 %s7927_s10, 2  ;;  %s4734_s26 = sshll.u32 %s7929_s19, 3 }
  0x1d   : > { %5305 = vmatprep.mubr.msk.bf16.mxu1 %vm835_vm2, %v618_v35  ;;  %v2431_v45 = vor.u32 %v2429_v28, %v2427_v37  ;;  %v633_v49 = vrot.slane %v631_v42, 1  ;;  %v2436_v50 = vshrl.u32 %v6480_v29, 16  ;;  %v2439_v54 = vshll.u32 %v6498_v39, 16  ;;  %v6565_v35 = vld [vmem:[%s6445_s30 + $0x44] ss:$4 sps:$4 sm:$0xff]   ;;  %s6717_s16 = scalar_lea.vmem %s7805_s1, %s4733_s12  ;;  %s7614_s5 = scalar_lea.vmem %s7808_s4, %s4734_s26 }
  0x1e   : > { %5306 = vmatmul.mubr.msk.bf16.vlgmr.msra.gmra.mrb[0].mxu1 %vm835_vm2, %v626_v36  ;;  %v2428_v48 = vsel %vm606_vm1, %v2424_v40, %v2427_v37  ;;  %v641_v53 = vrot.slane %v639_v47, 1  ;;  %v2443_v60 = vshrl.u32 %v6498_v39, 16  ;;  %v2446_v61 = vshll.u32 %v6504_v44, 16  ;;  %v6574_v40 = vld [vmem:[%s6445_s30 + $0x50] sm:$0xff]   ;;  %v6777_v4 = vld [vmem:[%s6445_s30 + $0xa8] sm:$0xff]  }
  0x1f   : > { %5362 = vmatpush3.bf16.msra.mxu1 %v1238_v8  ;;  %5537 = vmatprep.mubr.msk.bf16.mxu0 %vm835_vm2, %v2428_v48  ;;  %v2435_v52 = vsel %vm606_vm1, %v2431_v45, %v2434_v46  ;;  %v634_v55 = vsel %vm606_vm1, %v629_v41, %v633_v49  ;;  %v637_v56 = vor.u32 %v635_v43, %v633_v49  ;;  %v2441_v59 = vrot.slane %v2439_v54, 1  ;;  %v6542_v8 = vld [vmem:[%s6445_s30 + $0x3c] ss:$4 sps:$4 sm:$0xff]  }
  0x20   : > { %6277 = vmatprep.subr.msk.bf16.mxu1 %vm920_vm0, %v6492_v34  ;;  %5538 = vmatmul.mubr.msk.bf16.vlgmr.msra.gmra.mrb[0].mxu0 %vm835_vm2, %v2435_v52  ;;  %v2438_v57 = vor.u32 %v2436_v50, %v2434_v46  ;;  %v643_v62 = vshrl.u32 %v6475_v24, 16  ;;  %v647_v1 = vshll.u32 %v6484_v32, 16  ;;  %v651_v2 = vshrl.u32 %v6484_v32, 16  ;;  %v6578_v46 = vld [vmem:[%s6445_s30 + $0x4c] ss:$4 sps:$4 sm:$0xff]  }
  0x21   : > { %5594 = vmatpush3.bf16.msra.mxu0 %v3192_v10  ;;  %5309 = vmatprep.mubr.msk.bf16.mxu1 %vm835_vm2, %v634_v55  ;;  %v6533_v0 = vsel %vm606_vm1, %v637_v56, %v641_v53  ;;  %v655_v3 = vshll.u32 %v6487_v33, 16  ;;  %v2445_v11 = vor.u32 %v2443_v60, %v2441_v59  ;;  %v2448_v12 = vrot.slane %v2446_v61, 1  ;;  %v6590_v56 = vld [vmem:[%s6445_s30 + $0x58] sm:$0xff]  }
  0x22   : > { %7857 = vst [vmem:[#allocation3_spill] sm:$0xff] %v6533_v0  ;;  %6282 = vmatprep.subr.msk.bf16.mxu0 %vm920_vm0, %v6513_v51  ;;  %v2442_v10 = vsel %vm606_vm1, %v2438_v57, %v2441_v59  ;;  %v645_v13 = vor.u32 %v643_v62, %v641_v53  ;;  %v649_v14 = vrot.slane %v647_v1, 1  ;;  %v2450_v19 = vshrl.u32 %v6504_v44, 16  ;;  %v6593_v57 = vld [vmem:[%s6445_s30 + $0x54] ss:$4 sps:$4 sm:$0xff]  }
  0x23   : > { %5541 = vmatprep.mubr.msk.bf16.mxu0 %vm835_vm2, %v2442_v10  ;;  %v657_v15 = vrot.slane %v655_v3, 1  ;;  %v2449_v18 = vsel %vm606_vm1, %v2445_v11, %v2448_v12  ;;  %v2453_v21 = vshll.u32 %v6530_v63, 16  ;;  %v2457_v25 = vshrl.u32 %v6530_v63, 16  ;;  %v6603_v3 = vld [vmem:[%s6445_s30 + $0x60] sm:$0xff]  }
  0x24   : > { %v6554_v22 = vsel %vm606_vm1, %v645_v13, %v649_v14  ;;  %v653_v23 = vor.u32 %v651_v2, %v649_v14  ;;  %v2452_v27 = vor.u32 %v2450_v19, %v2448_v12  ;;  %v2460_v30 = vshll.u32 %v6542_v8, 16  ;;  %v6613_v14 = vld [vmem:[%s6445_s30 + $0x5c] ss:$4 sps:$4 sm:$0xff]  }
  0x25   : > { %7858 = vst [vmem:[#allocation4_spill] sm:$0xff] %v6554_v22  ;;  %v2455_v28 = vrot.slane %v2453_v21, 1  ;;  %v659_v31 = vshrl.u32 %v6487_v33, 16  ;;  %v663_v37 = vshll.u32 %v6523_v58, 16  ;;  %v671_v38 = vshll.u32 %v6539_v5, 16 }
  0x26   : > { %5310 = vmatmul.mubr.msk.bf16.gmra.mrb[4].mxu1 %vm835_vm2, %v6533_v0  ;;  %v6569_v36 = vsel %vm606_vm1, %v653_v23, %v657_v15  ;;  %v2462_v43 = vrot.slane %v2460_v30, 1  ;;  %v667_v48 = vshrl.u32 %v6523_v58, 16  ;;  %v2464_v50 = vshrl.u32 %v6542_v8, 16 }
  0x27   : > { %5313 = vmatprep.mubr.msk.bf16.mxu1 %vm835_vm2, %v6554_v22  ;;  %7859 = vst [vmem:[#allocation5_spill] sm:$0xff] %v6569_v36  ;;  %v2456_v41 = vsel %vm606_vm1, %v2452_v27, %v2455_v28  ;;  %v2459_v42 = vor.u32 %v2457_v25, %v2455_v28  ;;  %v661_v45 = vor.u32 %v659_v31, %v657_v15  ;;  %v665_v47 = vrot.slane %v663_v37, 1  ;;  %v6623_v27 = vld [vmem:[%s6445_s30 + $0x68] sm:$0xff]  }
  0x28   : > { %5542 = vmatmul.mubr.msk.bf16.gmra.mrb[4].mxu0 %vm835_vm2, %v2449_v18  ;;  %v673_v49 = vrot.slane %v671_v38, 1  ;;  %v2467_v52 = vshll.u32 %v6565_v35, 16  ;;  %v2471_v55 = vshrl.u32 %v6565_v35, 16  ;;  %v2466_v59 = vor.u32 %v2464_v50, %v2462_v43  ;;  %v6630_v38 = vld [vmem:[%s6445_s30 + $0x64] ss:$4 sps:$4 sm:$0xff]  }
  0x29   : > { %5545 = vmatprep.mubr.msk.bf16.mxu0 %vm835_vm2, %v2456_v41  ;;  %v2463_v53 = vsel %vm606_vm1, %v2459_v42, %v2462_v43  ;;  %v6586_v54 = vsel %vm606_vm1, %v661_v45, %v665_v47  ;;  %v2474_v61 = vshll.u32 %v6578_v46, 16  ;;  %v675_v62 = vshrl.u32 %v6539_v5, 16  ;;  %v6635_v43 = vld [vmem:[%s6445_s30 + $0x70] sm:$0xff]  }
  0x2a   : > { %7860 = vst [vmem:[#allocation6_spill] sm:$0xff] %v6586_v54  ;;  %v2469_v60 = vrot.slane %v2467_v52, 1  ;;  %v669_v1 = vor.u32 %v667_v48, %v665_v47  ;;  %v679_v2 = vshll.u32 %v6558_v26, 16  ;;  %v683_v12 = vshrl.u32 %v6558_v26, 16 }
  0x2b   : > { %v677_v11 = vor.u32 %v675_v62, %v673_v49  ;;  %v687_v13 = vshll.u32 %v6574_v40, 16  ;;  %v2476_v15 = vrot.slane %v2474_v61, 1  ;;  %v2478_v21 = vshrl.u32 %v6578_v46, 16 }
  0x2c   : > { %v2470_v10 = vsel %vm606_vm1, %v2466_v59, %v2469_v60  ;;  %v681_v18 = vrot.slane %v679_v2, 1  ;;  %v2473_v19 = vor.u32 %v2471_v55, %v2469_v60  ;;  %v2481_v23 = vshll.u32 %v6593_v57, 16  ;;  %v6649_v55 = vld [vmem:[%s6445_s30 + $0x78] sm:$0xff]  }
  0x2d   : > { %v6620_v25 = vsel %vm606_vm1, %v669_v1, %v673_v49  ;;  %v2480_v30 = vor.u32 %v2478_v21, %v2476_v15  ;;  %v691_v37 = vshrl.u32 %v6574_v40, 16  ;;  %v2488_v41 = vshll.u32 %v6613_v14, 16 }
  0x2e   : > { %5314 = vmatmul.mubr.msk.bf16.gmra.mrb[8].mxu1 %vm835_vm2, %v6569_v36  ;;  %7861 = vst [vmem:[#allocation7_spill] sm:$0xff] %v6620_v25  ;;  %v6626_v28 = vsel %vm606_vm1, %v677_v11, %v681_v18  ;;  %v2483_v31 = vrot.slane %v2481_v23, 1  ;;  %v695_v42 = vshll.u32 %v6590_v56, 16  ;;  %v2477_v45 = vsel %vm606_vm1, %v2473_v19, %v2476_v15  ;;  %v6667_v15 = vld [vmem:[%s6445_s30 + $0x74] ss:$4 sps:$4 sm:$0xff]  }
  0x2f   : > { %5317 = vmatprep.mubr.msk.bf16.mxu1 %vm835_vm2, %v6586_v54  ;;  %7862 = vst [vmem:[#allocation8_spill] sm:$0xff] %v6626_v28  ;;  %v685_v47 = vor.u32 %v683_v12, %v681_v18  ;;  %v689_v48 = vrot.slane %v687_v13, 1  ;;  %v2485_v49 = vshrl.u32 %v6593_v57, 16  ;;  %v2492_v60 = vshrl.u32 %v6613_v14, 16  ;;  %7865 = vst [vmem:[#allocation10_spill] sm:$0xff] %v6667_v15  ;;  %v6670_v18 = vld [vmem:[%s6445_s30 + $0x80] sm:$0xff]  }
  0x30   : > { %5546 = vmatmul.mubr.msk.bf16.gmra.mrb[8].mxu0 %vm835_vm2, %v2463_v53  ;;  %v2484_v50 = vsel %vm606_vm1, %v2480_v30, %v2483_v31  ;;  %v697_v52 = vrot.slane %v695_v42, 1  ;;  %v6646_v53 = vld [vmem:[%s6445_s30 + $0x6c] ss:$4 sps:$4 sm:$0xff]   ;;  %v2495_v61 = vshll.u32 %v6630_v38, 16  ;;  %v2490_v62 = vrot.slane %v2488_v41, 1 }
  0x31   : > { %5549 = vmatprep.mubr.msk.bf16.mxu0 %vm835_vm2, %v2470_v10  ;;  %v693_v59 = vor.u32 %v691_v37, %v689_v48  ;;  %v703_v1 = vshll.u32 %v6603_v3, 16  ;;  %v2487_v2 = vor.u32 %v2485_v49, %v2483_v31  ;;  %v699_v10 = vshrl.u32 %v6590_v56, 16 }
  0x32   : > { %v6664_v11 = vsel %vm606_vm1, %v685_v47, %v689_v48  ;;  %v2494_v12 = vor.u32 %v2492_v60, %v2490_v62  ;;  %v2497_v13 = vrot.slane %v2495_v61, 1  ;;  %v707_v21 = vshrl.u32 %v6603_v3, 16  ;;  %v6695_v61 = vld [vmem:[%s6445_s30 + $0x7c] ss:$4 sps:$4 sm:$0xff]  }
  0x33   : > { %7864 = vst [vmem:[#allocation9_spill] sm:$0xff] %v6664_v11  ;;  %v6673_v19 = vsel %vm606_vm1, %v693_v59, %v697_v52  ;;  %v711_v23 = vshll.u32 %v6623_v27, 16  ;;  %v705_v30 = vrot.slane %v703_v1, 1  ;;  %v2502_v31 = vshll.u32 %v6646_v53, 16 }
  0x34   : > { %7866 = vst [vmem:[#allocation11_spill] sm:$0xff] %v6673_v19  ;;  %v2491_v37 = vsel %vm606_vm1, %v2487_v2, %v2490_v62  ;;  %v701_v41 = vor.u32 %v699_v10, %v697_v52  ;;  %v2499_v42 = vshrl.u32 %v6630_v38, 16  ;;  %v2506_v47 = vshrl.u32 %v6646_v53, 16 }
  0x35   : > { %v2509_v48 = vshll.u32 %v6667_v15, 16  ;;  %v709_v49 = vor.u32 %v707_v21, %v705_v30  ;;  %v2504_v59 = vrot.slane %v2502_v31, 1  ;;  %v719_v60 = vshll.u32 %v6635_v43, 16 }
  0x36   : > { %5318 = vmatmul.mubr.msk.bf16.gmra.mrb[12].mxu1 %vm835_vm2, %v6620_v25  ;;  %v2501_v52 = vor.u32 %v2499_v42, %v2497_v13  ;;  %v6698_v62 = vsel %vm606_vm1, %v701_v41, %v705_v30  ;;  %v715_v1 = vshrl.u32 %v6623_v27, 16  ;;  %v723_v21 = vshrl.u32 %v6635_v43, 16  ;;  %v6862_v25 = vld [vmem:[%s6445_s30 + $0xd8] sm:$0xff]  }
  0x37   : > { %5321 = vmatprep.mubr.msk.bf16.mxu1 %vm835_vm2, %v6626_v28  ;;  %7867 = vst [vmem:[#allocation12_spill] sm:$0xff] %v6698_v62  ;;  %v2508_v2 = vor.u32 %v2506_v47, %v2504_v59  ;;  %v2511_v10 = vrot.slane %v2509_v48, 1  ;;  %v721_v30 = vrot.slane %v719_v60, 1  ;;  %v2513_v31 = vshrl.u32 %v6667_v15, 16  ;;  %v6720_v48 = vld [vmem:[%s6445_s30 + $0x88] sm:$0xff]  }
  0x38   : > { %5550 = vmatmul.mubr.msk.bf16.gmra.mrb[12].mxu0 %vm835_vm2, %v2477_v45  ;;  %v2498_v45 = vsel %vm606_vm1, %v2494_v12, %v2497_v13  ;;  %v2505_v13 = vsel %vm606_vm1, %v2501_v52, %v2504_v59  ;;  %v731_v60 = vshrl.u32 %v6649_v55, 16  ;;  %v6857_v28 = vld [vmem:[%s6445_s30 + $0xcc] ss:$4 sps:$4 sm:$0xff]  }
  0x39   : > { %5553 = vmatprep.mubr.msk.bf16.mxu0 %vm835_vm2, %v2484_v50  ;;  %v713_v50 = vrot.slane %v711_v23, 1  ;;  %v727_v23 = vshll.u32 %v6649_v55, 16  ;;  %v2512_v42 = vsel %vm606_vm1, %v2508_v2, %v2511_v10  ;;  %v3051_v2 = vrot.slane %v6470_v20, 1  ;;  %7885 = vst [vmem:[#allocation30_spill] sm:$0xff] %v6857_v28 }
  0x3b   : > { %v6702_v12 = vsel %vm606_vm1, %v709_v49, %v713_v50  ;;  %v717_v41 = vor.u32 %v715_v1, %v713_v50  ;;  %v729_v47 = vrot.slane %v727_v23, 1  ;;  %v2515_v49 = vor.u32 %v2513_v31, %v2511_v10  ;;  %v6743_v31 = vld [vmem:[%s6445_s30 + $0x90] sm:$0xff]  }
  0x3c   : > { %7868 = vst [vmem:[#allocation13_spill] sm:$0xff] %v6702_v12  ;;  %v735_v50 = vshll.u32 %v6670_v18, 16  ;;  %v3050_v1 = vrot.slane %v6467_v17, 1  ;;  %v739_v10 = vshrl.u32 %v6670_v18, 16  ;;  %v743_v23 = vshll.u32 %v6720_v48, 16 }
  0x3d   : > { %v6728_v52 = vsel %vm606_vm1, %v717_v41, %v721_v30  ;;  %v733_v17 = vor.u32 %v731_v60, %v729_v47  ;;  %v3055_v60 = vrot.slane %v6498_v39, 1  ;;  %v3522_v39 = vsel %vm920_vm0, %v6513_v51, 0 }
  0x3e   : > { %5322 = vmatmul.mubr.msk.bf16.gmra.mrb[16].mxu1 %vm835_vm2, %v6664_v11  ;;  %7870 = vst [vmem:[#allocation15_spill] sm:$0xff] %v6728_v52  ;;  %v3052_v20 = vsel %vm1528_vm3, %v3050_v1, %v3051_v2  ;;  %v745_v41 = vrot.slane %v743_v23, 1  ;;  %v3057_v51 = vrot.slane %v6504_v44, 1 }
  0x3f   : > { %5325 = vmatprep.mubr.msk.bf16.mxu1 %vm835_vm2, %v6673_v19  ;;  %v6843_v19 = vld [vmem:[%s6445_s30 + $0xc8] sm:$0xff]  }
  0x40   : > { %5554 = vmatmul.mubr.msk.bf16.gmra.mrb[16].mxu0 %vm835_vm2, %v2491_v37  ;;  %v2516_v37 = vshll.u32 %v6695_v61, 16 }
  0x41   : > { %5557 = vmatprep.mubr.msk.bf16.mxu0 %vm835_vm2, %v2498_v45  ;;  %v725_v45 = vor.u32 %v723_v21, %v721_v30  ;;  %v737_v30 = vrot.slane %v735_v50, 1 }
  0x42   : > { %v6724_v59 = vrot.slane %v2516_v37, 1 }
  0x43   : > { %v6734_v21 = vsel %vm606_vm1, %v725_v45, %v729_v47  ;;  %v741_v37 = vor.u32 %v739_v10, %v737_v30  ;;  %v3053_v45 = vrot.slane %v6480_v29, 1  ;;  %v6756_v50 = vsel %vm606_vm1, %v733_v17, %v737_v30  ;;  %v6769_v30 = vld [vmem:[%s6445_s30 + $0xa0] sm:$0xff]  }
  0x44   : > { %7869 = vst [vmem:[#allocation14_spill] sm:$0xff] %v6724_v59  ;;  %7871 = vst [vmem:[#allocation16_spill] sm:$0xff] %v6734_v21  ;;  %v747_v47 = vshrl.u32 %v6720_v48, 16  ;;  %v755_v10 = vshrl.u32 %v6743_v31, 16  ;;  %v771_v44 = vshrl.u32 %v6769_v30, 16 }
  0x45   : > { %7872 = vst [vmem:[#allocation17_spill] sm:$0xff] %v6756_v50  ;;  %v6761_v1 = vsel %vm606_vm1, %v741_v37, %v745_v41  ;;  %v3054_v29 = vsel %vm1528_vm3, %v3051_v2, %v3053_v45  ;;  %v6782_v2 = vld [vmem:[%s7806_s2 + $0x1c] sm:$0xf] }
  0x46   : > { %5326 = vmatmul.mubr.msk.bf16.gmra.mrb[20].mxu1 %vm835_vm2, %v6698_v62  ;;  %7873 = vst [vmem:[#allocation18_spill] sm:$0xff] %v6761_v1  ;;  %v749_v17 = vor.u32 %v747_v47, %v745_v41  ;;  %v6793_v47 = vld [vmem:[%s6445_s30 + $0x8c] ss:$4 sps:$4 sm:$0xff]   ;;  %v3061_v62 = vrot.slane %v6542_v8, 1 }
  0x47   : > { %5329 = vmatprep.mubr.msk.bf16.mxu1 %vm835_vm2, %v6702_v12  ;;  %v6831_v12 = vld [vmem:[%s6445_s30 + $0xb4] ss:$4 sps:$4 sm:$0xff]  }
  0x48   : > { %5558 = vmatmul.mubr.msk.bf16.gmra.mrb[20].mxu0 %vm835_vm2, %v2505_v13  ;;  %v2519_v13 = vsel %vm606_vm1, %v2515_v49, %v6724_v59  ;;  %v751_v49 = vshll.u32 %v6743_v31, 16  ;;  %7881 = vst [vmem:[#allocation26_spill] sm:$0xff] %v6831_v12 }
  0x49   : > { %5561 = vmatprep.mubr.msk.bf16.mxu0 %vm835_vm2, %v2512_v42  ;;  %v6749_v42 = vld [vmem:[%s6445_s30 + $0x98] sm:$0xff]  }
  0x4a   : > { %v759_v23 = vshll.u32 %v6749_v42, 16  ;;  %v763_v41 = vshrl.u32 %v6749_v42, 16 }
  0x4c   : > { %v761_v59 = vrot.slane %v759_v23, 1  ;;  %v3059_v23 = vrot.slane %v6530_v63, 1  ;;  %v3058_v63 = vsel %vm1528_vm3, %v3055_v60, %v3057_v51 }
  0x4e   : > { %5330 = vmatmul.mubr.msk.bf16.gmra.mrb[24].mxu1 %vm835_vm2, %v6728_v52  ;;  %v3060_v52 = vsel %vm1528_vm3, %v3057_v51, %v3059_v23  ;;  %v6846_v51 = vld [vmem:[%s6445_s30 + $0xc4] ss:$4 sps:$4 sm:$0xff]  }
  0x4f   : > { %5333 = vmatprep.mubr.msk.bf16.mxu1 %vm835_vm2, %v6734_v21  ;;  %v6819_v21 = vld [vmem:[%s6445_s30 + $0xb0] sm:$0xff]   ;;  %7883 = vst [vmem:[#allocation28_spill] sm:$0xff] %v6846_v51 }
  0x50   : > { %5562 = vmatmul.mubr.msk.bf16.gmra.mrb[24].mxu0 %vm835_vm2, %v2519_v13  ;;  %v753_v13 = vrot.slane %v751_v49, 1  ;;  %v6787_v49 = vld [vmem:[%s6445_s30 + $0x84] ss:$4 sps:$4 sm:$0xff]   ;;  %7879 = vst [vmem:[#allocation24_spill] sm:$0xff] %v6819_v21  ;;  %v787_v8 = vshrl.u32 %v6819_v21, 16 }
  0x51   : > { %5595 = vmatprep.mubr.msk.bf16.mxu0 %vm835_vm2, %v3052_v20  ;;  %v3056_v20 = vsel %vm1528_vm3, %v3053_v45, %v3055_v60  ;;  %v767_v45 = vshll.u32 %v6769_v30, 16  ;;  %v6828_v60 = vld [vmem:[%s6445_s30 + $0xb8] sm:$0xff]  }
  0x52   : > { %v757_v37 = vor.u32 %v755_v10, %v753_v13  ;;  %v6796_v10 = vsel %vm606_vm1, %v749_v17, %v753_v13  ;;  %v6810_v13 = vld [vmem:[%s6445_s30 + $0x9c] ss:$4 sps:$4 sm:$0xff]   ;;  %v6814_v17 = vld [vmem:[%s6445_s30 + $0xa4] ss:$4 sps:$4 sm:$0xff]  }
  0x53   : > { %7874 = vst [vmem:[#allocation19_spill] sm:$0xff] %v6796_v10  ;;  %7877 = vst [vmem:[#allocation22_spill] sm:$0xff] %v6810_v13 }
  0x54   : > { %7878 = vst [vmem:[#allocation23_spill] sm:$0xff] %v6814_v17 }
  0x56   : > { %5334 = vmatmul.mubr.msk.bf16.gmra.mrb[28].mxu1 %vm835_vm2, %v6756_v50  ;;  %v769_v50 = vrot.slane %v767_v45, 1  ;;  %v6837_v45 = vld [vmem:[%s6445_s30 + $0xbc] ss:$4 sps:$4 sm:$0xff]  }
  0x57   : > { %5337 = vmatprep.mubr.msk.bf16.mxu1 %vm835_vm2, %v6761_v1  ;;  %v765_v1 = vor.u32 %v763_v41, %v761_v59  ;;  %v6834_v41 = vld [vmem:[%s6445_s30 + $0xc0] sm:$0xff]   ;;  %7882 = vst [vmem:[#allocation27_spill] sm:$0xff] %v6837_v45 }
  0x58   : > { %5596 = vmatmul.mubr.msk.bf16.vlgmr.msra.gmra.mrb[0].mxu0 %vm835_vm2, %v3054_v29  ;;  %v6801_v29 = vld [vmem:[%s6445_s30 + $0x94] ss:$4 sps:$4 sm:$0xff]  }
  0x59   : > { %5652 = vmatpush3.bf16.msra.mxu0 %v3522_v39  ;;  %5599 = vmatprep.mubr.msk.bf16.mxu0 %vm835_vm2, %v3056_v20  ;;  %7875 = vst [vmem:[#allocation20_spill] sm:$0xff] %v6801_v29  ;;  %v6806_v39 = vsel %vm606_vm1, %v757_v37, %v761_v59  ;;  %v775_v20 = vshll.u32 %v6777_v4, 16  ;;  %v6822_v37 = vld [vmem:[%s6445_s30 + $0xac] ss:$4 sps:$4 sm:$0xff]   ;;  %v6849_v11 = vsel %vm606_vm1, %v765_v1, %v769_v50 }
  0x5a   : > { %6283 = vmatprep.subr.msk.bf16.mxu0 %vm920_vm0, %v6782_v2  ;;  %7876 = vst [vmem:[#allocation21_spill] sm:$0xff] %v6806_v39  ;;  %7880 = vst [vmem:[#allocation25_spill] sm:$0xff] %v6822_v37 }
  0x5b   : > { %v777_v59 = vrot.slane %v775_v20, 1  ;;  %7884 = vst [vmem:[#allocation29_spill] sm:$0xff] %v6849_v11  ;;  %v6854_v20 = vld [vmem:[%s6445_s30 + $0xd0] sm:$0xff]  }
  0x5e   : > { %5338 = vmatmul.mubr.msk.bf16.gmra.mrb[32].mxu1 %vm835_vm2, %v6796_v10  ;;  %v773_v10 = vor.u32 %v771_v44, %v769_v50  ;;  %v783_v44 = vshll.u32 %v6819_v21, 16  ;;  %v791_v50 = vshll.u32 %v6828_v60, 16  ;;  %v799_v21 = vshll.u32 %v6834_v41, 16 }
  0x5f   : > { %5341 = vmatprep.mubr.msk.bf16.mxu1 %vm835_vm2, %v6806_v39  ;;  %v779_v39 = vshrl.u32 %v6777_v4, 16 }
  0x60   : > { %5600 = vmatmul.mubr.msk.bf16.gmra.mrb[4].mxu0 %vm835_vm2, %v3058_v63  ;;  %v3063_v63 = vrot.slane %v6565_v35, 1  ;;  %v6865_v54 = vsel %vm606_vm1, %v773_v10, %v777_v59  ;;  %v785_v1 = vrot.slane %v783_v44, 1  ;;  %v793_v0 = vrot.slane %v791_v50, 1 }
  0x61   : > { %5603 = vmatprep.mubr.msk.bf16.mxu0 %vm835_vm2, %v3060_v52  ;;  %v3062_v52 = vsel %vm1528_vm3, %v3059_v23, %v3061_v62  ;;  %v781_v36 = vor.u32 %v779_v39, %v777_v59  ;;  %v3065_v10 = vrot.slane %v6578_v46, 1  ;;  %v795_v23 = vshrl.u32 %v6828_v60, 16 }
  0x62   : > { %v3064_v35 = vsel %vm1528_vm3, %v3061_v62, %v3063_v63  ;;  %v789_v22 = vor.u32 %v787_v8, %v785_v1  ;;  %v3067_v44 = vrot.slane %v6593_v57, 1  ;;  %v803_v62 = vshrl.u32 %v6834_v41, 16 }
  0x63   : > { %v807_v59 = vshll.u32 %v6843_v19, 16  ;;  %v3066_v46 = vsel %vm1528_vm3, %v3063_v63, %v3065_v10  ;;  %v801_v8 = vrot.slane %v799_v21, 1  ;;  %v815_v63 = vshll.u32 %v6854_v20, 16 }
  0x64   : > { %v6884_v39 = vsel %vm606_vm1, %v789_v22, %v793_v0  ;;  %v3068_v57 = vsel %vm1528_vm3, %v3065_v10, %v3067_v44  ;;  %v819_v10 = vshrl.u32 %v6854_v20, 16 }
  0x65   : > { %v805_v50 = vor.u32 %v803_v62, %v801_v8  ;;  %v809_v22 = vrot.slane %v807_v59, 1  ;;  %v6909_v62 = vld [vmem:[%s6717_s16] sm:$0xf] }
  0x66   : > { %5342 = vmatmul.mubr.msk.bf16.gmra.mrb[36].mxu1 %vm835_vm2, %v6849_v11  ;;  %v6879_v11 = vsel %vm606_vm1, %v781_v36, %v785_v1  ;;  %v797_v36 = vor.u32 %v795_v23, %v793_v0  ;;  %v811_v1 = vshrl.u32 %v6843_v19, 16  ;;  %v823_v23 = vshll.u32 %v6862_v25, 16 }
  0x67   : > { %5345 = vmatprep.mubr.msk.bf16.mxu1 %vm835_vm2, %v6865_v54  ;;  %v6904_v0 = vsel %vm606_vm1, %v805_v50, %v809_v22  ;;  %v7831_v50 = vrot.slane %v6451_v7, 1 }
  0x68   : > { %5604 = vmatmul.mubr.msk.bf16.gmra.mrb[8].mxu0 %vm835_vm2, %v3062_v52  ;;  %v3069_v52 = vrot.slane %v6613_v14, 1  ;;  %v6900_v21 = vsel %vm606_vm1, %v797_v36, %v801_v8  ;;  %v813_v59 = vor.u32 %v811_v1, %v809_v22  ;;  %v6919_v8 = vcombine.low %v6909_v62, %v6909_v62 }
  0x69   : > { %5607 = vmatprep.mubr.msk.bf16.mxu0 %vm835_vm2, %v3064_v35  ;;  %7886 = vst [vmem:[#allocation31_spill] sm:$0xff] %v6900_v21  ;;  %v3071_v35 = vrot.slane %v6630_v38, 1  ;;  %v3073_v22 = vrot.slane %v6646_v53, 1 }
  0x6a   : > { %v3070_v14 = vsel %vm1528_vm3, %v3067_v44, %v3069_v52  ;;  %v831_v1 = vshll.u32 %v6919_v8, 16 }
  0x6b   : > { %v3072_v38 = vsel %vm1528_vm3, %v3069_v52, %v3071_v35  ;;  %v827_v52 = vshrl.u32 %v6862_v25, 16 }
  0x6e   : > { %5346 = vmatmul.mubr.msk.bf16.gmra.mrb[40].mxu1 %vm835_vm2, %v6879_v11 }
  0x6f   : > { %5349 = vmatprep.mubr.msk.bf16.mxu1 %vm835_vm2, %v6884_v39 }
  0x70   : > { %5608 = vmatmul.mubr.msk.bf16.gmra.mrb[12].mxu0 %vm835_vm2, %v3066_v46  ;;  %v817_v46 = vrot.slane %v815_v63, 1  ;;  %v3075_v63 = vrot.slane %v6667_v15, 1  ;;  %v3079_v15 = vrot.slane %v6787_v49, 1 }
  0x71   : > { %5611 = vmatprep.mubr.msk.bf16.mxu0 %vm835_vm2, %v3068_v57  ;;  %v825_v57 = vrot.slane %v823_v23, 1 }
  0x72   : > { %v821_v36 = vor.u32 %v819_v10, %v817_v46  ;;  %v6925_v44 = vsel %vm606_vm1, %v813_v59, %v817_v46  ;;  %v833_v59 = vrot.slane %v831_v1, 1  ;;  %v3076_v46 = vsel %vm1528_vm3, %v3073_v22, %v3075_v63 }
  0x73   : > { %v6945_v53 = vor.u32 %v827_v52, %v825_v57 }
  0x74   : > { %v6938_v23 = vsel %vm606_vm1, %v821_v36, %v825_v57  ;;  %v1536_v36 = vrot.slane %v6475_v24, 1 }
  0x76   : > { %5350 = vmatmul.mubr.msk.bf16.gmra.mrb[44].mxu1 %vm835_vm2, %v6900_v21  ;;  %v1532_v21 = vrot.slane %v6455_v9, 1 }
  0x77   : > { %5353 = vmatprep.mubr.msk.bf16.mxu1 %vm835_vm2, %v6904_v0 }
  0x78   : > { %5612 = vmatmul.mubr.msk.bf16.gmra.mrb[16].mxu0 %vm835_vm2, %v3070_v14  ;;  %v6935_v10 = vsel %vm1528_vm3, %v7831_v50, %v1532_v21  ;;  %v3074_v14 = vsel %vm1528_vm3, %v3071_v35, %v3073_v22  ;;  %v3077_v50 = vrot.slane %v6695_v61, 1  ;;  %v834_v35 = vsel %vm606_vm1, %v6945_v53, %v833_v59 }
  0x79   : > { %5615 = vmatprep.mubr.msk.bf16.mxu0 %vm835_vm2, %v3072_v38  ;;  %v1534_v38 = vrot.slane %v6464_v16, 1  ;;  %v1540_v59 = vrot.slane %v6487_v33, 1 }
  0x7a   : > { %v3078_v52 = vsel %vm1528_vm3, %v3075_v63, %v3077_v50  ;;  %v3080_v1 = vsel %vm1528_vm3, %v3077_v50, %v3079_v15  ;;  %v6984_v50 = vld [vmem:[%s7806_s2 + $0xc] sm:$0xf] }
  0x7b   : > { %v6957_v57 = vsel %vm1528_vm3, %v1532_v21, %v1534_v38  ;;  %v6960_v22 = vsel %vm1528_vm3, %v1534_v38, %v1536_v36  ;;  %v3081_v21 = vrot.slane %v6793_v47, 1 }
  0x7e   : > { %5354 = vmatmul.mubr.msk.bf16.gmra.mrb[48].mxu1 %vm835_vm2, %v6925_v44 }
  0x7f   : > { %5357 = vmatprep.mubr.msk.bf16.mxu1 %vm835_vm2, %v6938_v23 }
  0x80   : > { %5616 = vmatmul.mubr.msk.bf16.gmra.mrb[20].mxu0 %vm835_vm2, %v3074_v14  ;;  %v1538_v14 = vrot.slane %v6484_v32, 1 }
  0x81   : > { %5619 = vmatprep.mubr.msk.bf16.mxu0 %vm835_vm2, %v3076_v46  ;;  %v3083_v46 = vrot.slane %v6801_v29, 1  ;;  %v1578_v29 = vrot.slane %v6843_v19, 1 }
  0x82   : > { %v6974_v38 = vsel %vm1528_vm3, %v1536_v36, %v1538_v14  ;;  %v6977_v63 = vsel %vm1528_vm3, %v1538_v14, %v1540_v59 }
  0x83   : > { %v3084_v36 = vsel %vm1528_vm3, %v3081_v21, %v3083_v46 }
  0x86   : > { %5358 = vmatmul.mubr.msk.bf16.gmra.mrb[52].mxu1 %vm835_vm2, %v834_v35  ;;  %v3082_v35 = vsel %vm1528_vm3, %v3079_v15, %v3081_v21  ;;  %v3087_v15 = vrot.slane %v6814_v17, 1 }
  0x87   : > { %5363 = vmatprep.mubr.msk.bf16.mxu1 %vm835_vm2, %v6448_v6  ;;  %v1671_v6 = vsel %vm920_vm0, %v6492_v34, 0  ;;  %v1542_v34 = vrot.slane %v6523_v58, 1 }
  0x88   : > { %5620 = vmatmul.mubr.msk.bf16.gmra.mrb[24].mxu0 %vm835_vm2, %v3078_v52  ;;  %v1544_v52 = vrot.slane %v6539_v5, 1 }
  0x89   : > { %5623 = vmatprep.mubr.msk.bf16.mxu0 %vm835_vm2, %v3080_v1  ;;  %v3085_v1 = vrot.slane %v6810_v13, 1  ;;  %v7001_v14 = vsel %vm1528_vm3, %v1540_v59, %v1542_v34  ;;  %v1548_v59 = vrot.slane %v6574_v40, 1 }
  0x8b   : > { %v3086_v21 = vsel %vm1528_vm3, %v3083_v46, %v3085_v1 }
  0x8e   : > { %5364 = vmatmul.mubr.msk.bf16.vlgmr.msra.gmra.mrb[0].mxu1 %vm835_vm2, %v6451_v7 }
  0x8f   : > { %5420 = vmatpush3.bf16.msra.mxu1 %v1671_v6  ;;  %5367 = vmatprep.mubr.msk.bf16.mxu1 %vm835_vm2, %v6455_v9  ;;  %v7004_v9 = vsel %vm1528_vm3, %v1542_v34, %v1544_v52  ;;  %v3088_v6 = vsel %vm1528_vm3, %v3085_v1, %v3087_v15 }
  0x90   : > { %6278 = vmatprep.subr.msk.bf16.mxu1 %vm920_vm0, %v6984_v50  ;;  %5624 = vmatmul.mubr.msk.bf16.gmra.mrb[28].mxu0 %vm835_vm2, %v3082_v35  ;;  %v1546_v35 = vrot.slane %v6558_v26, 1 }
  0x91   : > { %5627 = vmatprep.mubr.msk.bf16.mxu0 %vm835_vm2, %v3084_v36  ;;  %v3089_v36 = vrot.slane %v6822_v37, 1 }
  0x92   : > { %v7019_v46 = vsel %vm1528_vm3, %v1544_v52, %v1546_v35  ;;  %v1550_v52 = vrot.slane %v6590_v56, 1 }
  0x93   : > { %v3090_v34 = vsel %vm1528_vm3, %v3087_v15, %v3089_v36 }
  0x94   : > { %v7038_v15 = vsel %vm1528_vm3, %v1548_v59, %v1550_v52 }
  0x96   : > { %5368 = vmatmul.mubr.msk.bf16.gmra.mrb[4].mxu1 %vm835_vm2, %v6464_v16  ;;  %v3091_v16 = vrot.slane %v6831_v12, 1  ;;  %v317_v12 = vld [vmem:[%s6717_s16 + $0xc] sm:$0xf] }
  0x97   : > { %5371 = vmatprep.mubr.msk.bf16.mxu1 %vm835_vm2, %v6475_v24  ;;  %v7022_v24 = vsel %vm1528_vm3, %v1546_v35, %v1548_v59  ;;  %v315_v35 = vld [vmem:[%s6717_s16 + $0x4] sm:$0xf] }
  0x98   : > { %5628 = vmatmul.mubr.msk.bf16.gmra.mrb[32].mxu0 %vm835_vm2, %v3086_v21  ;;  %v3092_v1 = vsel %vm1528_vm3, %v3089_v36, %v3091_v16  ;;  %v1552_v21 = vrot.slane %v6603_v3, 1  ;;  %v316_v36 = vld [vmem:[%s6717_s16 + $0x8] sm:$0xf] }
  0x99   : > { %5631 = vmatprep.mubr.msk.bf16.mxu0 %vm835_vm2, %v3088_v6  ;;  %v3093_v6 = vrot.slane %v6837_v45, 1  ;;  %v7052_v45 = vld [vmem:[%s6445_s30 + $0xd4] ss:$4 sps:$4 sm:$0xff]  }
  0x9a   : > { %7887 = vst [vmem:[#allocation32_spill] sm:$0xff] %v7052_v45 }
  0x9e   : > { %5372 = vmatmul.mubr.msk.bf16.gmra.mrb[8].mxu1 %vm835_vm2, %v6484_v32  ;;  %v3095_v32 = vrot.slane %v6846_v51, 1  ;;  %v7057_v51 = vcombine.low %v316_v36, %v317_v12 }
  0x9f   : > { %5375 = vmatprep.mubr.msk.bf16.mxu1 %vm835_vm2, %v6487_v33  ;;  %v7041_v33 = vsel %vm1528_vm3, %v1550_v52, %v1552_v21  ;;  %v1554_v52 = vrot.slane %v6623_v27, 1 }
  0xa0   : > { %5632 = vmatmul.mubr.msk.bf16.gmra.mrb[36].mxu0 %vm835_vm2, %v3090_v34  ;;  %v7046_v34 = vcombine.low %v6909_v62, %v315_v35  ;;  %v3096_v59 = vsel %vm1528_vm3, %v3093_v6, %v3095_v32  ;;  %v1556_v62 = vrot.slane %v6635_v43, 1  ;;  %v566_v35 = vunpack.c.h.bf16 %v6862_v25 }
  0xa1   : > { %5635 = vmatprep.mubr.msk.bf16.mxu0 %vm835_vm2, %v3092_v1  ;;  %v3094_v1 = vsel %vm1528_vm3, %v3091_v16, %v3093_v6  ;;  %v3099_v16 = vrot.slane %v7052_v45, 1  ;;  %v569_v36 = vunpack.c.l.bf16 %v7057_v51 }
  0xa2   : > { %v568_v6 = vunpack.c.h.bf16 %v7046_v34  ;;  %v7073_v37 = vsel %vm1528_vm3, %v1554_v52, %v1556_v62 }
  0xa4   : > { %v7083_v17 = vpack.c.bf16 %v569_v36, %v568_v6  ;;  %v7100_v6 = vcombine.low %v317_v12, %v317_v12  ;;  %v1562_v36 = vrot.slane %v6720_v48, 1 }
  0xa6   : > { %5376 = vmatmul.mubr.msk.bf16.gmra.mrb[12].mxu1 %vm835_vm2, %v6523_v58  ;;  %v3097_v58 = vrot.slane %v6857_v28, 1  ;;  %7889 = vst [vmem:[#allocation34_spill] sm:$0xff] %v7083_v17  ;;  %7890 = vst [vmem:[#allocation35_spill] sm:$0xff] %v7100_v6 }
  0xa7   : > { %5379 = vmatprep.mubr.msk.bf16.mxu1 %vm835_vm2, %v6539_v5  ;;  %v567_v5 = vunpack.c.l.bf16 %v7046_v34 }
  0xa8   : > { %5636 = vmatmul.mubr.msk.bf16.gmra.mrb[40].mxu0 %vm835_vm2, %v3094_v1  ;;  %v7070_v1 = vsel %vm1528_vm3, %v1552_v21, %v1554_v52  ;;  %v3100_v28 = vsel %vm1528_vm3, %v3097_v58, %v3099_v16  ;;  %v1558_v21 = vrot.slane %v6649_v55, 1  ;;  %v1560_v52 = vrot.slane %v6670_v18, 1 }
  0xa9   : > { %5639 = vmatprep.mubr.msk.bf16.mxu0 %vm835_vm2, %v3096_v59  ;;  %v3098_v59 = vsel %vm1528_vm3, %v3095_v32, %v3097_v58  ;;  %v7078_v45 = vpack.c.bf16 %v567_v5, %v566_v35  ;;  %v3103_v32 = vrot.slane %v7083_v17, 1 }
  0xaa   : > { %v7092_v35 = vsel %vm1528_vm3, %v1556_v62, %v1558_v21  ;;  %v7095_v5 = vsel %vm1528_vm3, %v1558_v21, %v1560_v52  ;;  %v3105_v62 = vrot.slane %v7100_v6, 1  ;;  %v1566_v21 = vrot.slane %v6749_v42, 1  ;;  %v6355_v6 = vld [vmem:[%s6445_s30 + $0x28] sm:$0xff]  }
  0xab   : > { %7888 = vst [vmem:[#allocation33_spill] sm:$0xff] %v7078_v45  ;;  %v3101_v13 = vrot.slane %v7078_v45, 1  ;;  %v6357_v45 = vld [vmem:[%s6445_s30 + $0x38] sm:$0xff]  }
  0xad   : > { %v3102_v58 = vsel %vm1528_vm3, %v3099_v16, %v3101_v13  ;;  %v7111_v16 = vsel %vm1528_vm3, %v1560_v52, %v1562_v36  ;;  %v1568_v52 = vrot.slane %v6769_v30, 1 }
  0xae   : > { %5380 = vmatmul.mubr.msk.bf16.gmra.mrb[16].mxu1 %vm835_vm2, %v6558_v26 }
  0xaf   : > { %5383 = vmatprep.mubr.msk.bf16.mxu1 %vm835_vm2, %v6574_v40 }
  0xb0   : > { %5640 = vmatmul.mubr.msk.bf16.gmra.mrb[44].mxu0 %vm835_vm2, %v3098_v59  ;;  %v1564_v59 = vrot.slane %v6743_v31, 1 }
  0xb1   : > { %5643 = vmatprep.mubr.msk.bf16.mxu0 %vm835_vm2, %v3100_v28  ;;  %v3104_v28 = vsel %vm1528_vm3, %v3101_v13, %v3103_v32  ;;  %v3106_v13 = vsel %vm1528_vm3, %v3103_v32, %v3105_v62  ;;  %v3879_v32 = vsel %vm920_vm0, %v6782_v2, 0  ;;  %v7141_v62 = vld [vmem:[%s7806_s2 + $0x20] sm:$0xf] }
  0xb2   : > { %v7114_v12 = vsel %vm1528_vm3, %v1562_v36, %v1564_v59  ;;  %v7130_v36 = vsel %vm1528_vm3, %v1566_v21, %v1568_v52 }
  0xb6   : > { %5384 = vmatmul.mubr.msk.bf16.gmra.mrb[20].mxu1 %vm835_vm2, %v6590_v56 }
  0xb7   : > { %5387 = vmatprep.mubr.msk.bf16.mxu1 %vm835_vm2, %v6603_v3 }
  0xb8   : > { %5644 = vmatmul.mubr.msk.bf16.gmra.mrb[48].mxu0 %vm835_vm2, %v3102_v58  ;;  %v6353_v58 = vld [vmem:[%s6445_s30 + $0x18] sm:$0xff]  }
  0xb9   : > { %5647 = vmatprep.mubr.msk.bf16.mxu0 %vm835_vm2, %v3104_v28  ;;  %v7127_v28 = vsel %vm1528_vm3, %v1564_v59, %v1566_v21  ;;  %v6354_v59 = vld [vmem:[%s6445_s30 + $0x20] sm:$0xff]   ;;  %v7891_v21 = vld [vmem:[#allocation24_spill] sm:$0xff] }
  0xbe   : > { %5388 = vmatmul.mubr.msk.bf16.gmra.mrb[24].mxu1 %vm835_vm2, %v6623_v27 }
  0xbf   : > { %5391 = vmatprep.mubr.msk.bf16.mxu1 %vm835_vm2, %v6635_v43 }
  0xc0   : > { %5648 = vmatmul.mubr.msk.bf16.gmra.mrb[52].mxu0 %vm835_vm2, %v3106_v13  ;;  %v1570_v13 = vrot.slane %v6777_v4, 1 }
  0xc1   : > { %5653 = vmatprep.mubr.msk.bf16.mxu0 %vm835_vm2, %v6353_v58  ;;  %v1572_v58 = vrot.slane %v7891_v21, 1 }
  0xc2   : > { %v7152_v2 = vsel %vm1528_vm3, %v1568_v52, %v1570_v13 }
  0xc3   : > { %v7155_v17 = vsel %vm1528_vm3, %v1570_v13, %v1572_v58 }
  0xc6   : > { %5392 = vmatmul.mubr.msk.bf16.gmra.mrb[28].mxu1 %vm835_vm2, %v6649_v55 }
  0xc7   : > { %5395 = vmatprep.mubr.msk.bf16.mxu1 %vm835_vm2, %v6670_v18 }
  0xc8   : > { %5654 = vmatmul.mubr.msk.bf16.vlgmr.msra.gmra.mrb[0].mxu0 %vm835_vm2, %v6354_v59  ;;  %v1576_v59 = vrot.slane %v6834_v41, 1 }
  0xc9   : > { %5710 = vmatpush3.bf16.msra.mxu0 %v3879_v32  ;;  %5657 = vmatprep.mubr.msk.bf16.mxu0 %vm835_vm2, %v6355_v6  ;;  %v6356_v32 = vld [vmem:[%s6445_s30 + $0x30] sm:$0xff]   ;;  %v1574_v6 = vrot.slane %v6828_v60, 1 }
  0xca   : > { %6284 = vmatprep.subr.msk.bf16.mxu0 %vm920_vm0, %v7141_v62 }
  0xcb   : > { %v7168_v52 = vsel %vm1528_vm3, %v1572_v58, %v1574_v6  ;;  %v7171_v13 = vsel %vm1528_vm3, %v1574_v6, %v1576_v59  ;;  %v7184_v58 = vsel %vm1528_vm3, %v1576_v59, %v1578_v29  ;;  %v6361_v59 = vld [vmem:[%s6445_s30 + $0xc] ss:$4 sps:$4 sm:$0xff]  }
  0xce   : > { %5396 = vmatmul.mubr.msk.bf16.gmra.mrb[32].mxu1 %vm835_vm2, %v6720_v48 }
  0xcf   : > { %5399 = vmatprep.mubr.msk.bf16.mxu1 %vm835_vm2, %v6743_v31 }
  0xd0   : > { %5658 = vmatmul.mubr.msk.bf16.gmra.mrb[4].mxu0 %vm835_vm2, %v6356_v32  ;;  %v6358_v32 = vld [vmem:[%s6445_s30 + $0x40] sm:$0xff]  }
  0xd1   : > { %5661 = vmatprep.mubr.msk.bf16.mxu0 %vm835_vm2, %v6357_v45  ;;  %v1580_v45 = vrot.slane %v6854_v20, 1 }
  0xd3   : > { %v7189_v6 = vsel %vm1528_vm3, %v1578_v29, %v1580_v45  ;;  %v7900_v29 = vld [vmem:[#allocation11_spill] sm:$0xff] }
  0xd6   : > { %5400 = vmatmul.mubr.msk.bf16.gmra.mrb[36].mxu1 %vm835_vm2, %v6749_v42 }
  0xd7   : > { %5403 = vmatprep.mubr.msk.bf16.mxu1 %vm835_vm2, %v6769_v30 }
  0xd8   : > { %5662 = vmatmul.mubr.msk.bf16.gmra.mrb[8].mxu0 %vm835_vm2, %v6358_v32  ;;  %v7906_v32 = vld [vmem:[#allocation18_spill] sm:$0xff] }
  0xd9   : > { %5665 = vmatprep.mubr.msk.bf16.mxu0 %vm835_vm2, %v6558_v26  ;;  %v6359_v26 = vld [vmem:[%s6445_s30] sm:$0xff]  }
  0xde   : > { %5404 = vmatmul.mubr.msk.bf16.gmra.mrb[40].mxu1 %vm835_vm2, %v6777_v4 }
  0xdf   : > { %5407 = vmatprep.mubr.msk.bf16.mxu1 %vm835_vm2, %v7891_v21 }
  0xe0   : > { %5666 = vmatmul.mubr.msk.bf16.gmra.mrb[12].mxu0 %vm835_vm2, %v6574_v40  ;;  %v1529_v40 = vrot.slane %v6359_v26, 1  ;;  %v7908_v26 = vld [vmem:[#allocation2_spill] sm:$0xff] }
  0xe1   : > { %5669 = vmatprep.mubr.msk.bf16.mxu0 %vm835_vm2, %v6590_v56  ;;  %v7892_v56 = vrot.slane %v6451_v7, 1  ;;  %v6360_v7 = vld [vmem:[%s7806_s2 + $0x10] sm:$0xf] }
  0xe6   : > { %5408 = vmatmul.mubr.msk.bf16.gmra.mrb[44].mxu1 %vm835_vm2, %v6828_v60 }
  0xe7   : > { %5411 = vmatprep.mubr.msk.bf16.mxu1 %vm835_vm2, %v6834_v41 }
  0xe8   : > { %5670 = vmatmul.mubr.msk.bf16.gmra.mrb[16].mxu0 %vm835_vm2, %v6603_v3  ;;  %v1531_v3 = vsel %vm1528_vm3, %v1529_v40, %v7892_v56  ;;  %v6363_v40 = vld [vmem:[%s6445_s30 + $0x1c] ss:$4 sps:$4 sm:$0xff]  }
  0xe9   : > { %5673 = vmatprep.mubr.msk.bf16.mxu0 %vm835_vm2, %v6623_v27  ;;  %v2101_v27 = vsel %vm920_vm0, %v6984_v50, 0  ;;  %v7909_v56 = vld [vmem:[#allocation21_spill] sm:$0xff] }
  0xee   : > { %5412 = vmatmul.mubr.msk.bf16.gmra.mrb[48].mxu1 %vm835_vm2, %v6843_v19 }
  0xef   : > { %5415 = vmatprep.mubr.msk.bf16.mxu1 %vm835_vm2, %v6854_v20 }
  0xf0   : > { %5674 = vmatmul.mubr.msk.bf16.gmra.mrb[20].mxu0 %vm835_vm2, %v6635_v43  ;;  %v7893_v43 = vld [vmem:[#allocation3_spill] sm:$0xff] }
  0xf1   : > { %5677 = vmatprep.mubr.msk.bf16.mxu0 %vm835_vm2, %v6649_v55  ;;  %v4221_v55 = vsel %vm920_vm0, %v7141_v62, 0  ;;  %v7904_v62 = vld [vmem:[#allocation16_spill] sm:$0xff] }
  0xf6   : > { %5416 = vmatmul.mubr.msk.bf16.gmra.mrb[52].mxu1 %vm835_vm2, %v6862_v25 }
  0xf7   : > { %5421 = vmatprep.mubr.msk.bf16.mxu1 %vm835_vm2, %v1531_v3  ;;  %v7910_v3 = vld [vmem:[#allocation29_spill] sm:$0xff] }
  0xf8   : > { %5678 = vmatmul.mubr.msk.bf16.gmra.mrb[24].mxu0 %vm835_vm2, %v6670_v18  ;;  %v7894_v18 = vld [vmem:[#allocation4_spill] sm:$0xff] }
  0xf9   : > { %5681 = vmatprep.mubr.msk.bf16.mxu0 %vm835_vm2, %v6720_v48  ;;  %v7896_v48 = vld [vmem:[#allocation6_spill] sm:$0xff] }
  0xfe   : > { %5422 = vmatmul.mubr.msk.bf16.vlgmr.msra.gmra.mrb[0].mxu1 %vm835_vm2, %v6935_v10  ;;  %v7902_v10 = vld [vmem:[#allocation13_spill] sm:$0xff] }
  0xff   : > { %5478 = vmatpush3.bf16.msra.mxu1 %v2101_v27  ;;  %5425 = vmatprep.mubr.msk.bf16.mxu1 %vm835_vm2, %v6957_v57  ;;  %v7903_v57 = vld [vmem:[#allocation15_spill] sm:$0xff] }
 0x100   : > { %6280 = vmatprep.subr.msk.bf16.mxu1 %vm920_vm0, %v6360_v7  ;;  %5682 = vmatmul.mubr.msk.bf16.gmra.mrb[28].mxu0 %vm835_vm2, %v6743_v31  ;;  %v7897_v31 = vld [vmem:[#allocation7_spill] sm:$0xff] }
 0x101   : > { %5685 = vmatprep.mubr.msk.bf16.mxu0 %vm835_vm2, %v6749_v42  ;;  %v7898_v42 = vld [vmem:[#allocation8_spill] sm:$0xff]  ;;  %v6364_v27 = vld [vmem:[%s6445_s30 + $0x24] ss:$4 sps:$4 sm:$0xff]  }
 0x102   : > { %v6365_v7 = vld [vmem:[%s6445_s30 + $0x2c] ss:$4 sps:$4 sm:$0xff]  }
 0x106   : > { %5426 = vmatmul.mubr.msk.bf16.gmra.mrb[4].mxu1 %vm835_vm2, %v6960_v22 }
 0x107   : > { %5429 = vmatprep.mubr.msk.bf16.mxu1 %vm835_vm2, %v6974_v38 }
 0x108   : > { %5686 = vmatmul.mubr.msk.bf16.gmra.mrb[32].mxu0 %vm835_vm2, %v6769_v30  ;;  %v7899_v30 = vld [vmem:[#allocation9_spill] sm:$0xff] }
 0x109   : > { %5689 = vmatprep.mubr.msk.bf16.mxu0 %vm835_vm2, %v6777_v4  ;;  %v7281_v4 = vld [vmem:[%s6717_s16 + $0x10] sm:$0xff]  }
 0x10e   : > { %5430 = vmatmul.mubr.msk.bf16.gmra.mrb[8].mxu1 %vm835_vm2, %v6977_v63 }
 0x10f   : > { %5433 = vmatprep.mubr.msk.bf16.mxu1 %vm835_vm2, %v7001_v14 }
 0x110   : > { %5690 = vmatmul.mubr.msk.bf16.gmra.mrb[36].mxu0 %vm835_vm2, %v7891_v21  ;;  %v7905_v21 = vld [vmem:[#allocation17_spill] sm:$0xff] }
 0x111   : > { %5693 = vmatprep.mubr.msk.bf16.mxu0 %vm835_vm2, %v6828_v60  ;;  %v7901_v60 = vld [vmem:[#allocation12_spill] sm:$0xff] }
 0x116   : > { %5434 = vmatmul.mubr.msk.bf16.gmra.mrb[12].mxu1 %vm835_vm2, %v7004_v9 }
 0x117   : > { %5437 = vmatprep.mubr.msk.bf16.mxu1 %vm835_vm2, %v7019_v46 }
 0x118   : > { %5694 = vmatmul.mubr.msk.bf16.gmra.mrb[40].mxu0 %vm835_vm2, %v6834_v41  ;;  %v7330_v41 = vrot.slane %v6862_v25, 1 }
 0x119   : > { %5697 = vmatprep.mubr.msk.bf16.mxu0 %vm835_vm2, %v6843_v19  ;;  %v7895_v19 = vld [vmem:[#allocation5_spill] sm:$0xff] }
 0x11a   : > { %v7340_v50 = vsel %vm1528_vm3, %v1580_v45, %v7330_v41  ;;  %v6362_v45 = vld [vmem:[%s6445_s30 + $0x14] ss:$4 sps:$4 sm:$0xff]  }
 0x11e   : > { %5438 = vmatmul.mubr.msk.bf16.gmra.mrb[16].mxu1 %vm835_vm2, %v7022_v24 }
 0x11f   : > { %5441 = vmatprep.mubr.msk.bf16.mxu1 %vm835_vm2, %v7038_v15 }
 0x120   : > { %5698 = vmatmul.mubr.msk.bf16.gmra.mrb[44].mxu0 %vm835_vm2, %v6854_v20 }
 0x121   : > { %5701 = vmatprep.mubr.msk.bf16.mxu0 %vm835_vm2, %v6862_v25  ;;  %v1584_v25 = vrot.slane %v6919_v8, 1  ;;  %v7907_v8 = vld [vmem:[#allocation19_spill] sm:$0xff] }
 0x123   : > { %v1585_v20 = vsel %vm1528_vm3, %v7330_v41, %v1584_v25 }
 0x126   : > { %5442 = vmatmul.mubr.msk.bf16.gmra.mrb[20].mxu1 %vm835_vm2, %v7041_v33 }
 0x127   : > { %5445 = vmatprep.mubr.msk.bf16.mxu1 %vm835_vm2, %v7070_v1 }
 0x128   : > { %5702 = vmatmul.mubr.msk.bf16.gmra.mrb[48].mxu0 %vm835_vm2, %v7046_v34 }
 0x129   : > { %5705 = vmatprep.mubr.msk.bf16.mxu0 %vm835_vm2, %v7057_v51 }
 0x12e   : > { %5446 = vmatmul.mubr.msk.bf16.gmra.mrb[24].mxu1 %vm835_vm2, %v7073_v37 }
 0x12f   : > { %5449 = vmatprep.mubr.msk.bf16.mxu1 %vm835_vm2, %v7092_v35 }
 0x130   : > { %5706 = vmatmul.mubr.msk.bf16.gmra.mrb[52].mxu0 %vm835_vm2, %v7281_v4 }
 0x131   : > { %5711 = vmatprep.mubr.msk.bf16.mxu0 %vm835_vm2, %v7893_v43  ;;  %v6366_v43 = vld [vmem:[%s6445_s30 + $0x34] ss:$4 sps:$4 sm:$0xff]  }
 0x136   : > { %5450 = vmatmul.mubr.msk.bf16.gmra.mrb[28].mxu1 %vm835_vm2, %v7095_v5 }
 0x137   : > { %5453 = vmatprep.mubr.msk.bf16.mxu1 %vm835_vm2, %v7111_v16 }
 0x138   : > { %5712 = vmatmul.mubr.msk.bf16.vlgmr.msra.gmra.mrb[0].mxu0 %vm835_vm2, %v7894_v18  ;;  %v7911_v18 = vld [vmem:[#allocation31_spill] sm:$0xff] }
 0x139   : > { %5768 = vmatpush3.bf16.msra.mxu0 %v4221_v55  ;;  %5715 = vmatprep.mubr.msk.bf16.mxu0 %vm835_vm2, %v7895_v19  ;;  %v6367_v55 = vld [vmem:[%s6445_s30 + $0x3c] ss:$4 sps:$4 sm:$0xff]   ;;  %v6368_v19 = vld [vmem:[%s6445_s30 + $0x44] ss:$4 sps:$4 sm:$0xff]  }
 0x13e   : > { %5454 = vmatmul.mubr.msk.bf16.gmra.mrb[32].mxu1 %vm835_vm2, %v7114_v12 }
 0x13f   : > { %5457 = vmatprep.mubr.msk.bf16.mxu1 %vm835_vm2, %v7127_v28 }
 0x140   : > { %5716 = vmatmul.mubr.msk.bf16.gmra.mrb[4].mxu0 %vm835_vm2, %v7896_v48 }
 0x141   : > { %5719 = vmatprep.mubr.msk.bf16.mxu0 %vm835_vm2, %v7897_v31  ;;  %v6370_v31 = vld [vmem:[%s6445_s30 + $0x54] ss:$4 sps:$4 sm:$0xff]  }
 0x146   : > { %5458 = vmatmul.mubr.msk.bf16.gmra.mrb[36].mxu1 %vm835_vm2, %v7130_v36 }
 0x147   : > { %5461 = vmatprep.mubr.msk.bf16.mxu1 %vm835_vm2, %v7152_v2 }
 0x148   : > { %5720 = vmatmul.mubr.msk.bf16.gmra.mrb[8].mxu0 %vm835_vm2, %v7898_v42  ;;  %v3844_v42 = vshrl.u32 %v7046_v34, 16 }
 0x149   : > { %5723 = vmatprep.mubr.msk.bf16.mxu0 %vm835_vm2, %v7899_v30  ;;  %v6371_v30 = vld [vmem:[%s6445_s30 + $0x5c] ss:$4 sps:$4 sm:$0xff]  }
 0x14e   : > { %5462 = vmatmul.mubr.msk.bf16.gmra.mrb[40].mxu1 %vm835_vm2, %v7155_v17 }
 0x14f   : > { %5465 = vmatprep.mubr.msk.bf16.mxu1 %vm835_vm2, %v7168_v52 }
 0x150   : > { %5724 = vmatmul.mubr.msk.bf16.gmra.mrb[12].mxu0 %vm835_vm2, %v7900_v29  ;;  %v3851_v29 = vshrl.u32 %v7057_v51, 16 }
 0x151   : > { %5727 = vmatprep.mubr.msk.bf16.mxu0 %vm835_vm2, %v7901_v60 }
 0x156   : > { %5466 = vmatmul.mubr.msk.bf16.gmra.mrb[44].mxu1 %vm835_vm2, %v7171_v13 }
 0x157   : > { %5469 = vmatprep.mubr.msk.bf16.mxu1 %vm835_vm2, %v7184_v58 }
 0x158   : > { %5728 = vmatmul.mubr.msk.bf16.gmra.mrb[16].mxu0 %vm835_vm2, %v7902_v10 }
 0x159   : > { %5731 = vmatprep.mubr.msk.bf16.mxu0 %vm835_vm2, %v7903_v57  ;;  %v7408_v57 = vld [vmem:[%s6717_s16 + $0x18] ss:$0 sps:$4 sm:$0xff]  }
 0x15e   : > { %5470 = vmatmul.mubr.msk.bf16.gmra.mrb[48].mxu1 %vm835_vm2, %v7189_v6 }
 0x15f   : > { %5473 = vmatprep.mubr.msk.bf16.mxu1 %vm835_vm2, %v7340_v50 }
 0x160   : > { %5732 = vmatmul.mubr.msk.bf16.gmra.mrb[20].mxu0 %vm835_vm2, %v7904_v62 }
 0x161   : > { %5735 = vmatprep.mubr.msk.bf16.mxu0 %vm835_vm2, %v7905_v21  ;;  %v6372_v21 = vld [vmem:[%s6445_s30 + $0x64] ss:$4 sps:$4 sm:$0xff]  }
 0x166   : > { %5474 = vmatmul.mubr.msk.bf16.gmra.mrb[52].mxu1 %vm835_vm2, %v1585_v20  ;;  %v3858_v20 = vshrl.u32 %v7281_v4, 16 }
 0x167   : > { %5479 = vmatprep.mubr.msk.bf16.mxu1 %vm835_vm2, %v6361_v59  ;;  %v3862_v59 = vshll.u32 %v7408_v57, 16 }
 0x168   : > { %5736 = vmatmul.mubr.msk.bf16.gmra.mrb[24].mxu0 %vm835_vm2, %v7906_v32  ;;  %v6373_v32 = vld [vmem:[%s6445_s30 + $0x6c] ss:$4 sps:$4 sm:$0xff]  }
 0x169   : > { %5739 = vmatprep.mubr.msk.bf16.mxu0 %vm835_vm2, %v7907_v8 }
 0x16e   : > { %5480 = vmatmul.mubr.msk.bf16.vlgmr.msra.gmra.mrb[0].mxu1 %vm835_vm2, %v6362_v45  ;;  %v3864_v45 = vrot.slane %v3862_v59, 1 }
 0x16f   : > { %5826 = vmatpush3.bf16.msra.mxu1 %v7908_v26  ;;  %5483 = vmatprep.mubr.msk.bf16.mxu1 %vm835_vm2, %v6363_v40  ;;  %v7912_v26 = vld [vmem:[#allocation10_spill] sm:$0xff] }
 0x170   : > { %5740 = vmatmul.mubr.msk.bf16.gmra.mrb[28].mxu0 %vm835_vm2, %v7909_v56  ;;  %v7913_v56 = vld [vmem:[#allocation20_spill] sm:$0xff] }
 0x171   : > { %5743 = vmatprep.mubr.msk.bf16.mxu0 %vm835_vm2, %v7910_v3  ;;  %v7914_v3 = vld [vmem:[#allocation22_spill] sm:$0xff] }
 0x176   : > { %5484 = vmatmul.mubr.msk.bf16.gmra.mrb[4].mxu1 %vm835_vm2, %v6364_v27  ;;  %v7916_v27 = vld [vmem:[#allocation25_spill] sm:$0xff] }
 0x177   : > { %5487 = vmatprep.mubr.msk.bf16.mxu1 %vm835_vm2, %v6365_v7  ;;  %v7923_v7 = vld [vmem:[#allocation14_spill] sm:$0xff] }
 0x178   : > { %5744 = vmatmul.mubr.msk.bf16.gmra.mrb[32].mxu0 %vm835_vm2, %v6865_v54  ;;  %v6369_v54 = vld [vmem:[%s6445_s30 + $0x4c] ss:$4 sps:$4 sm:$0xff]  }
 0x179   : > { %5747 = vmatprep.mubr.msk.bf16.mxu0 %vm835_vm2, %v6879_v11  ;;  %v3840_v11 = vshll.u32 %v7046_v34, 16 }
 0x17b   : > { %v3842_v48 = vrot.slane %v3840_v11, 1 }
 0x17d   : > { %v3846_v10 = vor.u32 %v3844_v42, %v3842_v48  ;;  %v2548_v42 = vshrl.u32 %v7914_v3, 16 }
 0x17e   : > { %5488 = vmatmul.mubr.msk.bf16.gmra.mrb[8].mxu1 %vm835_vm2, %v6366_v43 }
 0x17f   : > { %5491 = vmatprep.mubr.msk.bf16.mxu1 %vm835_vm2, %v6367_v55 }
 0x180   : > { %5748 = vmatmul.mubr.msk.bf16.gmra.mrb[36].mxu0 %vm835_vm2, %v6884_v39  ;;  %v3847_v39 = vshll.u32 %v7057_v51, 16 }
 0x181   : > { %5751 = vmatprep.mubr.msk.bf16.mxu0 %vm835_vm2, %v7911_v18  ;;  %v2534_v18 = vshrl.u32 %v6793_v47, 16 }
 0x182   : > { %v3849_v60 = vrot.slane %v3847_v39, 1 }
 0x184   : > { %v3853_v25 = vor.u32 %v3851_v29, %v3849_v60 }
 0x186   : > { %5492 = vmatmul.mubr.msk.bf16.gmra.mrb[12].mxu1 %vm835_vm2, %v6368_v19  ;;  %v2537_v19 = vshll.u32 %v7913_v56, 16 }
 0x187   : > { %5495 = vmatprep.mubr.msk.bf16.mxu1 %vm835_vm2, %v6369_v54  ;;  %v7924_v54 = vld [vmem:[#allocation34_spill] sm:$0xff] }
 0x188   : > { %5752 = vmatmul.mubr.msk.bf16.gmra.mrb[40].mxu0 %vm835_vm2, %v6904_v0  ;;  %v3843_v0 = vsel %vm606_vm1, %v6945_v53, %v3842_v48  ;;  %v3850_v53 = vsel %vm606_vm1, %v3846_v10, %v3849_v60  ;;  %v2539_v39 = vrot.slane %v2537_v19, 1 }
 0x189   : > { %5755 = vmatprep.mubr.msk.bf16.mxu0 %vm835_vm2, %v6925_v44  ;;  %v3854_v44 = vshll.u32 %v7281_v4, 16 }
 0x18b   : > { %v3856_v62 = vrot.slane %v3854_v44, 1  ;;  %v2558_v44 = vshll.u32 %v7916_v27, 16 }
 0x18d   : > { %v3860_v8 = vor.u32 %v3858_v20, %v3856_v62 }
 0x18e   : > { %5496 = vmatmul.mubr.msk.bf16.gmra.mrb[16].mxu1 %vm835_vm2, %v6370_v31 }
 0x18f   : > { %5499 = vmatprep.mubr.msk.bf16.mxu1 %vm835_vm2, %v6371_v30  ;;  %v3865_v40 = vsel %vm606_vm1, %v3860_v8, %v3864_v45 }
 0x190   : > { %5756 = vmatmul.mubr.msk.bf16.gmra.mrb[44].mxu0 %vm835_vm2, %v6938_v23  ;;  %v3857_v23 = vsel %vm606_vm1, %v3853_v25, %v3856_v62  ;;  %v2562_v62 = vshrl.u32 %v7916_v27, 16 }
 0x191   : > { %5759 = vmatprep.mubr.msk.bf16.mxu0 %vm835_vm2, %v3843_v0 }
 0x196   : > { %5500 = vmatmul.mubr.msk.bf16.gmra.mrb[20].mxu1 %vm835_vm2, %v6372_v21 }
 0x197   : > { %5503 = vmatprep.mubr.msk.bf16.mxu1 %vm835_vm2, %v6373_v32 }
 0x198   : > { %5760 = vmatmul.mubr.msk.bf16.gmra.mrb[48].mxu0 %vm835_vm2, %v3850_v53  ;;  %v2560_v53 = vrot.slane %v2558_v44, 1 }
 0x199   : > { %5763 = vmatprep.mubr.msk.bf16.mxu0 %vm835_vm2, %v3857_v23 }
 0x19a   : > { %v2564_v20 = vor.u32 %v2562_v62, %v2560_v53 }
 0x19e   : > { %5504 = vmatmul.mubr.msk.bf16.gmra.mrb[24].mxu1 %vm835_vm2, %v7912_v26 }
 0x19f   : > { %5507 = vmatprep.mubr.msk.bf16.mxu1 %vm835_vm2, %v6695_v61 }
 0x1a0   : > { %5764 = vmatmul.mubr.msk.bf16.gmra.mrb[52].mxu0 %vm835_vm2, %v3865_v40 }
 0x1a1   : > { %5769 = vmatprep.mubr.msk.bf16.mxu0 %vm835_vm2, %v6960_v22  ;;  %v7915_v22 = vld [vmem:[#allocation23_spill] sm:$0xff] }
 0x1a2   : > { %v2551_v30 = vshll.u32 %v7915_v22, 16  ;;  %v2555_v10 = vshrl.u32 %v7915_v22, 16 }
 0x1a6   : > { %5508 = vmatmul.mubr.msk.bf16.gmra.mrb[28].mxu1 %vm835_vm2, %v6787_v49 }
 0x1a7   : > { %5511 = vmatprep.mubr.msk.bf16.mxu1 %vm835_vm2, %v6793_v47 }
 0x1a8   : > { %5770 = vmatmul.mubr.msk.bf16.vlgmr.msra.gmra.mrb[0].mxu0 %vm835_vm2, %v6974_v38  ;;  %v7917_v38 = vld [vmem:[#allocation26_spill] sm:$0xff] }
 0x1a9   : > { %5773 = vmatprep.mubr.msk.bf16.mxu0 %vm835_vm2, %v6977_v63  ;;  %v7918_v63 = vld [vmem:[#allocation27_spill] sm:$0xff]  ;;  %v2565_v21 = vshll.u32 %v7917_v38, 16  ;;  %v2569_v23 = vshrl.u32 %v7917_v38, 16 }
 0x1aa   : > { %v2572_v59 = vshll.u32 %v7918_v63, 16  ;;  %v2576_v45 = vshrl.u32 %v7918_v63, 16 }
 0x1ac   : > { %v2574_v40 = vrot.slane %v2572_v59, 1 }
 0x1ae   : > { %5512 = vmatmul.mubr.msk.bf16.gmra.mrb[32].mxu1 %vm835_vm2, %v7913_v56 }
 0x1af   : > { %5515 = vmatprep.mubr.msk.bf16.mxu1 %vm835_vm2, %v7914_v3 }
 0x1b0   : > { %5774 = vmatmul.mubr.msk.bf16.gmra.mrb[4].mxu0 %vm835_vm2, %v7001_v14  ;;  %v7919_v14 = vld [vmem:[#allocation28_spill] sm:$0xff] }
 0x1b1   : > { %5777 = vmatprep.mubr.msk.bf16.mxu0 %vm835_vm2, %v7004_v9  ;;  %v7920_v9 = vld [vmem:[#allocation30_spill] sm:$0xff]  ;;  %v2579_v26 = vshll.u32 %v7919_v14, 16 }
 0x1b6   : > { %5516 = vmatmul.mubr.msk.bf16.gmra.mrb[36].mxu1 %vm835_vm2, %v7915_v22 }
 0x1b7   : > { %5519 = vmatprep.mubr.msk.bf16.mxu1 %vm835_vm2, %v7916_v27  ;;  %v2583_v27 = vshrl.u32 %v7919_v14, 16 }
 0x1b8   : > { %5778 = vmatmul.mubr.msk.bf16.gmra.mrb[8].mxu0 %vm835_vm2, %v7019_v46  ;;  %v2520_v46 = vshrl.u32 %v6695_v61, 16  ;;  %v2527_v61 = vshrl.u32 %v6787_v49, 16 }
 0x1b9   : > { %5781 = vmatprep.mubr.msk.bf16.mxu0 %vm835_vm2, %v7022_v24  ;;  %v2523_v24 = vshll.u32 %v6787_v49, 16  ;;  %v2544_v49 = vshll.u32 %v7914_v3, 16  ;;  %v2586_v3 = vshll.u32 %v7920_v9, 16 }
 0x1ba   : > { %v2522_v43 = vor.u32 %v2520_v46, %v7923_v7 }
 0x1bb   : > { %v2525_v55 = vrot.slane %v2523_v24, 1  ;;  %v2546_v0 = vrot.slane %v2544_v49, 1  ;;  %v2588_v24 = vrot.slane %v2586_v3, 1 }
 0x1bd   : > { %v2529_v48 = vor.u32 %v2527_v61, %v2525_v55  ;;  %v2550_v29 = vor.u32 %v2548_v42, %v2546_v0 }
 0x1be   : > { %5520 = vmatmul.mubr.msk.bf16.gmra.mrb[40].mxu1 %vm835_vm2, %v7917_v38 }
 0x1bf   : > { %5523 = vmatprep.mubr.msk.bf16.mxu1 %vm835_vm2, %v7918_v63  ;;  %v2590_v63 = vshrl.u32 %v7920_v9, 16 }
 0x1c0   : > { %5782 = vmatmul.mubr.msk.bf16.gmra.mrb[12].mxu0 %vm835_vm2, %v7038_v15  ;;  %v7921_v15 = vld [vmem:[#allocation32_spill] sm:$0xff] }
 0x1c1   : > { %5785 = vmatprep.mubr.msk.bf16.mxu0 %vm835_vm2, %v7041_v33  ;;  %v7922_v33 = vld [vmem:[#allocation33_spill] sm:$0xff]  ;;  %v2593_v46 = vshll.u32 %v7921_v15, 16  ;;  %v2592_v7 = vor.u32 %v2590_v63, %v2588_v24 }
 0x1c2   : > { %v2604_v61 = vshrl.u32 %v7922_v33, 16 }
 0x1c6   : > { %5524 = vmatmul.mubr.msk.bf16.gmra.mrb[44].mxu1 %vm835_vm2, %v7919_v14  ;;  %v2600_v14 = vshll.u32 %v7922_v33, 16 }
 0x1c7   : > { %5527 = vmatprep.mubr.msk.bf16.mxu1 %vm835_vm2, %v7920_v9 }
 0x1c8   : > { %5786 = vmatmul.mubr.msk.bf16.gmra.mrb[16].mxu0 %vm835_vm2, %v7070_v1  ;;  %v2526_v1 = vsel %vm606_vm1, %v2522_v43, %v2525_v55  ;;  %v2597_v43 = vshrl.u32 %v7921_v15, 16  ;;  %v4200_v55 = vrot.slane %v7046_v34, 1  ;;  %v4202_v34 = vrot.slane %v7057_v51, 1 }
 0x1c9   : > { %5789 = vmatprep.mubr.msk.bf16.mxu0 %vm835_vm2, %v7073_v37  ;;  %v2530_v37 = vshll.u32 %v6793_v47, 16 }
 0x1cb   : > { %v2532_v11 = vrot.slane %v2530_v37, 1 }
 0x1cd   : > { %v2533_v47 = vsel %vm606_vm1, %v2529_v48, %v2532_v11  ;;  %v7925_v48 = vld [vmem:[#allocation35_spill] sm:$0xff] }
 0x1ce   : > { %5528 = vmatmul.mubr.msk.bf16.gmra.mrb[48].mxu1 %vm835_vm2, %v7921_v15 }
 0x1cf   : > { %5531 = vmatprep.mubr.msk.bf16.mxu1 %vm835_vm2, %v7922_v33  ;;  %v2611_v33 = vshrl.u32 %v7924_v54, 16 }
 0x1d0   : > { %5790 = vmatmul.mubr.msk.bf16.gmra.mrb[20].mxu0 %vm835_vm2, %v7092_v35  ;;  %v2536_v35 = vor.u32 %v2534_v18, %v2532_v11  ;;  %v4201_v18 = vsel %vm1528_vm3, %v7330_v41, %v4200_v55  ;;  %v4203_v41 = vsel %vm1528_vm3, %v4200_v55, %v4202_v34 }
 0x1d1   : > { %5793 = vmatprep.mubr.msk.bf16.mxu0 %vm835_vm2, %v7095_v5  ;;  %v2541_v5 = vshrl.u32 %v7913_v56, 16  ;;  %v2578_v56 = vor.u32 %v2576_v45, %v2574_v40 }
 0x1d2   : > { %v2540_v31 = vsel %vm606_vm1, %v2536_v35, %v2539_v39  ;;  %v2615_v35 = vshll.u32 %v7925_v48, 16 }
 0x1d6   : > { %5532 = vmatmul.mubr.msk.bf16.gmra.mrb[52].mxu1 %vm835_vm2, %v7924_v54 }
 0x1d7   : > { %5565 = vmatprep.mubr.msk.bf16.mxu1 %vm835_vm2, %v2526_v1  ;;  %v2607_v1 = vshll.u32 %v7924_v54, 16  ;;  %v4206_v54 = vrot.slane %v7408_v57, 1 }
 0x1d8   : > { %5794 = vmatmul.mubr.msk.bf16.gmra.mrb[24].mxu0 %vm835_vm2, %v7111_v16  ;;  %v2543_v16 = vor.u32 %v2541_v5, %v2539_v39  ;;  %v4204_v39 = vrot.slane %v7281_v4, 1 }
 0x1d9   : > { %5797 = vmatprep.mubr.msk.bf16.mxu0 %vm835_vm2, %v7114_v12  ;;  %v2553_v12 = vrot.slane %v2551_v30, 1  ;;  %v2609_v11 = vrot.slane %v2607_v1, 1 }
 0x1da   : > { %v2547_v60 = vsel %vm606_vm1, %v2543_v16, %v2546_v0  ;;  %v4205_v51 = vsel %vm1528_vm3, %v4202_v34, %v4204_v39  ;;  %v4207_v5 = vsel %vm1528_vm3, %v4204_v39, %v4206_v54 }
 0x1db   : > { %v2554_v25 = vsel %vm606_vm1, %v2550_v29, %v2553_v12 }
 0x1de   : > { %5566 = vmatmul.mubr.msk.bf16.vlgmr.msra.gmra.mrb[28].mxu1 %vm835_vm2, %v2533_v47  ;;  %v2617_v47 = vrot.slane %v2615_v35, 1 }
 0x1df   : > { %5569 = vmatprep.mubr.msk.bf16.mxu1 %vm835_vm2, %v2540_v31 }
 0x1e0   : > { %5798 = vmatmul.mubr.msk.bf16.gmra.mrb[28].mxu0 %vm835_vm2, %v7127_v28  ;;  %v2557_v28 = vor.u32 %v2555_v10, %v2553_v12 }
 0x1e1   : > { %5801 = vmatprep.mubr.msk.bf16.mxu0 %vm835_vm2, %v7130_v36  ;;  %v2567_v36 = vrot.slane %v2565_v21, 1 }
 0x1e2   : > { %v2561_v32 = vsel %vm606_vm1, %v2557_v28, %v2560_v53 }
 0x1e3   : > { %v2568_v8 = vsel %vm606_vm1, %v2564_v20, %v2567_v36 }
 0x1e6   : > { %5570 = vmatmul.mubr.msk.bf16.gmra.mrb[32].mxu1 %vm835_vm2, %v2547_v60 }
 0x1e7   : > { %5573 = vmatprep.mubr.msk.bf16.mxu1 %vm835_vm2, %v2554_v25 }
 0x1e8   : > { %5802 = vmatmul.mubr.msk.bf16.gmra.mrb[32].mxu0 %vm835_vm2, %v7152_v2  ;;  %v2571_v2 = vor.u32 %v2569_v23, %v2567_v36 }
 0x1e9   : > { %5805 = vmatprep.mubr.msk.bf16.mxu0 %vm835_vm2, %v7155_v17  ;;  %v2581_v17 = vrot.slane %v2579_v26, 1 }
 0x1ea   : > { %v2575_v22 = vsel %vm606_vm1, %v2571_v2, %v2574_v40 }
 0x1eb   : > { %v2582_v38 = vsel %vm606_vm1, %v2578_v56, %v2581_v17 }
 0x1ee   : > { %5574 = vmatmul.mubr.msk.bf16.gmra.mrb[36].mxu1 %vm835_vm2, %v2561_v32 }
 0x1ef   : > { %5577 = vmatprep.mubr.msk.bf16.mxu1 %vm835_vm2, %v2568_v8 }
 0x1f0   : > { %5806 = vmatmul.mubr.msk.bf16.gmra.mrb[36].mxu0 %vm835_vm2, %v7168_v52  ;;  %v2585_v52 = vor.u32 %v2583_v27, %v2581_v17 }
 0x1f1   : > { %5809 = vmatprep.mubr.msk.bf16.mxu0 %vm835_vm2, %v7171_v13  ;;  %v2595_v13 = vrot.slane %v2593_v46, 1 }
 0x1f2   : > { %v2589_v9 = vsel %vm606_vm1, %v2585_v52, %v2588_v24 }
 0x1f3   : > { %v2596_v37 = vsel %vm606_vm1, %v2592_v7, %v2595_v13 }
 0x1f6   : > { %5578 = vmatmul.mubr.msk.bf16.gmra.mrb[40].mxu1 %vm835_vm2, %v2575_v22  ;;  %v7609_v22 = vld [vmem:[%s7807_s3] ss:$0 sm:$0xff] }
 0x1f7   : > { %5581 = vmatprep.mubr.msk.bf16.mxu1 %vm835_vm2, %v2582_v38 }
 0x1f8   : > { %5810 = vmatmul.mubr.msk.bf16.gmra.mrb[40].mxu0 %vm835_vm2, %v7184_v58  ;;  %v2602_v58 = vrot.slane %v2600_v14, 1 }
 0x1f9   : > { %5813 = vmatprep.mubr.msk.bf16.mxu0 %vm835_vm2, %v7189_v6  ;;  %v2599_v6 = vor.u32 %v2597_v43, %v2595_v13 }
 0x1fa   : > { %v2606_v19 = vor.u32 %v2604_v61, %v2602_v58 }
 0x1fb   : > { %v2603_v15 = vsel %vm606_vm1, %v2599_v6, %v2602_v58 }
 0x1fc   : > { %v2610_v49 = vsel %vm606_vm1, %v2606_v19, %v2609_v11 }
 0x1fe   : > { %5582 = vmatmul.mubr.msk.bf16.gmra.mrb[44].mxu1 %vm835_vm2, %v2589_v9 }
 0x1ff   : > { %5585 = vmatprep.mubr.msk.bf16.mxu1 %vm835_vm2, %v2596_v37 }
 0x200   : > { %5814 = vmatmul.mubr.msk.bf16.gmra.mrb[44].mxu0 %vm835_vm2, %v7340_v50  ;;  %v2613_v50 = vor.u32 %v2611_v33, %v2609_v11 }
 0x201   : > { %5817 = vmatprep.mubr.msk.bf16.mxu0 %vm835_vm2, %v4201_v18 }
 0x202   : > { %v2618_v4 = vsel %vm606_vm1, %v2613_v50, %v2617_v47 }
 0x206   : > { %5586 = vmatmul.mubr.msk.bf16.gmra.mrb[48].mxu1 %vm835_vm2, %v2603_v15 }
 0x207   : > { %5589 = vmatprep.mubr.msk.bf16.mxu1 %vm835_vm2, %v2610_v49 }
 0x208   : > { %5818 = vmatmul.mubr.msk.bf16.gmra.mrb[48].mxu0 %vm835_vm2, %v4203_v41 }
 0x209   : > { %5821 = vmatprep.mubr.msk.bf16.mxu0 %vm835_vm2, %v4205_v51 }
 0x20e   : > { %5590 = vmatmul.mubr.msk.bf16.gmra.mrb[52].mxu1 %vm835_vm2, %v2618_v4 }
 0x210   : > { %5822 = vmatmul.mubr.msk.bf16.gmra.mrb[52].mxu0 %vm835_vm2, %v4207_v5 }
 0x241   : > { %v5481_v31 = vpop.f32.mrb[0].mxu1 }
 0x242   : > { %v2137_v42 = vpop.f32.mrb[1].mxu1 }
 0x243   : > { %v5482_v30 = vpop.f32.mrb[2].mxu1 }
 0x244   : > { %v2140_v0 = vpop.f32.mrb[3].mxu1 }
 0x249   : > { %v5485_v16 = vpop.f32.mrb[4].mxu1 }
 0x24a   : > { %v2153_v29 = vpop.f32.mrb[5].mxu1 }
 0x24b   : > { %v5486_v12 = vpop.f32.mrb[6].mxu1 }
 0x24c   : > { %v2156_v44 = vpop.f32.mrb[7].mxu1 }
 0x251   : > { %v5489_v60 = vpop.f32.mrb[8].mxu1 }
 0x252   : > { %v2169_v10 = vpop.f32.mrb[9].mxu1 }
 0x253   : > { %v5490_v25 = vpop.f32.mrb[10].mxu1 }
 0x254   : > { %v7570_v57 = vpop.f32.mrb[11].mxu1 }
 0x259   : > { %v7572_v62 = vpop.f32.mrb[12].mxu1 }
 0x25a   : > { %v7574_v21 = vpop.f32.mrb[13].mxu1 }
 0x25b   : > { %v7576_v53 = vpop.f32.mrb[14].mxu1 }
 0x25c   : > { %v7578_v28 = vpop.f32.mrb[15].mxu1 }
 0x261   : > { %v7580_v20 = vpop.f32.mrb[16].mxu1 }
 0x262   : > { %v7582_v36 = vpop.f32.mrb[17].mxu1 }
 0x263   : > { %v7584_v59 = vpop.f32.mrb[18].mxu1 }
 0x264   : > { %v7586_v32 = vpop.f32.mrb[19].mxu1 }
 0x269   : > { %v7588_v23 = vpop.f32.mrb[20].mxu1 }
 0x26a   : > { %v7590_v8 = vpop.f32.mrb[21].mxu1 }
 0x26b   : > { %v7592_v45 = vpop.f32.mrb[22].mxu1 }
 0x26c   : > { %v7594_v26 = vpop.f32.mrb[23].mxu1 }
 0x271   : > { %v7596_v40 = vpop.f32.mrb[24].mxu1 }
 0x272   : > { %v7598_v2 = vpop.f32.mrb[25].mxu1 }
 0x273   : > { %v7600_v56 = vpop.f32.mrb[26].mxu1 }
 0x274   : > { %v7603_v17 = vpop.f32.mrb[27].mxu1 }
 0x27b   : > { %v5771_v3 = vpop.f32.mrb[0].mxu0 }
 0x27c   : > { %v5827_v27 = vadd.f32 %v5771_v3, %v5481_v31  ;;  %v4257_v38 = vpop.f32.mrb[1].mxu0 }
 0x27d   : > { %v5828_v63 = vadd.f32 %v4257_v38, %v2137_v42  ;;  %v5772_v46 = vpop.f32.mrb[2].mxu0 }
 0x27e   : > { %v4545_v24 = vadd.f32 %v5827_v27, %v7609_v22  ;;  %v5829_v52 = vadd.f32 %v5772_v46, %v5482_v30  ;;  %v4260_v7 = vpop.f32.mrb[3].mxu0 }
 0x27f   : > { %v4543_v13 = vadd.f32 %v5828_v63, %v7609_v22  ;;  %v5830_v14 = vadd.f32 %v4260_v7, %v2140_v0 }
 0x280   : > { %4601 = vst.msk [vmem:[%s7614_s5 + $0x10] sm:$0xff] %vm835_vm2, %v4545_v24  ;;  %v4546_v9 = vadd.f32 %v5829_v52, %v7609_v22 }
 0x281   : > { %4599 = vst.msk [vmem:[%s7614_s5] sm:$0xff] %vm835_vm2, %v4543_v13  ;;  %v4544_v43 = vadd.f32 %v5830_v14, %v7609_v22 }
 0x282   : > { %4602 = vst.msk [vmem:[%s7614_s5 + $0x18] sm:$0xff] %vm835_vm2, %v4546_v9 }
 0x283   : > { %4600 = vst.msk [vmem:[%s7614_s5 + $0x8] sm:$0xff] %vm835_vm2, %v4544_v43  ;;  %v5775_v55 = vpop.f32.mrb[4].mxu0 }
 0x284   : > { %v5831_v37 = vadd.f32 %v5775_v55, %v5485_v16  ;;  %v4273_v61 = vpop.f32.mrb[5].mxu0 }
 0x285   : > { %v5832_v1 = vadd.f32 %v4273_v61, %v2153_v29  ;;  %v5776_v58 = vpop.f32.mrb[6].mxu0 }
 0x286   : > { %v4549_v6 = vadd.f32 %v5831_v37, %v7609_v22  ;;  %v5833_v18 = vadd.f32 %v5776_v58, %v5486_v12  ;;  %v4276_v19 = vpop.f32.mrb[7].mxu0 }
 0x287   : > { %v4547_v11 = vadd.f32 %v5832_v1, %v7609_v22  ;;  %v5834_v34 = vadd.f32 %v4276_v19, %v2156_v44 }
 0x288   : > { %4605 = vst.msk [vmem:[%s7614_s5 + $0x30] sm:$0xff] %vm835_vm2, %v4549_v6  ;;  %v4550_v15 = vadd.f32 %v5833_v18, %v7609_v22 }
 0x289   : > { %4603 = vst.msk [vmem:[%s7614_s5 + $0x20] sm:$0xff] %vm835_vm2, %v4547_v11  ;;  %v4548_v33 = vadd.f32 %v5834_v34, %v7609_v22 }
 0x28a   : > { %4606 = vst.msk [vmem:[%s7614_s5 + $0x38] sm:$0xff] %vm835_vm2, %v4550_v15 }
 0x28b   : > { %4604 = vst.msk [vmem:[%s7614_s5 + $0x28] sm:$0xff] %vm835_vm2, %v4548_v33  ;;  %v5779_v48 = vpop.f32.mrb[8].mxu0 }
 0x28c   : > { %v5835_v35 = vadd.f32 %v5779_v48, %v5489_v60  ;;  %v4289_v39 = vpop.f32.mrb[9].mxu0 }
 0x28d   : > { %v5836_v49 = vadd.f32 %v4289_v39, %v2169_v10  ;;  %v5780_v41 = vpop.f32.mrb[10].mxu0 }
 0x28e   : > { %v4553_v50 = vadd.f32 %v5835_v35, %v7609_v22  ;;  %v5837_v47 = vadd.f32 %v5780_v41, %v5490_v25  ;;  %v4292_v51 = vpop.f32.mrb[11].mxu0 }
 0x28f   : > { %v4551_v54 = vadd.f32 %v5836_v49, %v7609_v22  ;;  %v5838_v4 = vadd.f32 %v4292_v51, %v7570_v57 }
 0x290   : > { %4609 = vst.msk [vmem:[%s7614_s5 + $0x50] sm:$0xff] %vm835_vm2, %v4553_v50  ;;  %v4554_v5 = vadd.f32 %v5837_v47, %v7609_v22 }
 0x291   : > { %4607 = vst.msk [vmem:[%s7614_s5 + $0x40] sm:$0xff] %vm835_vm2, %v4551_v54  ;;  %v4552_v31 = vadd.f32 %v5838_v4, %v7609_v22 }
 0x292   : > { %4610 = vst.msk [vmem:[%s7614_s5 + $0x58] sm:$0xff] %vm835_vm2, %v4554_v5 }
 0x293   : > { %4608 = vst.msk [vmem:[%s7614_s5 + $0x48] sm:$0xff] %vm835_vm2, %v4552_v31  ;;  %v5783_v42 = vpop.f32.mrb[12].mxu0 }
 0x294   : > { %v5839_v30 = vadd.f32 %v5783_v42, %v7572_v62  ;;  %v4305_v0 = vpop.f32.mrb[13].mxu0 }
 0x295   : > { %v5840_v16 = vadd.f32 %v4305_v0, %v7574_v21  ;;  %v5784_v29 = vpop.f32.mrb[14].mxu0 }
 0x296   : > { %v4557_v12 = vadd.f32 %v5839_v30, %v7609_v22  ;;  %v5841_v44 = vadd.f32 %v5784_v29, %v7576_v53  ;;  %v4308_v60 = vpop.f32.mrb[15].mxu0 }
 0x297   : > { %v4555_v10 = vadd.f32 %v5840_v16, %v7609_v22  ;;  %v5842_v25 = vadd.f32 %v4308_v60, %v7578_v28 }
 0x298   : > { %4613 = vst.msk [vmem:[%s7614_s5 + $0x70] sm:$0xff] %vm835_vm2, %v4557_v12  ;;  %v4558_v57 = vadd.f32 %v5841_v44, %v7609_v22 }
 0x299   : > { %4611 = vst.msk [vmem:[%s7614_s5 + $0x60] sm:$0xff] %vm835_vm2, %v4555_v10  ;;  %v4556_v62 = vadd.f32 %v5842_v25, %v7609_v22 }
 0x29a   : > { %4614 = vst.msk [vmem:[%s7614_s5 + $0x78] sm:$0xff] %vm835_vm2, %v4558_v57 }
 0x29b   : > { %4612 = vst.msk [vmem:[%s7614_s5 + $0x68] sm:$0xff] %vm835_vm2, %v4556_v62  ;;  %v5787_v21 = vpop.f32.mrb[16].mxu0 }
 0x29c   : > { %v5843_v53 = vadd.f32 %v5787_v21, %v7580_v20  ;;  %v4321_v28 = vpop.f32.mrb[17].mxu0 }
 0x29d   : > { %v5844_v3 = vadd.f32 %v4321_v28, %v7582_v36  ;;  %v5788_v27 = vpop.f32.mrb[18].mxu0 }
 0x29e   : > { %v4561_v38 = vadd.f32 %v5843_v53, %v7609_v22  ;;  %v5845_v63 = vadd.f32 %v5788_v27, %v7584_v59  ;;  %v4324_v46 = vpop.f32.mrb[19].mxu0 }
 0x29f   : > { %v4559_v24 = vadd.f32 %v5844_v3, %v7609_v22  ;;  %v5846_v52 = vadd.f32 %v4324_v46, %v7586_v32 }
 0x2a0   : > { %4617 = vst.msk [vmem:[%s7614_s5 + $0x90] sm:$0xff] %vm835_vm2, %v4561_v38  ;;  %v4562_v7 = vadd.f32 %v5845_v63, %v7609_v22 }
 0x2a1   : > { %4615 = vst.msk [vmem:[%s7614_s5 + $0x80] sm:$0xff] %vm835_vm2, %v4559_v24  ;;  %v4560_v20 = vadd.f32 %v5846_v52, %v7609_v22 }
 0x2a2   : > { %4618 = vst.msk [vmem:[%s7614_s5 + $0x98] sm:$0xff] %vm835_vm2, %v4562_v7 }
 0x2a3   : > { %4616 = vst.msk [vmem:[%s7614_s5 + $0x88] sm:$0xff] %vm835_vm2, %v4560_v20  ;;  %v5791_v36 = vpop.f32.mrb[20].mxu0 }
 0x2a4   : > { %v5847_v59 = vadd.f32 %v5791_v36, %v7588_v23  ;;  %v4337_v32 = vpop.f32.mrb[21].mxu0 }
 0x2a5   : > { %v5848_v13 = vadd.f32 %v4337_v32, %v7590_v8  ;;  %v5792_v14 = vpop.f32.mrb[22].mxu0 }
 0x2a6   : > { %v4565_v9 = vadd.f32 %v5847_v59, %v7609_v22  ;;  %v5849_v43 = vadd.f32 %v5792_v14, %v7592_v45  ;;  %v4340_v55 = vpop.f32.mrb[23].mxu0 }
 0x2a7   : > { %v4563_v37 = vadd.f32 %v5848_v13, %v7609_v22  ;;  %v5850_v61 = vadd.f32 %v4340_v55, %v7594_v26 }
 0x2a8   : > { %4621 = vst.msk [vmem:[%s7614_s5 + $0xb0] sm:$0xff] %vm835_vm2, %v4565_v9  ;;  %v4566_v1 = vadd.f32 %v5849_v43, %v7609_v22 }
 0x2a9   : > { %4619 = vst.msk [vmem:[%s7614_s5 + $0xa0] sm:$0xff] %vm835_vm2, %v4563_v37  ;;  %v4564_v23 = vadd.f32 %v5850_v61, %v7609_v22 }
 0x2aa   : > { %4622 = vst.msk [vmem:[%s7614_s5 + $0xb8] sm:$0xff] %vm835_vm2, %v4566_v1 }
 0x2ab   : > { %4620 = vst.msk [vmem:[%s7614_s5 + $0xa8] sm:$0xff] %vm835_vm2, %v4564_v23  ;;  %v5795_v8 = vpop.f32.mrb[24].mxu0 }
 0x2ac   : > { %v5851_v45 = vadd.f32 %v5795_v8, %v7596_v40  ;;  %v4353_v58 = vpop.f32.mrb[25].mxu0 }
 0x2ad   : > { %v5852_v26 = vadd.f32 %v4353_v58, %v7598_v2  ;;  %v5796_v6 = vpop.f32.mrb[26].mxu0 }
 0x2ae   : > { %v4569_v18 = vadd.f32 %v5851_v45, %v7609_v22  ;;  %v5853_v19 = vadd.f32 %v5796_v6, %v7600_v56  ;;  %v4356_v11 = vpop.f32.mrb[27].mxu0 }
 0x2af   : > { %v4567_v34 = vadd.f32 %v5852_v26, %v7609_v22  ;;  %v5854_v15 = vadd.f32 %v4356_v11, %v7603_v17 }
 0x2b0   : > { %4625 = vst.msk [vmem:[%s7614_s5 + $0xd0] sm:$0xff] %vm835_vm2, %v4569_v18  ;;  %v4570_v33 = vadd.f32 %v5853_v19, %v7609_v22 }
 0x2b1   : > { %v5567_v48 = vpop.f32.mrb[28].mxu1  ;;  %4623 = vst.msk [vmem:[%s7614_s5 + $0xc0] sm:$0xff] %vm835_vm2, %v4567_v34  ;;  %v4568_v40 = vadd.f32 %v5854_v15, %v7609_v22 }
 0x2b2   : > { %v2852_v2 = vpop.f32.mrb[29].mxu1  ;;  %4626 = vst.msk [vmem:[%s7614_s5 + $0xd8] sm:$0xff] %vm835_vm2, %v4570_v33 }
 0x2b3   : > { %v5568_v35 = vpop.f32.mrb[30].mxu1  ;;  %4624 = vst.msk [vmem:[%s7614_s5 + $0xc8] sm:$0xff] %vm835_vm2, %v4568_v40  ;;  %v5799_v39 = vpop.f32.mrb[28].mxu0 }
 0x2b4   : > { %v2855_v56 = vpop.f32.mrb[31].mxu1  ;;  %v5855_v17 = vadd.f32 %v5799_v39, %v5567_v48  ;;  %v4369_v49 = vpop.f32.mrb[29].mxu0 }
 0x2b5   : > { %v5856_v41 = vadd.f32 %v4369_v49, %v2852_v2  ;;  %v5800_v50 = vpop.f32.mrb[30].mxu0 }
 0x2b6   : > { %v4573_v47 = vadd.f32 %v5855_v17, %v7609_v22  ;;  %v5857_v51 = vadd.f32 %v5800_v50, %v5568_v35  ;;  %v4372_v54 = vpop.f32.mrb[31].mxu0 }
 0x2b7   : > { %v4571_v4 = vadd.f32 %v5856_v41, %v7609_v22  ;;  %v5858_v5 = vadd.f32 %v4372_v54, %v2855_v56 }
 0x2b8   : > { %4629 = vst.msk [vmem:[%s7614_s5 + $0xf0] sm:$0xff] %vm835_vm2, %v4573_v47  ;;  %v4574_v31 = vadd.f32 %v5857_v51, %v7609_v22 }
 0x2b9   : > { %v5571_v42 = vpop.f32.mrb[32].mxu1  ;;  %4627 = vst.msk [vmem:[%s7614_s5 + $0xe0] sm:$0xff] %vm835_vm2, %v4571_v4  ;;  %v4572_v30 = vadd.f32 %v5858_v5, %v7609_v22 }
 0x2ba   : > { %v2868_v0 = vpop.f32.mrb[33].mxu1  ;;  %4630 = vst.msk [vmem:[%s7614_s5 + $0xf8] sm:$0xff] %vm835_vm2, %v4574_v31 }
 0x2bb   : > { %v5572_v16 = vpop.f32.mrb[34].mxu1  ;;  %4628 = vst.msk [vmem:[%s7614_s5 + $0xe8] sm:$0xff] %vm835_vm2, %v4572_v30  ;;  %v5803_v12 = vpop.f32.mrb[32].mxu0 }
 0x2bc   : > { %v2871_v29 = vpop.f32.mrb[35].mxu1  ;;  %v5859_v44 = vadd.f32 %v5803_v12, %v5571_v42  ;;  %v4385_v60 = vpop.f32.mrb[33].mxu0 }
 0x2bd   : > { %v5860_v10 = vadd.f32 %v4385_v60, %v2868_v0  ;;  %v5804_v25 = vpop.f32.mrb[34].mxu0 }
 0x2be   : > { %v4577_v57 = vadd.f32 %v5859_v44, %v7609_v22  ;;  %v5861_v62 = vadd.f32 %v5804_v25, %v5572_v16  ;;  %v4388_v21 = vpop.f32.mrb[35].mxu0 }
 0x2bf   : > { %v4575_v53 = vadd.f32 %v5860_v10, %v7609_v22  ;;  %v5862_v28 = vadd.f32 %v4388_v21, %v2871_v29 }
 0x2c0   : > { %4633 = vst.msk [vmem:[%s7614_s5 + $0x110] sm:$0xff] %vm835_vm2, %v4577_v57  ;;  %v4578_v3 = vadd.f32 %v5861_v62, %v7609_v22 }
 0x2c1   : > { %v5575_v27 = vpop.f32.mrb[36].mxu1  ;;  %4631 = vst.msk [vmem:[%s7614_s5 + $0x100] sm:$0xff] %vm835_vm2, %v4575_v53  ;;  %v4576_v38 = vadd.f32 %v5862_v28, %v7609_v22 }
 0x2c2   : > { %v2884_v63 = vpop.f32.mrb[37].mxu1  ;;  %4634 = vst.msk [vmem:[%s7614_s5 + $0x118] sm:$0xff] %vm835_vm2, %v4578_v3 }
 0x2c3   : > { %v5576_v46 = vpop.f32.mrb[38].mxu1  ;;  %4632 = vst.msk [vmem:[%s7614_s5 + $0x108] sm:$0xff] %vm835_vm2, %v4576_v38  ;;  %v5807_v52 = vpop.f32.mrb[36].mxu0 }
 0x2c4   : > { %v2887_v24 = vpop.f32.mrb[39].mxu1  ;;  %v5863_v7 = vadd.f32 %v5807_v52, %v5575_v27  ;;  %v4401_v20 = vpop.f32.mrb[37].mxu0 }
 0x2c5   : > { %v5864_v36 = vadd.f32 %v4401_v20, %v2884_v63  ;;  %v5808_v59 = vpop.f32.mrb[38].mxu0 }
 0x2c6   : > { %v4581_v32 = vadd.f32 %v5863_v7, %v7609_v22  ;;  %v5865_v13 = vadd.f32 %v5808_v59, %v5576_v46  ;;  %v4404_v14 = vpop.f32.mrb[39].mxu0 }
 0x2c7   : > { %v4579_v9 = vadd.f32 %v5864_v36, %v7609_v22  ;;  %v5866_v43 = vadd.f32 %v4404_v14, %v2887_v24 }
 0x2c8   : > { %4637 = vst.msk [vmem:[%s7614_s5 + $0x130] sm:$0xff] %vm835_vm2, %v4581_v32  ;;  %v4582_v55 = vadd.f32 %v5865_v13, %v7609_v22 }
 0x2c9   : > { %v5579_v37 = vpop.f32.mrb[40].mxu1  ;;  %4635 = vst.msk [vmem:[%s7614_s5 + $0x120] sm:$0xff] %vm835_vm2, %v4579_v9  ;;  %v4580_v61 = vadd.f32 %v5866_v43, %v7609_v22 }
 0x2ca   : > { %v2900_v1 = vpop.f32.mrb[41].mxu1  ;;  %4638 = vst.msk [vmem:[%s7614_s5 + $0x138] sm:$0xff] %vm835_vm2, %v4582_v55 }
 0x2cb   : > { %v5580_v23 = vpop.f32.mrb[42].mxu1  ;;  %4636 = vst.msk [vmem:[%s7614_s5 + $0x128] sm:$0xff] %vm835_vm2, %v4580_v61  ;;  %v5811_v45 = vpop.f32.mrb[40].mxu0 }
 0x2cc   : > { %v2903_v8 = vpop.f32.mrb[43].mxu1  ;;  %v5867_v58 = vadd.f32 %v5811_v45, %v5579_v37  ;;  %v4417_v26 = vpop.f32.mrb[41].mxu0 }
 0x2cd   : > { %v5868_v6 = vadd.f32 %v4417_v26, %v2900_v1  ;;  %v5812_v18 = vpop.f32.mrb[42].mxu0 }
 0x2ce   : > { %v4585_v19 = vadd.f32 %v5867_v58, %v7609_v22  ;;  %v5869_v11 = vadd.f32 %v5812_v18, %v5580_v23  ;;  %v4420_v34 = vpop.f32.mrb[43].mxu0 }
 0x2cf   : > { %v4583_v15 = vadd.f32 %v5868_v6, %v7609_v22  ;;  %v5870_v33 = vadd.f32 %v4420_v34, %v2903_v8 }
 0x2d0   : > { %4641 = vst.msk [vmem:[%s7614_s5 + $0x150] sm:$0xff] %vm835_vm2, %v4585_v19  ;;  %v4586_v48 = vadd.f32 %v5869_v11, %v7609_v22 }
 0x2d1   : > { %v5583_v40 = vpop.f32.mrb[44].mxu1  ;;  %4639 = vst.msk [vmem:[%s7614_s5 + $0x140] sm:$0xff] %vm835_vm2, %v4583_v15  ;;  %v4584_v2 = vadd.f32 %v5870_v33, %v7609_v22 }
 0x2d2   : > { %v2916_v35 = vpop.f32.mrb[45].mxu1  ;;  %4642 = vst.msk [vmem:[%s7614_s5 + $0x158] sm:$0xff] %vm835_vm2, %v4586_v48 }
 0x2d3   : > { %v5584_v56 = vpop.f32.mrb[46].mxu1  ;;  %4640 = vst.msk [vmem:[%s7614_s5 + $0x148] sm:$0xff] %vm835_vm2, %v4584_v2  ;;  %v5815_v17 = vpop.f32.mrb[44].mxu0 }
 0x2d4   : > { %v2919_v39 = vpop.f32.mrb[47].mxu1  ;;  %v5871_v49 = vadd.f32 %v5815_v17, %v5583_v40  ;;  %v4433_v41 = vpop.f32.mrb[45].mxu0 }
 0x2d5   : > { %v5872_v50 = vadd.f32 %v4433_v41, %v2916_v35  ;;  %v5816_v47 = vpop.f32.mrb[46].mxu0 }
 0x2d6   : > { %v4589_v51 = vadd.f32 %v5871_v49, %v7609_v22  ;;  %v5873_v54 = vadd.f32 %v5816_v47, %v5584_v56  ;;  %v4436_v4 = vpop.f32.mrb[47].mxu0 }
 0x2d7   : > { %v4587_v5 = vadd.f32 %v5872_v50, %v7609_v22  ;;  %v5874_v31 = vadd.f32 %v4436_v4, %v2919_v39 }
 0x2d8   : > { %4645 = vst.msk [vmem:[%s7614_s5 + $0x170] sm:$0xff] %vm835_vm2, %v4589_v51  ;;  %v4590_v42 = vadd.f32 %v5873_v54, %v7609_v22 }
 0x2d9   : > { %v5587_v30 = vpop.f32.mrb[48].mxu1  ;;  %4643 = vst.msk [vmem:[%s7614_s5 + $0x160] sm:$0xff] %vm835_vm2, %v4587_v5  ;;  %v4588_v0 = vadd.f32 %v5874_v31, %v7609_v22 }
 0x2da   : > { %v2932_v16 = vpop.f32.mrb[49].mxu1  ;;  %4646 = vst.msk [vmem:[%s7614_s5 + $0x178] sm:$0xff] %vm835_vm2, %v4590_v42 }
 0x2db   : > { %v5588_v29 = vpop.f32.mrb[50].mxu1  ;;  %4644 = vst.msk [vmem:[%s7614_s5 + $0x168] sm:$0xff] %vm835_vm2, %v4588_v0  ;;  %v5819_v44 = vpop.f32.mrb[48].mxu0 }
 0x2dc   : > { %v2935_v12 = vpop.f32.mrb[51].mxu1  ;;  %v5875_v60 = vadd.f32 %v5819_v44, %v5587_v30  ;;  %v4449_v10 = vpop.f32.mrb[49].mxu0 }
 0x2dd   : > { %v5876_v25 = vadd.f32 %v4449_v10, %v2932_v16  ;;  %v5820_v57 = vpop.f32.mrb[50].mxu0 }
 0x2de   : > { %v4593_v62 = vadd.f32 %v5875_v60, %v7609_v22  ;;  %v5877_v21 = vadd.f32 %v5820_v57, %v5588_v29  ;;  %v4452_v53 = vpop.f32.mrb[51].mxu0 }
 0x2df   : > { %v4591_v28 = vadd.f32 %v5876_v25, %v7609_v22  ;;  %v5878_v3 = vadd.f32 %v4452_v53, %v2935_v12 }
 0x2e0   : > { %4649 = vst.msk [vmem:[%s7614_s5 + $0x190] sm:$0xff] %vm835_vm2, %v4593_v62  ;;  %v4594_v27 = vadd.f32 %v5877_v21, %v7609_v22 }
 0x2e1   : > { %v5591_v38 = vpop.f32.mrb[52].mxu1  ;;  %4647 = vst.msk [vmem:[%s7614_s5 + $0x180] sm:$0xff] %vm835_vm2, %v4591_v28  ;;  %v4592_v63 = vadd.f32 %v5878_v3, %v7609_v22 }
 0x2e2   : > { %v2948_v46 = vpop.f32.mrb[53].mxu1  ;;  %4650 = vst.msk [vmem:[%s7614_s5 + $0x198] sm:$0xff] %vm835_vm2, %v4594_v27 }
 0x2e3   : > { %v5592_v24 = vpop.f32.mrb[54].mxu1  ;;  %4648 = vst.msk [vmem:[%s7614_s5 + $0x188] sm:$0xff] %vm835_vm2, %v4592_v63  ;;  %v5823_v7 = vpop.f32.mrb[52].mxu0 }
 0x2e4   : > { %v2951_v52 = vpop.f32.mrb[55].mxu1  ;;  %v5879_v20 = vadd.f32 %v5823_v7, %v5591_v38  ;;  %v4465_v36 = vpop.f32.mrb[53].mxu0 }
 0x2e5   : > { %v5880_v59 = vadd.f32 %v4465_v36, %v2948_v46  ;;  %v5824_v32 = vpop.f32.mrb[54].mxu0 }
 0x2e6   : > { %v4597_v13 = vadd.f32 %v5879_v20, %v7609_v22  ;;  %v5881_v14 = vadd.f32 %v5824_v32, %v5592_v24  ;;  %v4468_v9 = vpop.f32.mrb[55].mxu0 }
 0x2e7   : > { %v4595_v43 = vadd.f32 %v5880_v59, %v7609_v22  ;;  %v5882_v55 = vadd.f32 %v4468_v9, %v2951_v52 }
 0x2e8   : > { %4653 = vst.msk [vmem:[%s7614_s5 + $0x1b0] sm:$0xff] %vm835_vm2, %v4597_v13  ;;  %v4598_v37 = vadd.f32 %v5881_v14, %v7609_v22 }
 0x2e9   : > { %4651 = vst.msk [vmem:[%s7614_s5 + $0x1a0] sm:$0xff] %vm835_vm2, %v4595_v43  ;;  %v4596_v61 = vadd.f32 %v5882_v55, %v7609_v22 }
 0x2ea   : > { %4654 = vst.msk [vmem:[%s7614_s5 + $0x1b8] sm:$0xff] %vm835_vm2, %v4598_v37 }
 0x2eb   : > { %4652 = vst.msk [vmem:[%s7614_s5 + $0x1a8] sm:$0xff] %vm835_vm2, %v4596_v61 }
 0x2ec PF: > { %s14_s15 = sadd.s32 1, %s6380_s15  }
 0x2ed   : > { %p11_p6 = scmp.ge.s32.totalorder %s14_s15, 4  }
 0x2ef   :  { %13 = sbr.rel (!%p11_p6) target bundleno = 1 (0x1), region = 77 }

</bundles_post_ra>
